<compile_context>
chip_gen: v7x
topology: tpu7x:2x2x1
jax: 0.10.0
libtpu: 0.0.40
codegen_flags: <defaults>
</compile_context>

<pallas_src>
import functools

import jax
import jax.numpy as jnp
from jax import lax
from jax.experimental import pallas as pl
from jax.experimental.pallas import tpu as pltpu


# ----------------------------- Pallas kernel -------------------------------

def _bottleneck_kernel(x_ref, w1_ref, b1_ref, w2_ref, b2_ref, w3_ref, b3_ref,
                       o_ref, h1p_ref, patch_ref, *, H, W):
    """Fused bottleneck for one image; rows = H*W pixels, lanes = channels.

    x_ref    : (HW, Cin)       io dtype (also the identity shortcut)
    w1_ref   : (Cin, Cmid)     bf16 (BN scale folded)   b1_ref: (1, Cmid) f32
    w2_ref   : (9*Cmid, Cmid)  bf16, rows t*Cmid..(t+1)*Cmid are tap t=ky*3+kx
    b2_ref   : (1, Cmid)       f32
    w3_ref   : (Cmid, Cout)    bf16                     b3_ref: (1, Cout) f32
    o_ref    : (HW, Cout)      io dtype
    h1p_ref  : VMEM scratch (HW + 2*PADR, Cmid) bf16  (h1 with slack rows)
    patch_ref: VMEM scratch (HW, 9*Cmid)        bf16  (im2col patch)
    """
    HW = H * W
    cmid = w1_ref.shape[1]
    PADR = ((W + 1 + 7) // 8) * 8   # sublane-aligned slack so tap slices stay in-bounds

    # ---- conv1 (1x1) -> +bias -> ReLU, stored once as bf16 -----------------
    h1 = jnp.dot(x_ref[...].astype(jnp.bfloat16), w1_ref[...],
                 preferred_element_type=jnp.float32)
    h1 = jnp.maximum(h1 + b1_ref[...], 0.0)
    h1p_ref[PADR:PADR + HW, :] = h1.astype(jnp.bfloat16)

    # ---- conv2 (3x3, pad=1): build bf16 im2col patch, then ONE matmul ------
    # Boundary handling: a flat slice at offset oy*W + ox gives the shifted
    # pixel; rows whose source pixel falls outside the image (x or y wrap) are
    # zeroed by a select against tiny (HW, 1) iota masks, so the slack rows of
    # h1p_ref never need initialisation (uninitialised reads are masked away).
    row = lax.broadcasted_iota(jnp.int32, (HW, 1), 0)
    col = row % W
    ok_l = col >= 1          # valid when ox == -1
    ok_r = col <= W - 2      # valid when ox == +1
    ok_t = row >= W          # valid when oy == -1
    ok_b = row < HW - W      # valid when oy == +1
    zero = jnp.zeros((), jnp.bfloat16)

    for oy in (-1, 0, 1):
        for ox in (-1, 0, 1):
            t = (oy + 1) * 3 + (ox + 1)
            start = PADR + oy * W + ox
            patch = h1p_ref[start:start + HW, :]
            conds = []
            if oy == -1:
                conds.append(ok_t)
            elif oy == 1:
                conds.append(ok_b)
            if ox == -1:
                conds.append(ok_l)
            elif ox == 1:
                conds.append(ok_r)
            if conds:
                m = conds[0]
                for c in conds[1:]:
                    m = jnp.logical_and(m, c)
                patch = jnp.where(m, patch, zero)
            patch_ref[:, t * cmid:(t + 1) * cmid] = patch

    h2 = jnp.dot(patch_ref[...], w2_ref[...],       # K = 9*Cmid, f32 acc
                 preferred_element_type=jnp.float32)
    h2 = jnp.maximum(h2 + b2_ref[...], 0.0)

    # ---- conv3 (1x1) -> +bias -> ReLU -> identity shortcut -----------------
    y = jnp.dot(h2.astype(jnp.bfloat16), w3_ref[...],
                preferred_element_type=jnp.float32)
    y = jnp.maximum(y + b3_ref[...], 0.0)
    # Re-read x here (short live range) for the residual add.
    o_ref[...] = (y + x_ref[...].astype(jnp.float32)).astype(o_ref.dtype)


# ------------------------------- wrapper ------------------------------------

def _vmem_budget_bytes(HW, PADR, Cin, Cmid, Cout, io_bytes):
    """VMEM limit derived from actual block sizes (lane-padded), with margin."""
    def lanes(c):
        return ((c + 127) // 128) * 128
    io_blocks = 2 * HW * (lanes(Cin) + lanes(Cout)) * io_bytes      # x/out double-buffered
    weights = 2 * 2 * (Cin * lanes(Cmid) + 9 * Cmid * lanes(Cmid) + Cmid * lanes(Cout))
    biases = 2 * 4 * (lanes(Cmid) * 2 + lanes(Cout))
    scratch = ((HW + 2 * PADR) * lanes(Cmid) + HW * lanes(9 * Cmid)) * 2
    est = io_blocks + weights + biases + scratch
    return int(min(max(2 * est + (4 << 20), 16 << 20), 96 << 20))


def bottleneck_forward_rows(x2d, params, N, H, W):
    """Fused bottleneck on activations in (N*H*W, C) row layout (NHWC-flat)."""
    w1, b1 = params["w1"], params["b1"]
    w2, b2 = params["w2"], params["b2"]
    w3, b3 = params["w3"], params["b3"]
    Cin = x2d.shape[1]
    Cmid, Cout = w1.shape[1], w3.shape[1]
    assert Cout == Cin, "identity shortcut requires Cout == Cin"
    HW = H * W
    assert x2d.shape[0] == N * HW
    assert HW % 8 == 0, "rows per image must be sublane-aligned"
    PADR = ((W + 1 + 7) // 8) * 8

    io_dtype = x2d.dtype
    io_bytes = jnp.dtype(io_dtype).itemsize
    w2_flat = w2.reshape(9 * Cmid, Cmid)       # tap-major rows for im2col matmul

    def const(shape):
        return pl.BlockSpec(shape, lambda n: (0,) * len(shape))

    kernel = functools.partial(_bottleneck_kernel, H=H, W=W)
    vmem_limit = _vmem_budget_bytes(HW, PADR, Cin, Cmid, Cout, io_bytes)

    out2d = pl.pallas_call(
        kernel,
        out_shape=jax.ShapeDtypeStruct((N * HW, Cout), io_dtype),
        grid=(N,),
        in_specs=[
            pl.BlockSpec((HW, Cin), lambda n: (n, 0)),   # x: one image per step
            const((Cin, Cmid)),                          # w1 (bf16, BN folded)
            const((1, Cmid)),                            # b1
            const((9 * Cmid, Cmid)),                     # w2 (bf16, tap-major)
            const((1, Cmid)),                            # b2
            const((Cmid, Cout)),                         # w3
            const((1, Cout)),                            # b3
        ],
        out_specs=pl.BlockSpec((HW, Cout), lambda n: (n, 0)),
        scratch_shapes=[
            pltpu.VMEM((HW + 2 * PADR, Cmid), jnp.bfloat16),   # padded h1 (bf16)
            pltpu.VMEM((HW, 9 * Cmid), jnp.bfloat16),          # im2col patch (bf16)
        ],
        compiler_params=pltpu.CompilerParams(
            dimension_semantics=("parallel",),           # megacore-shard over N
            vmem_limit_bytes=vmem_limit),
    )(x2d, w1, b1, w2_flat, b2, w3, b3)
    return out2d


def bottleneck_forward(x_nchw, params, io_dtype=jnp.float32):
    """BottleneckBlock.forward (stride=1, downsample=None). Input NCHW.

    TODO(synk): in a full model, do the NCHW<->rows layout change once at model
    entry and chain blocks with `bottleneck_forward_rows` (the per-block
    transpose here roughly doubles the HBM traffic of a single block).
    """
    N, Cin, H, W = x_nchw.shape
    x2d = jnp.transpose(x_nchw, (0, 2, 3, 1)).reshape(N * H * W, Cin)
    x2d = x2d.astype(io_dtype)
    out2d = bottleneck_forward_rows(x2d, params, N, H, W)
    out = out2d.reshape(N, H, W, -1)
    return jnp.transpose(out, (0, 3, 1, 2))              # back to NCHW


# ------------------------------- parameters ---------------------------------

def _fold_bn_into(w, gamma, beta, mean, var, eps):
    """Fold eval-mode BatchNorm into the conv: (bf16 scaled weight, f32 bias)."""
    scale = gamma / jnp.sqrt(var + eps)
    bias = beta - mean * scale
    return (w * scale).astype(jnp.bfloat16), bias[None, :].astype(jnp.float32)


def init_params(key, in_channels, out_channels, expansion=4, eps=1e-5):
    cmid = out_channels
    cout = out_channels * expansion
    k1, k2, k3 = jax.random.split(key, 3)
    # Conv weights directly in matmul layout:
    #   w1: (Cin, Cmid); w2: (9, Cmid, Cmid) with tap t = ky*3+kx; w3: (Cmid, Cout)
    w1 = 0.1 * jax.random.normal(k1, (in_channels, cmid), jnp.float32)
    w2 = 0.1 * jax.random.normal(k2, (9, cmid, cmid), jnp.float32)
    w3 = 0.1 * jax.random.normal(k3, (cmid, cout), jnp.float32)

    def bn_stats(c):  # PyTorch BatchNorm2d defaults (eval mode)
        return (jnp.ones((c,), jnp.float32), jnp.zeros((c,), jnp.float32),
                jnp.zeros((c,), jnp.float32), jnp.ones((c,), jnp.float32))

    w1f, b1 = _fold_bn_into(w1, *bn_stats(cmid), eps)
    w2f, b2 = _fold_bn_into(w2, *bn_stats(cmid), eps)
    w3f, b3 = _fold_bn_into(w3, *bn_stats(cout), eps)
    return dict(w1=w1f, b1=b1, w2=w2f, b2=b2, w3=w3f, b3=b3)


# ------------------------------- reference ----------------------------------

def reference_forward(x_nchw, params):
    """Pure-JAX (lax.conv) reference using the same folded bf16 weights."""
    w1, b1 = params["w1"], params["b1"]
    w2, b2 = params["w2"], params["b2"]
    w3, b3 = params["w3"], params["b3"]
    Cmid, Cout = w1.shape[1], w3.shape[1]
    x = jnp.transpose(x_nchw, (0, 2, 3, 1)).astype(jnp.float32)
    dn = ("NHWC", "HWIO", "NHWC")

    def conv(a, w, padding):
        return lax.conv_general_dilated(
            a.astype(jnp.bfloat16), w, (1, 1), padding,
            dimension_numbers=dn, preferred_element_type=jnp.float32)

    y = jnp.maximum(conv(x, w1.reshape(1, 1, -1, Cmid), "VALID") + b1[0], 0.0)
    y = jnp.maximum(conv(y, w2.reshape(3, 3, Cmid, Cmid), "SAME") + b2[0], 0.0)
    y = jnp.maximum(conv(y, w3.reshape(1, 1, Cmid, Cout), "VALID") + b3[0], 0.0)
    y = y + x
    return jnp.transpose(y, (0, 3, 1, 2))


if __name__ == "__main__":
    key = jax.random.PRNGKey(0)
    kx, kp = jax.random.split(key)

    N, out_channels, H, W = 2, 4, 16, 16
    Cin = out_channels * 4            # identity shortcut requires Cin == Cmid*4
    x = jax.random.normal(kx, (N, Cin, H, W), jnp.float32)
    params = init_params(kp, Cin, out_channels)

    # f32 activation I/O (matches the PyTorch module's fp32 forward)
    out = jax.block_until_ready(bottleneck_forward(x, params))
    ref = jax.block_until_ready(reference_forward(x, params))
    assert out.shape == (N, out_channels * 4, H, W), out.shape
    max_err = float(jnp.max(jnp.abs(out - ref)))
    assert jnp.allclose(out, ref, rtol=2e-3, atol=2e-3), max_err

    # bf16 activation I/O option (halves HBM bytes for x/out; f32 accumulation
    # and the bias/ReLU/residual epilogue stay in f32 inside the kernel).
    out_bf16 = jax.block_until_ready(
        bottleneck_forward(x, params, io_dtype=jnp.bfloat16))
    assert out_bf16.shape == out.shape and out_bf16.dtype == jnp.bfloat16
    assert jnp.allclose(out_bf16.astype(jnp.float32), ref, rtol=0.1, atol=0.1)

    print("KERNEL_OK")
</pallas_src>

<mosaic_0001>
module attributes {stable_mosaic.version = 11 : i64} {
  func.func @_bottleneck_kernel(%arg0: i32, %arg1: memref<256x16xf32, #tpu.memory_space<vmem>>, %arg2: memref<16x4xbf16, #tpu.memory_space<vmem>>, %arg3: memref<1x4xf32, #tpu.memory_space<vmem>>, %arg4: memref<36x4xbf16, #tpu.memory_space<vmem>>, %arg5: memref<1x4xf32, #tpu.memory_space<vmem>>, %arg6: memref<4x16xbf16, #tpu.memory_space<vmem>>, %arg7: memref<1x16xf32, #tpu.memory_space<vmem>>, %arg8: memref<256x16xf32, #tpu.memory_space<vmem>>, %arg9: memref<304x4xbf16, #tpu.memory_space<vmem>>, %arg10: memref<256x36xbf16, #tpu.memory_space<vmem>>) attributes {dimension_semantics = [#tpu.dimension_semantics<parallel>], iteration_bounds = array<i64: 2>, scalar_prefetch = 0 : i64, scratch_operands = 2 : i64, tpu.core_type = #tpu.core_type<tc>, window_params = [{transform_indices = @transform_0, window_bounds = array<i64: 256, 16>}, {pipeline_mode = #tpu.pipeline_mode<synchronous>, transform_indices = @transform_1, window_bounds = array<i64: 16, 4>}, {pipeline_mode = #tpu.pipeline_mode<synchronous>, transform_indices = @transform_2, window_bounds = array<i64: 1, 4>}, {pipeline_mode = #tpu.pipeline_mode<synchronous>, transform_indices = @transform_3, window_bounds = array<i64: 36, 4>}, {pipeline_mode = #tpu.pipeline_mode<synchronous>, transform_indices = @transform_4, window_bounds = array<i64: 1, 4>}, {pipeline_mode = #tpu.pipeline_mode<synchronous>, transform_indices = @transform_5, window_bounds = array<i64: 4, 16>}, {pipeline_mode = #tpu.pipeline_mode<synchronous>, transform_indices = @transform_6, window_bounds = array<i64: 1, 16>}, {transform_indices = @transform_7, window_bounds = array<i64: 256, 16>}]} {
    %c0 = arith.constant 0 : index
    %c0_0 = arith.constant 0 : index
    %0 = vector.load %arg1[%c0, %c0_0] : memref<256x16xf32, #tpu.memory_space<vmem>>, vector<256x16xf32>
    %1 = arith.truncf %0 : vector<256x16xf32> to vector<256x16xbf16>
    %c0_1 = arith.constant 0 : index
    %c0_2 = arith.constant 0 : index
    %2 = vector.load %arg2[%c0_1, %c0_2] : memref<16x4xbf16, #tpu.memory_space<vmem>>, vector<16x4xbf16>
    %cst = arith.constant dense<0.000000e+00> : vector<256x4xf32>
    %3 = tpu.matmul %1, %2, %cst {dimension_numbers = #tpu.dot_dimension_numbers<[1], [0], [0], [1], [0, 0, 1, 1], [], []>} : vector<256x16xbf16>, vector<16x4xbf16>, vector<256x4xf32> -> vector<256x4xf32>
    %c0_3 = arith.constant 0 : index
    %c0_4 = arith.constant 0 : index
    %4 = vector.load %arg3[%c0_3, %c0_4] : memref<1x4xf32, #tpu.memory_space<vmem>>, vector<1x4xf32>
    %5 = vector.broadcast %4 : vector<1x4xf32> to vector<256x4xf32>
    %6 = arith.addf %3, %5 : vector<256x4xf32>
    %cst_5 = arith.constant 0.000000e+00 : f32
    %7 = vector.broadcast %cst_5 : f32 to vector<256x4xf32>
    %8 = arith.maximumf %6, %7 : vector<256x4xf32>
    %9 = arith.truncf %8 : vector<256x4xf32> to vector<256x4xbf16>
    %c24 = arith.constant 24 : index
    %c0_6 = arith.constant 0 : index
    %10 = vector.load %arg9[%c24, %c0_6] : memref<304x4xbf16, #tpu.memory_space<vmem>>, vector<256x4xbf16>
    tpu.vector_store %arg9[%c24, %c0_6], %9 {strides = array<i32>} : memref<304x4xbf16, #tpu.memory_space<vmem>>, vector<256x4xbf16>,
    %11 = tpu.iota {dimensions = array<i32: 0>} : vector<256x1xi32>
    %c16_i32 = arith.constant 16 : i32
    %c0_i32 = arith.constant 0 : i32
    %12 = arith.cmpi eq, %c16_i32, %c0_i32 : i32
    %c1_i32 = arith.constant 1 : i32
    %13 = arith.select %12, %c1_i32, %c16_i32 : i32
    %14 = vector.broadcast %13 : i32 to vector<256x1xi32>
    %15 = arith.remsi %11, %14 : vector<256x1xi32>
    %c0_i32_7 = arith.constant 0 : i32
    %16 = vector.broadcast %c0_i32_7 : i32 to vector<256x1xi32>
    %17 = arith.cmpi ne, %15, %16 : vector<256x1xi32>
    %c0_i32_8 = arith.constant 0 : i32
    %18 = vector.broadcast %c0_i32_8 : i32 to vector<256x1xi32>
    %19 = arith.cmpi slt, %15, %18 : vector<256x1xi32>
    %c0_i32_9 = arith.constant 0 : i32
    %20 = arith.cmpi slt, %13, %c0_i32_9 : i32
    %21 = vector.broadcast %20 : i1 to vector<256x1xi1>
    %22 = vector.broadcast %21 : vector<256x1xi1> to vector<256x1xi1>
    %23 = arith.xori %19, %22 : vector<256x1xi1>
    %24 = arith.andi %23, %17 : vector<256x1xi1>
    %25 = vector.broadcast %13 : i32 to vector<256x1xi32>
    %26 = arith.addi %15, %25 : vector<256x1xi32>
    %27 = arith.select %24, %26, %15 : vector<256x1xi1>, vector<256x1xi32>
    %c1_i32_10 = arith.constant 1 : i32
    %28 = vector.broadcast %c1_i32_10 : i32 to vector<256x1xi32>
    %29 = arith.cmpi sge, %27, %28 : vector<256x1xi32>
    %c14_i32 = arith.constant 14 : i32
    %30 = vector.broadcast %c14_i32 : i32 to vector<256x1xi32>
    %31 = arith.cmpi sle, %27, %30 : vector<256x1xi32>
    %c16_i32_11 = arith.constant 16 : i32
    %32 = vector.broadcast %c16_i32_11 : i32 to vector<256x1xi32>
    %33 = arith.cmpi sge, %11, %32 : vector<256x1xi32>
    %c240_i32 = arith.constant 240 : i32
    %34 = vector.broadcast %c240_i32 : i32 to vector<256x1xi32>
    %35 = arith.cmpi slt, %11, %34 : vector<256x1xi32>
    %c7 = arith.constant 7 : index
    %c0_12 = arith.constant 0 : index
    %36 = vector.load %arg9[%c7, %c0_12] : memref<304x4xbf16, #tpu.memory_space<vmem>>, vector<256x4xbf16>
    %37 = arith.andi %33, %29 : vector<256x1xi1>
    %cst_13 = arith.constant 0.000000e+00 : bf16
    %38 = vector.shape_cast %37 : vector<256x1xi1> to vector<256x1xi1>
    %39 = vector.broadcast %38 : vector<256x1xi1> to vector<256x4xi1>
    %40 = vector.broadcast %cst_13 : bf16 to vector<256x4xbf16>
    %41 = arith.select %39, %36, %40 : vector<256x4xi1>, vector<256x4xbf16>
    %c0_14 = arith.constant 0 : index
    %c0_15 = arith.constant 0 : index
    %42 = vector.load %arg10[%c0_14, %c0_15] : memref<256x36xbf16, #tpu.memory_space<vmem>>, vector<256x4xbf16>
    tpu.vector_store %arg10[%c0_14, %c0_15], %41 {strides = array<i32>} : memref<256x36xbf16, #tpu.memory_space<vmem>>, vector<256x4xbf16>,
    %c8 = arith.constant 8 : index
    %c0_16 = arith.constant 0 : index
    %43 = vector.load %arg9[%c8, %c0_16] : memref<304x4xbf16, #tpu.memory_space<vmem>>, vector<256x4xbf16>
    %cst_17 = arith.constant 0.000000e+00 : bf16
    %44 = vector.shape_cast %33 : vector<256x1xi1> to vector<256x1xi1>
    %45 = vector.broadcast %44 : vector<256x1xi1> to vector<256x4xi1>
    %46 = vector.broadcast %cst_17 : bf16 to vector<256x4xbf16>
    %47 = arith.select %45, %43, %46 : vector<256x4xi1>, vector<256x4xbf16>
    %c0_18 = arith.constant 0 : index
    %c4 = arith.constant 4 : index
    %48 = vector.load %arg10[%c0_18, %c4] : memref<256x36xbf16, #tpu.memory_space<vmem>>, vector<256x4xbf16>
    tpu.vector_store %arg10[%c0_18, %c4], %47 {strides = array<i32>} : memref<256x36xbf16, #tpu.memory_space<vmem>>, vector<256x4xbf16>,
    %c9 = arith.constant 9 : index
    %c0_19 = arith.constant 0 : index
    %49 = vector.load %arg9[%c9, %c0_19] : memref<304x4xbf16, #tpu.memory_space<vmem>>, vector<256x4xbf16>
    %50 = arith.andi %33, %31 : vector<256x1xi1>
    %cst_20 = arith.constant 0.000000e+00 : bf16
    %51 = vector.shape_cast %50 : vector<256x1xi1> to vector<256x1xi1>
    %52 = vector.broadcast %51 : vector<256x1xi1> to vector<256x4xi1>
    %53 = vector.broadcast %cst_20 : bf16 to vector<256x4xbf16>
    %54 = arith.select %52, %49, %53 : vector<256x4xi1>, vector<256x4xbf16>
    %c0_21 = arith.constant 0 : index
    %c8_22 = arith.constant 8 : index
    %55 = vector.load %arg10[%c0_21, %c8_22] : memref<256x36xbf16, #tpu.memory_space<vmem>>, vector<256x4xbf16>
    tpu.vector_store %arg10[%c0_21, %c8_22], %54 {strides = array<i32>} : memref<256x36xbf16, #tpu.memory_space<vmem>>, vector<256x4xbf16>,
    %c23 = arith.constant 23 : index
    %c0_23 = arith.constant 0 : index
    %56 = vector.load %arg9[%c23, %c0_23] : memref<304x4xbf16, #tpu.memory_space<vmem>>, vector<256x4xbf16>
    %cst_24 = arith.constant 0.000000e+00 : bf16
    %57 = vector.shape_cast %29 : vector<256x1xi1> to vector<256x1xi1>
    %58 = vector.broadcast %57 : vector<256x1xi1> to vector<256x4xi1>
    %59 = vector.broadcast %cst_24 : bf16 to vector<256x4xbf16>
    %60 = arith.select %58, %56, %59 : vector<256x4xi1>, vector<256x4xbf16>
    %c0_25 = arith.constant 0 : index
    %c12 = arith.constant 12 : index
    %61 = vector.load %arg10[%c0_25, %c12] : memref<256x36xbf16, #tpu.memory_space<vmem>>, vector<256x4xbf16>
    tpu.vector_store %arg10[%c0_25, %c12], %60 {strides = array<i32>} : memref<256x36xbf16, #tpu.memory_space<vmem>>, vector<256x4xbf16>,
    %c24_26 = arith.constant 24 : index
    %c0_27 = arith.constant 0 : index
    %62 = vector.load %arg9[%c24_26, %c0_27] : memref<304x4xbf16, #tpu.memory_space<vmem>>, vector<256x4xbf16>
    %c0_28 = arith.constant 0 : index
    %c16 = arith.constant 16 : index
    %63 = vector.load %arg10[%c0_28, %c16] : memref<256x36xbf16, #tpu.memory_space<vmem>>, vector<256x4xbf16>
    tpu.vector_store %arg10[%c0_28, %c16], %62 {strides = array<i32>} : memref<256x36xbf16, #tpu.memory_space<vmem>>, vector<256x4xbf16>,
    %c25 = arith.constant 25 : index
    %c0_29 = arith.constant 0 : index
    %64 = vector.load %arg9[%c25, %c0_29] : memref<304x4xbf16, #tpu.memory_space<vmem>>, vector<256x4xbf16>
    %cst_30 = arith.constant 0.000000e+00 : bf16
    %65 = vector.shape_cast %31 : vector<256x1xi1> to vector<256x1xi1>
    %66 = vector.broadcast %65 : vector<256x1xi1> to vector<256x4xi1>
    %67 = vector.broadcast %cst_30 : bf16 to vector<256x4xbf16>
    %68 = arith.select %66, %64, %67 : vector<256x4xi1>, vector<256x4xbf16>
    %c0_31 = arith.constant 0 : index
    %c20 = arith.constant 20 : index
    %69 = vector.load %arg10[%c0_31, %c20] : memref<256x36xbf16, #tpu.memory_space<vmem>>, vector<256x4xbf16>
    tpu.vector_store %arg10[%c0_31, %c20], %68 {strides = array<i32>} : memref<256x36xbf16, #tpu.memory_space<vmem>>, vector<256x4xbf16>,
    %c39 = arith.constant 39 : index
    %c0_32 = arith.constant 0 : index
    %70 = vector.load %arg9[%c39, %c0_32] : memref<304x4xbf16, #tpu.memory_space<vmem>>, vector<256x4xbf16>
    %71 = arith.andi %35, %29 : vector<256x1xi1>
    %cst_33 = arith.constant 0.000000e+00 : bf16
    %72 = vector.shape_cast %71 : vector<256x1xi1> to vector<256x1xi1>
    %73 = vector.broadcast %72 : vector<256x1xi1> to vector<256x4xi1>
    %74 = vector.broadcast %cst_33 : bf16 to vector<256x4xbf16>
    %75 = arith.select %73, %70, %74 : vector<256x4xi1>, vector<256x4xbf16>
    %c0_34 = arith.constant 0 : index
    %c24_35 = arith.constant 24 : index
    %76 = vector.load %arg10[%c0_34, %c24_35] : memref<256x36xbf16, #tpu.memory_space<vmem>>, vector<256x4xbf16>
    tpu.vector_store %arg10[%c0_34, %c24_35], %75 {strides = array<i32>} : memref<256x36xbf16, #tpu.memory_space<vmem>>, vector<256x4xbf16>,
    %c40 = arith.constant 40 : index
    %c0_36 = arith.constant 0 : index
    %77 = vector.load %arg9[%c40, %c0_36] : memref<304x4xbf16, #tpu.memory_space<vmem>>, vector<256x4xbf16>
    %cst_37 = arith.constant 0.000000e+00 : bf16
    %78 = vector.shape_cast %35 : vector<256x1xi1> to vector<256x1xi1>
    %79 = vector.broadcast %78 : vector<256x1xi1> to vector<256x4xi1>
    %80 = vector.broadcast %cst_37 : bf16 to vector<256x4xbf16>
    %81 = arith.select %79, %77, %80 : vector<256x4xi1>, vector<256x4xbf16>
    %c0_38 = arith.constant 0 : index
    %c28 = arith.constant 28 : index
    %82 = vector.load %arg10[%c0_38, %c28] : memref<256x36xbf16, #tpu.memory_space<vmem>>, vector<256x4xbf16>
    tpu.vector_store %arg10[%c0_38, %c28], %81 {strides = array<i32>} : memref<256x36xbf16, #tpu.memory_space<vmem>>, vector<256x4xbf16>,
    %c41 = arith.constant 41 : index
    %c0_39 = arith.constant 0 : index
    %83 = vector.load %arg9[%c41, %c0_39] : memref<304x4xbf16, #tpu.memory_space<vmem>>, vector<256x4xbf16>
    %84 = arith.andi %35, %31 : vector<256x1xi1>
    %cst_40 = arith.constant 0.000000e+00 : bf16
    %85 = vector.shape_cast %84 : vector<256x1xi1> to vector<256x1xi1>
    %86 = vector.broadcast %85 : vector<256x1xi1> to vector<256x4xi1>
    %87 = vector.broadcast %cst_40 : bf16 to vector<256x4xbf16>
    %88 = arith.select %86, %83, %87 : vector<256x4xi1>, vector<256x4xbf16>
    %c0_41 = arith.constant 0 : index
    %c32 = arith.constant 32 : index
    %89 = vector.load %arg10[%c0_41, %c32] : memref<256x36xbf16, #tpu.memory_space<vmem>>, vector<256x4xbf16>
    tpu.vector_store %arg10[%c0_41, %c32], %88 {strides = array<i32>} : memref<256x36xbf16, #tpu.memory_space<vmem>>, vector<256x4xbf16>,
    %c0_42 = arith.constant 0 : index
    %c0_43 = arith.constant 0 : index
    %90 = vector.load %arg10[%c0_42, %c0_43] : memref<256x36xbf16, #tpu.memory_space<vmem>>, vector<256x36xbf16>
    %c0_44 = arith.constant 0 : index
    %c0_45 = arith.constant 0 : index
    %91 = vector.load %arg4[%c0_44, %c0_45] : memref<36x4xbf16, #tpu.memory_space<vmem>>, vector<36x4xbf16>
    %cst_46 = arith.constant dense<0.000000e+00> : vector<256x4xf32>
    %92 = tpu.matmul %90, %91, %cst_46 {dimension_numbers = #tpu.dot_dimension_numbers<[1], [0], [0], [1], [0, 0, 1, 1], [], []>} : vector<256x36xbf16>, vector<36x4xbf16>, vector<256x4xf32> -> vector<256x4xf32>
    %c0_47 = arith.constant 0 : index
    %c0_48 = arith.constant 0 : index
    %93 = vector.load %arg5[%c0_47, %c0_48] : memref<1x4xf32, #tpu.memory_space<vmem>>, vector<1x4xf32>
    %94 = vector.broadcast %93 : vector<1x4xf32> to vector<256x4xf32>
    %95 = arith.addf %92, %94 : vector<256x4xf32>
    %cst_49 = arith.constant 0.000000e+00 : f32
    %96 = vector.broadcast %cst_49 : f32 to vector<256x4xf32>
    %97 = arith.maximumf %95, %96 : vector<256x4xf32>
    %98 = arith.truncf %97 : vector<256x4xf32> to vector<256x4xbf16>
    %c0_50 = arith.constant 0 : index
    %c0_51 = arith.constant 0 : index
    %99 = vector.load %arg6[%c0_50, %c0_51] : memref<4x16xbf16, #tpu.memory_space<vmem>>, vector<4x16xbf16>
    %cst_52 = arith.constant dense<0.000000e+00> : vector<256x16xf32>
    %100 = tpu.matmul %98, %99, %cst_52 {dimension_numbers = #tpu.dot_dimension_numbers<[1], [0], [0], [1], [0, 0, 1, 1], [], []>} : vector<256x4xbf16>, vector<4x16xbf16>, vector<256x16xf32> -> vector<256x16xf32>
    %c0_53 = arith.constant 0 : index
    %c0_54 = arith.constant 0 : index
    %101 = vector.load %arg7[%c0_53, %c0_54] : memref<1x16xf32, #tpu.memory_space<vmem>>, vector<1x16xf32>
    %102 = vector.broadcast %101 : vector<1x16xf32> to vector<256x16xf32>
    %103 = arith.addf %100, %102 : vector<256x16xf32>
    %cst_55 = arith.constant 0.000000e+00 : f32
    %104 = vector.broadcast %cst_55 : f32 to vector<256x16xf32>
    %105 = arith.maximumf %103, %104 : vector<256x16xf32>
    %c0_56 = arith.constant 0 : index
    %c0_57 = arith.constant 0 : index
    %106 = vector.load %arg1[%c0_56, %c0_57] : memref<256x16xf32, #tpu.memory_space<vmem>>, vector<256x16xf32>
    %107 = arith.addf %105, %106 : vector<256x16xf32>
    %c0_58 = arith.constant 0 : index
    %c0_59 = arith.constant 0 : index
    %108 = vector.load %arg8[%c0_58, %c0_59] : memref<256x16xf32, #tpu.memory_space<vmem>>, vector<256x16xf32>
    tpu.vector_store %arg8[%c0_58, %c0_59], %107 {strides = array<i32>} : memref<256x16xf32, #tpu.memory_space<vmem>>, vector<256x16xf32>,
    return
  }
  func.func @transform_0(%arg0: i32) -> (i32, i32) {
    %c0_i32 = arith.constant 0 : i32
    %c0_i32_0 = arith.constant 0 : i32
    return %arg0, %c0_i32 : i32, i32
  }
  func.func @transform_1(%arg0: i32) -> (i32, i32) {
    %c0_i32 = arith.constant 0 : i32
    %c0_i32_0 = arith.constant 0 : i32
    %c0_i32_1 = arith.constant 0 : i32
    return %c0_i32, %c0_i32_0 : i32, i32
  }
  func.func @transform_2(%arg0: i32) -> (i32, i32) {
    %c0_i32 = arith.constant 0 : i32
    %c0_i32_0 = arith.constant 0 : i32
    %c0_i32_1 = arith.constant 0 : i32
    return %c0_i32, %c0_i32_0 : i32, i32
  }
  func.func @transform_3(%arg0: i32) -> (i32, i32) {
    %c0_i32 = arith.constant 0 : i32
    %c0_i32_0 = arith.constant 0 : i32
    %c0_i32_1 = arith.constant 0 : i32
    return %c0_i32, %c0_i32_0 : i32, i32
  }
  func.func @transform_4(%arg0: i32) -> (i32, i32) {
    %c0_i32 = arith.constant 0 : i32
    %c0_i32_0 = arith.constant 0 : i32
    %c0_i32_1 = arith.constant 0 : i32
    return %c0_i32, %c0_i32_0 : i32, i32
  }
  func.func @transform_5(%arg0: i32) -> (i32, i32) {
    %c0_i32 = arith.constant 0 : i32
    %c0_i32_0 = arith.constant 0 : i32
    %c0_i32_1 = arith.constant 0 : i32
    return %c0_i32, %c0_i32_0 : i32, i32
  }
  func.func @transform_6(%arg0: i32) -> (i32, i32) {
    %c0_i32 = arith.constant 0 : i32
    %c0_i32_0 = arith.constant 0 : i32
    %c0_i32_1 = arith.constant 0 : i32
    return %c0_i32, %c0_i32_0 : i32, i32
  }
  func.func @transform_7(%arg0: i32) -> (i32, i32) {
    %c0_i32 = arith.constant 0 : i32
    %c0_i32_0 = arith.constant 0 : i32
    return %arg0, %c0_i32 : i32, i32
  }
}

</mosaic_0001>

<bundles_post_ra>
// kernel: tpu_custom_call.1
= control target key start
LH: loop header
LB: loop body
LE: loop exit
PB: predicated region body
PF: predicated region fallthrough
CT: control target
= control target key end

     0   :  { %s6823_s24 = smov 0   ;;  %s9223_s0 = inlined_call_operand.vmem [shape: f32[512,16], index: 0, kind: input, shape index: {}]   ;;  %s9224_s1 = inlined_call_operand.vmem [shape: bf16[16,4], index: 1, kind: input, shape index: {}]   ;;  %s9225_s2 = inlined_call_operand.vmem [shape: f32[1,4], index: 2, kind: input, shape index: {}]   ;;  %s9226_s3 = inlined_call_operand.vmem [shape: bf16[36,4], index: 3, kind: input, shape index: {}]   ;;  %s9227_s4 = inlined_call_operand.vmem [shape: f32[1,4], index: 4, kind: input, shape index: {}]   ;;  %s9228_s5 = inlined_call_operand.vmem [shape: bf16[4,16], index: 5, kind: input, shape index: {}]   ;;  %s9229_s6 = inlined_call_operand.vmem [shape: f32[1,16], index: 6, kind: input, shape index: {}]   ;;  %s9230_s7 = inlined_call_operand.vmem [shape: f32[512,16], index: 7, kind: output, shape index: {}]  }
   0x1 LB: > { %s6382_s25 = sadd.s32 4294967295, %s6770_s24   ;;  %p6386_p0 = scmp.ge.s32.totalorder %s6770_s24, 1  ;;  %s6770_s24 = sphi %s6823_s24, %s17_s24  }
   0x2   : > { %p238_p1 = scmp.lt.s32.totalorder %s6770_s24, 3 }
   0x4   : > { %p239_p2 = pnand %p6386_p0, %p238_p1 }
   0x6   : > { %242 = sbr.rel (%p239_p2) target bundleno = 1100 (0x44c), region = 48 }
   0xd   : > { %v6760_v0 = vld [vmem:[%s9224_s1] sm:$0xff]   ;;  %s6387_s28 = sshll.u32 %s6382_s25, 5  ;;  %vm9231_vm0 = vcmask 130048   ;;  %v691_v49 = vlaneseq  ;;  %vm6772_vm1 = vmmov 0   ;;  %v9233_v52 = vmov 0   ;;  %s6775_s12 = smov 4  }
   0xe   : > { %p271_p3 = scmp.lt.s32.totalorder %s6387_s28, 63  ;;  %6631 = vmatprep.subr.bf16.mxu0 %v6760_v0  ;;  %6737 = vmatprep.subr.bf16.mxu1 %v6760_v0  ;;  %vm1349_vm2 = vmpackc.low %vm6772_vm1, %vm6772_vm1  ;;  %vm6774_vm4 = vmmov 1   ;;  %s6776_s13 = smov 16  }
   0xf   : > { %6632 = vmatpush3.bf16.msra.mxu0 %v6760_v0  ;;  %6738 = vmatpush3.bf16.msra.mxu1 %v6760_v0  ;;  %v6892_v50 = vshrl.u32 %v691_v49, 7  ;;  %v6896_v53 = vsel %vm1349_vm2, 65537, %v9233_v52  ;;  %vm1352_vm5 = vmpackc.low %vm6774_vm4, %vm6774_vm4  ;;  %s6777_s14 = smov 8   ;;  %s6778_s15 = smov 12  }
  0x10   : > { %s9606_s28 = smov (!%p271_p3, %s6387_s28), 63  ;;  %9300 = vst [vmem:[#allocation5_spill] sm:$0xff] %v6896_v53  ;;  %v6901_v55 = vcombine.low %v6896_v53, %v6896_v53  ;;  %s6779_s16 = smov 20  }
  0x11   : > { %s6388_s29 = sshll.u32 %s9606_s28, 3  ;;  %9299 = vst [vmem:[#allocation4_spill] sm:$0xff] %v6892_v50  ;;  %v695_v51 = vadd.s32 24, %v6892_v50  ;;  %v697_v54 = vadd.s32 40, %v6892_v50  ;;  %v694_v60 = vadd.s32 16, %v6892_v50  ;;  %v693_v0 = vadd.s32 8, %v6892_v50 }
  0x12   : > { %s6842_s9 = scalar_lea.vmem %s9223_s0, %s6388_s29  ;;  %9301 = vst [vmem:[#allocation6_spill] sm:$0xff] %v6901_v55  ;;  %v1463_v58 = vshrl.u32 %v6901_v55, 16  ;;  %v1466_v59 = vshll.u32 %v6901_v55, 16  ;;  %vm9266_vm14 = vcmp.ne.s16.totalorder %v6901_v55, 0  ;;  %s6780_s17 = smov 28  }
  0x13   : > { %v285_v1 = vld [vmem:[%s6842_s9] sm:$0xff]  ;;  %v286_v2 = vld [vmem:[%s6842_s9 + $0x8] sm:$0xff]  ;;  %v287_v6 = vld [vmem:[%s6842_s9 + $0x10] sm:$0xff]  ;;  %v749_v56 = vand.u32 15, %v695_v51  ;;  %v763_v57 = vand.u32 15, %v697_v54  ;;  %v742_v63 = vand.u32 15, %v694_v60 }
  0x14   : > { %v301_v3 = vld [vmem:[%s6842_s9 + $0x80] sm:$0xff]  ;;  %v317_v4 = vpack.c.bf16 %v286_v2, %v285_v1  ;;  %v302_v5 = vld [vmem:[%s6842_s9 + $0x88] sm:$0xff]  ;;  %v288_v7 = vld [vmem:[%s6842_s9 + $0x18] sm:$0xff]  ;;  %v2395_v61 = vrot.slane %v1463_v58, 3  ;;  %v2398_v62 = vrot.slane %v1466_v59, 4  ;;  %v6908_v1 = vsel %vm1352_vm5, 65537, %v9233_v52 }
  0x15   : > { %v325_v8 = vpack.c.bf16 %v302_v5, %v301_v3  ;;  %v318_v9 = vpack.c.bf16 %v288_v7, %v287_v6  ;;  %v303_v10 = vld [vmem:[%s6842_s9 + $0x90] sm:$0xff]  ;;  %v304_v11 = vld [vmem:[%s6842_s9 + $0x98] sm:$0xff]  ;;  %v289_v12 = vld [vmem:[%s6842_s9 + $0x20] sm:$0xff]  ;;  %vm1143_vm3 = vcmp.le.s32.totalorder %v749_v56, 14  ;;  %vm1145_vm6 = vcmp.le.s32.totalorder %v763_v57, 14  ;;  %s6781_s18 = smov 24  }
  0x16   : > { %6633 = vmatprep.mubr.msk.bf16.mxu0 %vm9231_vm0, %v317_v4  ;;  %v326_v13 = vpack.c.bf16 %v304_v11, %v303_v10  ;;  %v290_v14 = vld [vmem:[%s6842_s9 + $0x28] sm:$0xff]  ;;  %v305_v15 = vld [vmem:[%s6842_s9 + $0xa0] sm:$0xff]  ;;  %v291_v19 = vld [vmem:[%s6842_s9 + $0x30] sm:$0xff]  ;;  %v696_v3 = vadd.s32 32, %v6892_v50  ;;  %v728_v4 = vand.u32 15, %v6892_v50  ;;  %v6913_v5 = vor.u32 %v2398_v62, %v2395_v61  ;;  %s6782_s21 = smov 32  }
  0x17   : > { %v306_v16 = vld [vmem:[%s6842_s9 + $0xa8] sm:$0xff]  ;;  %6649 = vmatprep.mubr.msk.bf16.mxu1 %vm9231_vm0, %v325_v8  ;;  %6634 = vmatmul.mubr.msk.bf16.vlgmr.msra.gmra.mrb[0].mxu0 %vm9231_vm0, %v318_v9  ;;  %v319_v17 = vpack.c.bf16 %v290_v14, %v289_v12  ;;  %v292_v20 = vld [vmem:[%s6842_s9 + $0x38] sm:$0xff]  ;;  %v307_v21 = vld [vmem:[%s6842_s9 + $0xb0] sm:$0xff]  ;;  %vm1110_vm9 = vcmp.ge.s32.totalorder %v742_v63, 1  ;;  %v735_v7 = vand.u32 15, %v693_v0  ;;  %v699_v10 = vadd.s32 56, %v6892_v50 }
  0x18   : > { %v327_v18 = vpack.c.bf16 %v306_v16, %v305_v15  ;;  %6650 = vmatmul.mubr.msk.bf16.vlgmr.msra.gmra.mrb[0].mxu1 %vm9231_vm0, %v326_v13  ;;  %v308_v22 = vld [vmem:[%s6842_s9 + $0xb8] sm:$0xff]  ;;  %v293_v23 = vld [vmem:[%s6842_s9 + $0x40] sm:$0xff]  ;;  %v294_v24 = vld [vmem:[%s6842_s9 + $0x48] sm:$0xff]  ;;  %v320_v27 = vpack.c.bf16 %v292_v20, %v291_v19  ;;  %9302 = vst [vmem:[#allocation7_spill] sm:$0xff] %v6913_v5  ;;  %v756_v9 = vand.u32 15, %v696_v3  ;;  %vm6919_vm10 = vcmp.ge.s32.totalorder %v728_v4, 1 }
  0x19   : > { %6637 = vmatprep.mubr.msk.bf16.mxu0 %vm9231_vm0, %v319_v17  ;;  %v309_v25 = vld [vmem:[%s6842_s9 + $0xc0] sm:$0xff]  ;;  %v310_v26 = vld [vmem:[%s6842_s9 + $0xc8] sm:$0xff]  ;;  %v328_v28 = vpack.c.bf16 %v308_v22, %v307_v21  ;;  %v321_v29 = vpack.c.bf16 %v294_v24, %v293_v23  ;;  %v295_v31 = vld [vmem:[%s6842_s9 + $0x50] sm:$0xff]  ;;  %vm9232_vm12 = vcmp.ne.s16.totalorder %v6913_v5, 0  ;;  %vm6924_vm13 = vcmp.le.s32.totalorder %v735_v7, 14 }
  0x1a   : > { %6653 = vmatprep.mubr.msk.bf16.mxu1 %vm9231_vm0, %v327_v18  ;;  %v329_v30 = vpack.c.bf16 %v310_v26, %v309_v25  ;;  %v296_v32 = vld [vmem:[%s6842_s9 + $0x58] sm:$0xff]  ;;  %v311_v33 = vld [vmem:[%s6842_s9 + $0xd0] sm:$0xff]  ;;  %v297_v35 = vld [vmem:[%s6842_s9 + $0x60] sm:$0xff]  ;;  %vm6933_vm1 = vcmp.ge.s32.totalorder %v756_v9, 1  ;;  %v777_v19 = vand.u32 15, %v699_v10  ;;  %v698_v24 = vadd.s32 48, %v6892_v50 }
  0x1b   : > { %v312_v34 = vld [vmem:[%s6842_s9 + $0xd8] sm:$0xff]  ;;  %v298_v36 = vld [vmem:[%s6842_s9 + $0x68] sm:$0xff]  ;;  %v313_v37 = vld [vmem:[%s6842_s9 + $0xe0] sm:$0xff]  ;;  %v322_v39 = vpack.c.bf16 %v296_v32, %v295_v31  ;;  %v6943_v25 = vrot.slane %v1463_v58, 4  ;;  %v6945_v26 = vrot.slane %v1466_v59, 5  ;;  %v708_v51 = vadd.s32 128, %v6892_v50 }
  0x1c   : > { %v314_v38 = vld [vmem:[%s6842_s9 + $0xe8] sm:$0xff]  ;;  %v330_v40 = vpack.c.bf16 %v312_v34, %v311_v33  ;;  %v323_v41 = vpack.c.bf16 %v298_v36, %v297_v35  ;;  %v299_v43 = vld [vmem:[%s6842_s9 + $0x70] sm:$0xff]  ;;  %v300_v44 = vld [vmem:[%s6842_s9 + $0x78] sm:$0xff]  ;;  %vm6958_vm4 = vcmp.le.s32.totalorder %v777_v19, 14  ;;  %vm1639_vm5 = vsmask.f32 4352 }
  0x1d   : > { %v331_v42 = vpack.c.bf16 %v314_v38, %v313_v37  ;;  %v315_v45 = vld [vmem:[%s6842_s9 + $0xf0] sm:$0xff]  ;;  %v316_v46 = vld [vmem:[%s6842_s9 + $0xf8] sm:$0xff]  ;;  %v324_v47 = vpack.c.bf16 %v300_v44, %v299_v43  ;;  %vm2283_vm7 = vmpackc.low %vm1143_vm3, %vm1143_vm3  ;;  %v710_v62 = vadd.s32 144, %v6892_v50  ;;  %v712_v3 = vadd.s32 160, %v6892_v50 }
  0x1e   : > { %v332_v48 = vpack.c.bf16 %v316_v46, %v315_v45  ;;  %vm2285_vm8 = vmpackc.low %vm1145_vm6, %vm1145_vm6  ;;  %v2315_v2 = vsel %vm2283_vm7, 65537, %v9233_v52  ;;  %v2167_v13 = vld [vmem:[#allocation2] sm:$0xf0]  ;;  %v709_v35 = vadd.s32 136, %v6892_v50 }
  0x1f   : > { %6638 = vmatmul.mubr.msk.bf16.gmra.mrb[4].mxu0 %vm9231_vm0, %v320_v27  ;;  %v2317_v6 = vsel %vm2285_vm8, 65537, %v9233_v52  ;;  %v6443_v8 = vcombine.low %v6908_v1, %v2315_v2  ;;  %vm1351_vm11 = vmpackc.low %vm1110_vm9, %vm1110_vm9  ;;  %v1824_v20 = vld [vmem:[#allocation2] sm:$0xf0]  ;;  %v2552_v21 = vsel %vm9232_vm12, %v2167_v13, 0  ;;  %v701_v27 = vadd.s32 72, %v6892_v50 }
  0x20   : > { %6654 = vmatmul.mubr.msk.bf16.gmra.mrb[4].mxu1 %vm9231_vm0, %v328_v28  ;;  %6641 = vmatprep.mubr.msk.bf16.mxu0 %vm9231_vm0, %v321_v29  ;;  %v6444_v11 = vcombine.low %v6908_v1, %v2317_v6  ;;  %v1383_v17 = vsel %vm1351_vm11, 65537, %v9233_v52  ;;  %vm2867_vm15 = vmpackc.low %vm6919_vm10, %vm6919_vm10  ;;  %v6955_v32 = vsel %vm9266_vm14, %v1824_v20, 0  ;;  %v2570_v33 = vshrl.u32 %v2552_v21, 16 }
  0x21   : > { %6657 = vmatprep.mubr.msk.bf16.mxu1 %vm9231_vm0, %v329_v30  ;;  %v2401_v15 = vshrl.u32 %v6443_v8, 16  ;;  %v2404_v16 = vshll.u32 %v6443_v8, 16  ;;  %vm3587_vm2 = vmpackc.low %vm6924_vm13, %vm6924_vm13  ;;  %v6410_v30 = vcombine.low %v1383_v17, %v6908_v1  ;;  %v2899_v31 = vsel %vm2867_vm15, 65537, %v9233_v52 }
  0x22   : > { %v2410_v22 = vshrl.u32 %v6444_v11, 16  ;;  %v2413_v23 = vshll.u32 %v6444_v11, 16  ;;  %vm1353_vm3 = vmpackc.low %vm6933_vm1, %vm6933_vm1  ;;  %v3619_v34 = vsel %vm3587_vm2, 65537, %v9233_v52  ;;  %v2573_v36 = vshll.u32 %v2552_v21, 16 }
  0x23   : > { %v2403_v28 = vrot.slane %v2401_v15, 3  ;;  %v2406_v29 = vrot.slane %v2404_v16, 4  ;;  %v791_v43 = vand.u32 15, %v701_v27  ;;  %v6474_v46 = vcombine.low %v6908_v1, %v3619_v34  ;;  %vm2287_vm6 = vmpackc.low %vm6958_vm4, %vm6958_vm4 }
  0x24   : > { %v2412_v37 = vrot.slane %v2410_v22, 3  ;;  %v2415_v38 = vrot.slane %v2413_v23, 4  ;;  %v1474_v49 = vshll.u32 %v6410_v30, 16  ;;  %v6976_v54 = vrot.slane %v2573_v36, 5 }
  0x25   : > { %v6967_v45 = vor.u32 %v2406_v29, %v2403_v28  ;;  %v2319_v60 = vsel %vm2287_vm6, 65537, %v9233_v52  ;;  %vm6986_vm8 = vcmp.le.s32.totalorder %v791_v43, 14  ;;  %v3699_v2 = vshrl.u32 %v6474_v46, 16 }
  0x26   : > { %v6978_v56 = vor.u32 %v2415_v38, %v2412_v37  ;;  %v1476_v6 = vrot.slane %v1474_v49, 5  ;;  %v3702_v7 = vshll.u32 %v6474_v46, 16  ;;  %v840_v8 = vand.u32 15, %v708_v51  ;;  %vm2289_vm10 = vmpackc.low %vm6986_vm8, %vm6986_vm8 }
  0x27   : > { %6642 = vmatmul.mubr.msk.bf16.gmra.mrb[8].mxu0 %vm9231_vm0, %v322_v39  ;;  %v770_v39 = vand.u32 15, %v698_v24  ;;  %v6994_v63 = vsel %vm1639_vm5, %v6913_v5, %v6967_v45  ;;  %v6445_v12 = vcombine.low %v6908_v1, %v2319_v60  ;;  %v854_v16 = vand.u32 15, %v710_v62 }
  0x28   : > { %6658 = vmatmul.mubr.msk.bf16.gmra.mrb[8].mxu1 %vm9231_vm0, %v330_v40  ;;  %6645 = vmatprep.mubr.msk.bf16.mxu0 %vm9231_vm0, %v323_v41  ;;  %v6458_v41 = vcombine.low %v2899_v31, %v6908_v1  ;;  %v7009_v13 = vsel %vm1639_vm5, %v6967_v45, %v6978_v56  ;;  %v3701_v18 = vrot.slane %v3699_v2, 3  ;;  %v868_v20 = vand.u32 15, %v712_v3 }
  0x29   : > { %6661 = vmatprep.mubr.msk.bf16.mxu1 %vm9231_vm0, %v331_v42  ;;  %v1385_v42 = vsel %vm1353_vm3, 65537, %v9233_v52  ;;  %vm6981_vm7 = vcmp.ge.s32.totalorder %v770_v39, 1  ;;  %v3704_v21 = vrot.slane %v3702_v7, 4  ;;  %v2321_v22 = vsel %vm2289_vm10, 65537, %v9233_v52 }
  0x2a   : > { %v6411_v57 = vcombine.low %v1385_v42, %v6908_v1  ;;  %v2980_v59 = vshrl.u32 %v6458_v41, 16  ;;  %v2983_v0 = vshll.u32 %v6458_v41, 16  ;;  %vm1355_vm9 = vmpackc.low %vm6981_vm7, %vm6981_vm7  ;;  %vm7015_vm11 = vcmp.ge.s32.totalorder %v840_v8, 1 }
  0x2b   : > { %v1387_v19 = vsel %vm1355_vm9, 65537, %v9233_v52  ;;  %v706_v24 = vadd.s32 112, %v6892_v50  ;;  %v2419_v29 = vshrl.u32 %v6445_v12, 16  ;;  %vm7023_vm13 = vcmp.ge.s32.totalorder %v854_v16, 1  ;;  %vm1365_vm1 = vmpackc.low %vm7015_vm11, %vm7015_vm11 }
  0x2c   : > { %v1480_v10 = vshrl.u32 %v6411_v57, 16  ;;  %v1483_v11 = vshll.u32 %v6411_v57, 16  ;;  %v2982_v15 = vrot.slane %v2980_v59, 4  ;;  %v2985_v17 = vrot.slane %v2983_v0, 5  ;;  %vm1367_vm3 = vmpackc.low %vm7023_vm13, %vm7023_vm13 }
  0x2d   : > { %v6446_v36 = vcombine.low %v6908_v1, %v2321_v22  ;;  %vm7029_vm15 = vcmp.ge.s32.totalorder %v868_v20, 1  ;;  %v711_v38 = vadd.s32 152, %v6892_v50  ;;  %v7039_v39 = vor.u32 %v6945_v26, %v6943_v25 }
  0x2e   : > { %v1482_v27 = vrot.slane %v1480_v10, 4  ;;  %v1485_v28 = vrot.slane %v1483_v11, 5  ;;  %vm1461_vm2 = vsmask.f32 3328  ;;  %v7041_v41 = vor.u32 %v2985_v17, %v2982_v15  ;;  %vm1369_vm4 = vmpackc.low %vm7029_vm15, %vm7029_vm15 }
  0x2f   : > { %6646 = vmatmul.mubr.msk.bf16.gmra.mrb[12].mxu0 %vm9231_vm0, %v324_v47  ;;  %v6973_v47 = vrot.slane %v2570_v33, 4  ;;  %v6412_v33 = vcombine.low %v1387_v19, %v6908_v1  ;;  %9321 = vst [vmem:[#allocation8_spill] sm:$0xff] %v7039_v39  ;;  %v7043_v42 = vor.u32 %v3704_v21, %v3701_v18  ;;  %v826_v43 = vand.u32 15, %v706_v24 }
  0x30   : > { %6662 = vmatmul.mubr.msk.bf16.gmra.mrb[12].mxu1 %vm9231_vm0, %v332_v48  ;;  %v1471_v48 = vshrl.u32 %v6410_v30, 16  ;;  %v2422_v30 = vshll.u32 %v6445_v12, 16  ;;  %v713_v46 = vadd.s32 168, %v6892_v50  ;;  %v2421_v49 = vrot.slane %v2419_v29, 3 }
  0x31   : > { %v707_v57 = vadd.s32 120, %v6892_v50  ;;  %v1489_v25 = vshrl.u32 %v6412_v33, 16  ;;  %v1397_v26 = vsel %vm1365_vm1, 65537, %v9233_v52  ;;  %v847_v58 = vand.u32 15, %v709_v35 }
  0x32   : > { %v1473_v4 = vrot.slane %v1471_v48, 4  ;;  %v7046_v48 = vor.u32 %v1485_v28, %v1482_v27  ;;  %v2424_v51 = vrot.slane %v2422_v30, 4  ;;  %v715_v59 = vadd.s32 184, %v6892_v50 }
  0x33   : > { %v1492_v60 = vshll.u32 %v6412_v33, 16  ;;  %v2428_v61 = vshrl.u32 %v6446_v36, 16  ;;  %v861_v62 = vand.u32 15, %v711_v38  ;;  %v717_v0 = vadd.s32 200, %v6892_v50 }
  0x34   : > { %v7020_v31 = vor.u32 %v1476_v6, %v1473_v4  ;;  %v1399_v2 = vsel %vm1367_vm3, 65537, %v9233_v52  ;;  %vm7064_vm6 = vcmp.ge.s32.totalorder %v826_v43, 1  ;;  %v875_v4 = vand.u32 15, %v713_v46 }
  0x35   : > { %v714_v6 = vadd.s32 176, %v6892_v50  ;;  %v1401_v7 = vsel %vm1369_vm4, 65537, %v9233_v52  ;;  %v6417_v8 = vcombine.low %v1397_v26, %v6908_v1  ;;  %v833_v10 = vand.u32 15, %v707_v57  ;;  %vm1363_vm8 = vmpackc.low %vm7064_vm6, %vm7064_vm6 }
  0x36   : > { %v700_v11 = vadd.s32 64, %v6892_v50  ;;  %v7072_v12 = vor.u32 %v2424_v51, %v2421_v49  ;;  %v2431_v15 = vshll.u32 %v6446_v36, 16  ;;  %vm7074_vm7 = vcmp.le.s32.totalorder %v847_v58, 14 }
  0x37   : > { %v889_v17 = vand.u32 15, %v715_v59  ;;  %v1491_v18 = vrot.slane %v1489_v25, 4  ;;  %v6418_v19 = vcombine.low %v1399_v2, %v6908_v1  ;;  %vm7082_vm9 = vcmp.le.s32.totalorder %v861_v62, 14  ;;  %vm2297_vm11 = vmpackc.low %vm7074_vm7, %vm7074_vm7 }
  0x38   : > { %v903_v21 = vand.u32 15, %v717_v0  ;;  %v1494_v22 = vrot.slane %v1492_v60, 5  ;;  %v6419_v23 = vcombine.low %v1401_v7, %v6908_v1  ;;  %vm7087_vm10 = vcmp.le.s32.totalorder %v875_v4, 14  ;;  %vm2299_vm15 = vmpackc.low %vm7082_vm9, %vm7082_vm9 }
  0x39   : > { %v882_v27 = vand.u32 15, %v714_v6  ;;  %v1534_v28 = vshrl.u32 %v6417_v8, 16  ;;  %v1537_v29 = vshll.u32 %v6417_v8, 16  ;;  %vm7094_vm13 = vcmp.le.s32.totalorder %v833_v10, 14  ;;  %vm2301_vm3 = vmpackc.low %vm7087_vm10, %vm7087_vm10 }
  0x3a   : > { %v784_v33 = vand.u32 15, %v700_v11  ;;  %v2430_v34 = vrot.slane %v2428_v61, 3  ;;  %v2433_v35 = vrot.slane %v2431_v15, 4  ;;  %v1395_v36 = vsel %vm1363_vm8, 65537, %v9233_v52  ;;  %vm2295_vm6 = vmpackc.low %vm7094_vm13, %vm7094_vm13 }
  0x3b   : > { %vm7102_vm1 = vcmp.le.s32.totalorder %v889_v17, 14  ;;  %v7109_v38 = vsel %vm1461_vm2, %v7041_v41, %v7020_v31  ;;  %v1543_v43 = vshrl.u32 %v6418_v19, 16  ;;  %v1546_v46 = vshll.u32 %v6418_v19, 16 }
  0x3c   : > { %vm7114_vm4 = vcmp.le.s32.totalorder %v903_v21, 14  ;;  %v7121_v51 = vsel %vm1639_vm5, %v7043_v42, %v6967_v45  ;;  %v1552_v57 = vshrl.u32 %v6419_v23, 16  ;;  %v2329_v25 = vsel %vm2297_vm11, 65537, %v9233_v52  ;;  %vm2303_vm8 = vmpackc.low %vm7102_vm1, %vm7102_vm1 }
  0x3d   : > { %vm7127_vm7 = vcmp.ge.s32.totalorder %v882_v27, 1  ;;  %v1536_v58 = vrot.slane %v1534_v28, 4  ;;  %v1539_v59 = vrot.slane %v1537_v29, 5  ;;  %v6416_v60 = vcombine.low %v1395_v36, %v6908_v1  ;;  %vm2305_vm11 = vmpackc.low %vm7114_vm4, %vm7114_vm4 }
  0x3e   : > { %vm7135_vm0 = vcmp.ge.s32.totalorder %v784_v33, 1  ;;  %v7142_v61 = vsel %vm1461_vm2, %v7020_v31, %v7046_v48  ;;  %v7147_v62 = vsel %vm1639_vm5, %v6978_v56, %v7072_v12  ;;  %v7149_v0 = vor.u32 %v1494_v22, %v1491_v18  ;;  %vm1371_vm12 = vmpackc.low %vm7127_vm7, %vm7127_vm7 }
  0x3f   : > { %v7151_v2 = vor.u32 %v2433_v35, %v2430_v34  ;;  %v1545_v3 = vrot.slane %v1543_v43, 4  ;;  %v1548_v4 = vrot.slane %v1546_v46, 5  ;;  %v2331_v6 = vsel %vm2299_vm15, 65537, %v9233_v52  ;;  %vm1357_vm9 = vmpackc.low %vm7135_vm0, %vm7135_vm0 }
  0x40   : > { %v6450_v56 = vcombine.low %v6908_v1, %v2329_v25  ;;  %v1554_v7 = vrot.slane %v1552_v57, 4  ;;  %v1555_v8 = vshll.u32 %v6419_v23, 16  ;;  %v2333_v10 = vsel %vm2301_vm3, 65537, %v9233_v52 }
  0x41   : > { %9340 = vst [vmem:[#allocation9_spill] sm:$0xff] %v7151_v2  ;;  %v2327_v11 = vsel %vm2295_vm6, 65537, %v9233_v52  ;;  %v7181_v15 = vor.u32 %v1539_v59, %v1536_v58  ;;  %v1525_v16 = vshrl.u32 %v6416_v60, 16  ;;  %v1528_v17 = vshll.u32 %v6416_v60, 16 }
  0x42   : > { %v2335_v18 = vsel %vm2303_vm8, 65537, %v9233_v52  ;;  %v6451_v19 = vcombine.low %v6908_v1, %v2331_v6  ;;  %v2337_v20 = vsel %vm2305_vm11, 65537, %v9233_v52  ;;  %v1403_v21 = vsel %vm1371_vm12, 65537, %v9233_v52 }
  0x43   : > { %v703_v22 = vadd.s32 88, %v6892_v50  ;;  %v6452_v23 = vcombine.low %v6908_v1, %v2333_v10  ;;  %v2464_v24 = vshrl.u32 %v6450_v56, 16  ;;  %v6449_v27 = vcombine.low %v6908_v1, %v2327_v11 }
  0x44   : > { %v1389_v28 = vsel %vm1357_vm9, 65537, %v9233_v52  ;;  %v1549_v29 = vor.u32 %v1548_v4, %v1545_v3  ;;  %v1557_v30 = vrot.slane %v1555_v8, 5  ;;  %v2467_v33 = vshll.u32 %v6450_v56, 16 }
  0x45   : > { %v6453_v34 = vcombine.low %v6908_v1, %v2335_v18  ;;  %v1527_v35 = vrot.slane %v1525_v16, 4  ;;  %v1530_v36 = vrot.slane %v1528_v17, 5  ;;  %v6454_v37 = vcombine.low %v6908_v1, %v2337_v20 }
  0x46   : > { %v6420_v43 = vcombine.low %v1403_v21, %v6908_v1  ;;  %v2473_v46 = vshrl.u32 %v6451_v19, 16  ;;  %v2476_v49 = vshll.u32 %v6451_v19, 16  ;;  %v6413_v57 = vcombine.low %v1389_v28, %v6908_v1 }
  0x47   : > { %v805_v25 = vand.u32 15, %v703_v22  ;;  %v2466_v26 = vrot.slane %v2464_v24, 3  ;;  %v2482_v58 = vshrl.u32 %v6452_v23, 16  ;;  %v2485_v59 = vshll.u32 %v6452_v23, 16 }
  0x48   : > { %v2455_v60 = vshrl.u32 %v6449_v27, 16  ;;  %v2469_v45 = vrot.slane %v2467_v33, 4  ;;  %v2458_v3 = vshll.u32 %v6449_v27, 16  ;;  %v2491_v4 = vshrl.u32 %v6453_v34, 16  ;;  %v1236_v33 = vld [vmem:[#allocation2] sm:$0xf8] }
  0x49   : > { %v2494_v6 = vshll.u32 %v6453_v34, 16  ;;  %v2500_v56 = vshrl.u32 %v6454_v37, 16  ;;  %v2503_v8 = vshll.u32 %v6454_v37, 16  ;;  %v1561_v10 = vshrl.u32 %v6420_v43, 16 }
  0x4a   : > { %v1564_v11 = vshll.u32 %v6420_v43, 16  ;;  %v2475_v16 = vrot.slane %v2473_v46, 3  ;;  %v1498_v17 = vshrl.u32 %v6413_v57, 16  ;;  %v1501_v18 = vshll.u32 %v6413_v57, 16 }
  0x4b   : > { %vm7205_vm0 = vcmp.le.s32.totalorder %v805_v25, 14  ;;  %v2478_v20 = vrot.slane %v2476_v49, 4  ;;  %v2484_v21 = vrot.slane %v2482_v58, 3  ;;  %v2487_v22 = vrot.slane %v2485_v59, 4 }
  0x4c   : > { %v2457_v23 = vrot.slane %v2455_v60, 3  ;;  %v2460_v24 = vrot.slane %v2458_v3, 4  ;;  %v2493_v28 = vrot.slane %v2491_v4, 3  ;;  %v2496_v27 = vrot.slane %v2494_v6, 4  ;;  %vm2291_vm10 = vmpackc.low %vm7205_vm0, %vm7205_vm0 }
  0x4d   : > { %vm9265_vm12 = vcmp.ne.s16.totalorder %v7039_v39, 0  ;;  %v2502_v34 = vrot.slane %v2500_v56, 3  ;;  %v2505_v37 = vrot.slane %v2503_v8, 4  ;;  %v1563_v43 = vrot.slane %v1561_v10, 4 }
  0x4e   : > { %v1566_v46 = vrot.slane %v1564_v11, 5  ;;  %v1558_v57 = vor.u32 %v1557_v30, %v1554_v7  ;;  %v7213_v25 = vor.u32 %v1530_v36, %v1527_v35  ;;  %v1500_v49 = vrot.slane %v1498_v17, 4 }
  0x4f   : > { %v1503_v58 = vrot.slane %v1501_v18, 5  ;;  %v2470_v59 = vor.u32 %v2469_v45, %v2466_v26  ;;  %v2479_v60 = vor.u32 %v2478_v20, %v2475_v16  ;;  %v2488_v3 = vor.u32 %v2487_v22, %v2484_v21 }
  0x50   : > { %9343 = vst [vmem:[#allocation10_spill] sm:$0xff] %v7213_v25  ;;  %v7217_v4 = vsel %vm9265_vm12, %v1236_v33, 0  ;;  %v7219_v6 = vor.u32 %v2460_v24, %v2457_v23  ;;  %v2497_v56 = vor.u32 %v2496_v27, %v2493_v28  ;;  %v2323_v8 = vsel %vm2291_vm10, 65537, %v9233_v52 }
  0x51   : > { %v716_v10 = vadd.s32 192, %v6892_v50  ;;  %v7226_v7 = vsel %vm1461_vm2, %v7046_v48, %v7149_v0  ;;  %v7231_v30 = vsel %vm1639_vm5, %v7072_v12, %v7151_v2  ;;  %v7233_v35 = vor.u32 %v2505_v37, %v2502_v34  ;;  %v7250_v12 = vld [vmem:[%s9225_s2] ss:$0 sm:$0xff] }
  0x52   : > { %9344 = vst [vmem:[#allocation11_spill] sm:$0xff] %v7219_v6  ;;  %v7235_v36 = vor.u32 %v1566_v46, %v1563_v43  ;;  %v7239_v26 = vsel %vm1461_vm2, %v7181_v15, %v1549_v29  ;;  %v7242_v45 = vsel %vm1461_vm2, %v1549_v29, %v1558_v57  ;;  %v7244_v11 = vor.u32 %v1503_v58, %v1500_v49 }
  0x53   : > { %9345 = vst [vmem:[#allocation12_spill] sm:$0xff] %v7233_v35  ;;  %9347 = vst [vmem:[#allocation14_spill] sm:$0xff] %v7239_v26  ;;  %v1641_v48 = vshrl.u32 %v7217_v4, 16  ;;  %v7255_v16 = vsel %vm1461_vm2, %v7213_v25, %v7181_v15  ;;  %v7258_v17 = vsel %vm1639_vm5, %v2470_v59, %v2479_v60  ;;  %v6447_v29 = vcombine.low %v6908_v1, %v2323_v8 }
  0x54   : > { %9346 = vst [vmem:[#allocation13_spill] sm:$0xff] %v7235_v36  ;;  %9348 = vst [vmem:[#allocation15_spill] sm:$0xff] %v7244_v11  ;;  %v702_v18 = vadd.s32 80, %v6892_v50  ;;  %v7263_v19 = vsel %vm1639_vm5, %v2479_v60, %v2488_v3  ;;  %v7267_v20 = vsel %vm1639_vm5, %v7219_v6, %v2470_v59  ;;  %v7270_v21 = vsel %vm1639_vm5, %v2488_v3, %v2497_v56 }
  0x55   : > { %9349 = vst [vmem:[#allocation16_spill] sm:$0xff] %v7255_v16  ;;  %9350 = vst [vmem:[#allocation17_spill] sm:$0xff] %v7258_v17  ;;  %v896_v22 = vand.u32 15, %v716_v10  ;;  %v7274_v23 = vsel %vm1639_vm5, %v2497_v56, %v7233_v35  ;;  %v7278_v24 = vsel %vm1461_vm2, %v1558_v57, %v7235_v36  ;;  %v7283_v28 = vsel %vm1461_vm2, %v7039_v39, %v7020_v31 }
  0x56   : > { %9351 = vst [vmem:[#allocation18_spill] sm:$0xff] %v7267_v20  ;;  %9352 = vst [vmem:[#allocation19_spill] sm:$0xff] %v7283_v28  ;;  %v705_v27 = vadd.s32 104, %v6892_v50  ;;  %vm622_vm13 = vcmask 1043456   ;;  %vm671_vm15 = vcmask 31748   ;;  %v7290_v43 = vsel %vm1461_vm2, %v7149_v0, %v7244_v11 }
  0x57   : > { %9353 = vst [vmem:[#allocation20_spill] sm:$0xff] %v7290_v43  ;;  %v7292_v46 = vrot.slane %v1641_v48, 3  ;;  %v1644_v57 = vshll.u32 %v7217_v4, 16  ;;  %vm9267_vm1 = vcmask 31744   ;;  %v2437_v60 = vshrl.u32 %v6447_v29, 16 }
  0x58   : > { %v798_v3 = vand.u32 15, %v702_v18  ;;  %vm7299_vm3 = vcmp.ge.s32.totalorder %v896_v22, 1  ;;  %v819_v44 = vand.u32 15, %v705_v27  ;;  %vm2536_vm0 = vcmp.ne.s16.totalorder %v6994_v63, 0 }
  0x59   : > { %9354 = vst [vmem:[#allocation21_spill] sm:$0xff] %v7292_v46  ;;  %vm1373_vm6 = vmpackc.low %vm7299_vm3, %vm7299_vm3  ;;  %v7315_v27 = vrot.slane %v2437_v60, 3  ;;  %vm2537_vm10 = vcmp.ne.s16.totalorder %v7009_v13, 0  ;;  %vm3122_vm3 = vcmp.ne.s16.totalorder %v7041_v41, 0  ;;  %vm2545_vm12 = vcmp.ne.s16.totalorder %v7263_v19, 0 }
  0x5a   : > { %vm7306_vm4 = vcmp.ge.s32.totalorder %v798_v3, 1  ;;  %vm7323_vm7 = vcmp.le.s32.totalorder %v819_v44, 14  ;;  %v7397_v3 = vadd.s32 232, %v6892_v50  ;;  %vm9275_vm14 = vcmp.ne.s16.totalorder %v7267_v20, 0 }
  0x5b   : > { %vm1359_vm8 = vmpackc.low %vm7306_vm4, %vm7306_vm4  ;;  %vm3123_vm4 = vcmp.ne.s16.totalorder %v7109_v38, 0 }
  0x5c   : > { %vm2293_vm11 = vmpackc.low %vm7323_vm7, %vm7323_vm7  ;;  %vm3842_vm7 = vcmp.ne.s16.totalorder %v7121_v51, 0 }
  0xea   : > { %v6635_v15 = vpop.f32.mrb[0].mxu0 }
  0xeb   : > { %v440_v33 = vadd.f32 %v6635_v15, %v7250_v12  ;;  %v431_v34 = vpop.f32.mrb[1].mxu0  ;;  %v6651_v37 = vpop.f32.mrb[0].mxu1  ;;  %v2440_v15 = vshll.u32 %v6447_v29, 16 }
  0xec   : > { %v432_v31 = vadd.f32 %v7250_v12, %v431_v34  ;;  %v6636_v49 = vpop.f32.mrb[2].mxu0  ;;  %v504_v58 = vadd.f32 %v6651_v37, %v7250_v12  ;;  %v495_v59 = vpop.f32.mrb[1].mxu1 }
  0xed   : > { %v443_v56 = vadd.f32 %v6636_v49, %v7250_v12  ;;  %v434_v8 = vpop.f32.mrb[3].mxu0  ;;  %v496_v10 = vadd.f32 %v7250_v12, %v495_v59  ;;  %v6652_v0 = vpop.f32.mrb[2].mxu1  ;;  %v560_v14 = vmax.f32 %v440_v33, 0.0  ;;  %v7317_v33 = vrot.slane %v1644_v57, 4 }
  0xee   : > { %v435_v4 = vadd.f32 %v7250_v12, %v434_v8  ;;  %v576_v34 = vmax.f32 %v504_v58, 0.0  ;;  %v507_v9 = vadd.f32 %v6652_v0, %v7250_v12  ;;  %v498_v37 = vpop.f32.mrb[3].mxu1  ;;  %v558_v52 = vmax.f32 %v432_v31, 0.0 }
  0xef   : > { %v561_v18 = vmax.f32 %v443_v56, 0.0  ;;  %v574_v40 = vmax.f32 %v496_v10, 0.0  ;;  %v499_v49 = vadd.f32 %v7250_v12, %v498_v37  ;;  %9359 = vst [vmem:[#allocation22_spill] sm:$0xff] %v7317_v33 }
  0xf0   : > { %v559_v59 = vmax.f32 %v435_v4, 0.0  ;;  %v577_v5 = vmax.f32 %v507_v9, 0.0  ;;  %v7321_v9 = vrot.slane %v2440_v15, 4 }
  0xf1   : > { %v7313_v22 = vpack.c.bf16 %v561_v18, %v560_v14  ;;  %v575_v58 = vmax.f32 %v499_v49, 0.0 }
  0xf2   : > { %v590_v56 = vpack.c.bf16 %v559_v59, %v558_v52  ;;  %v7319_v8 = vpack.c.bf16 %v577_v5, %v576_v34  ;;  %v6639_v31 = vpop.f32.mrb[4].mxu0  ;;  %v9362_v52 = vmov 0  }
  0xf3   : > { %v9237_v10 = vrot.slane %v7313_v22, 4  ;;  %v7328_v0 = vpack.c.bf16 %v575_v58, %v574_v40  ;;  %v456_v14 = vadd.f32 %v6639_v31, %v7250_v12  ;;  %v6655_v60 = vpop.f32.mrb[4].mxu1  ;;  %v447_v4 = vpop.f32.mrb[5].mxu0  ;;  %v1405_v5 = vsel %vm1373_vm6, 65537, %v9362_v52 }
  0xf4   : > { %v623_v44 = vrot.slane %v590_v56, 4  ;;  %v9243_v57 = vrot.slane %v7319_v8, 4  ;;  %v520_v40 = vadd.f32 %v6655_v60, %v7250_v12  ;;  %v448_v15 = vadd.f32 %v7250_v12, %v447_v4  ;;  %v511_v34 = vpop.f32.mrb[5].mxu1  ;;  %v6640_v37 = vpop.f32.mrb[6].mxu0 }
  0xf5   : > { %v9242_v18 = vrot.slane %v7328_v0, 4  ;;  %v564_v49 = vmax.f32 %v456_v14, 0.0  ;;  %v512_v59 = vadd.f32 %v7250_v12, %v511_v34  ;;  %v459_v58 = vadd.f32 %v6640_v37, %v7250_v12  ;;  %v6656_v31 = vpop.f32.mrb[6].mxu1  ;;  %v450_v48 = vpop.f32.mrb[7].mxu0 }
  0xf6   : > { %v625_v56 = vsel %vm622_vm13, %v623_v44, %v9237_v10  ;;  %672 = vst.msk [vmem:[#allocation2 + $0x8] sm:$0xf0] %vm671_vm15, %v623_v44  ;;  %v580_v60 = vmax.f32 %v520_v40, 0.0  ;;  %v523_v4 = vadd.f32 %v6656_v31, %v7250_v12  ;;  %v514_v14 = vpop.f32.mrb[7].mxu1  ;;  %v9363_v34 = vcombine.low %v6896_v53, %v6908_v1 }
  0xf7   : > { %v1391_v44 = vsel %vm1359_vm8, 65537, %v9362_v52  ;;  %674 = vst.msk [vmem:[#allocation2 + $0x10] sm:$0xff] %vm9267_vm1, %v625_v56  ;;  %v641_v40 = vsel %vm622_vm13, %v9242_v18, %v9243_v57  ;;  %v562_v31 = vmax.f32 %v448_v15, 0.0  ;;  %v451_v10 = vadd.f32 %v7250_v12, %v450_v48 }
  0xf8   : > { %vm7357_vm9 = vcmp.ne.s16.totalorder %v9363_v34, 0  ;;  %v565_v34 = vmax.f32 %v459_v58, 0.0  ;;  %682 = vst.msk [vmem:[#allocation2 + $0x50] sm:$0xff] %vm9267_vm1, %v641_v40  ;;  %v578_v39 = vmax.f32 %v512_v59, 0.0  ;;  %v581_v53 = vmax.f32 %v523_v4, 0.0 }
  0xf9   : > { %v515_v29 = vadd.f32 %v7250_v12, %v514_v14  ;;  %v2325_v56 = vsel %vm2293_vm11, 65537, %v9362_v52  ;;  %v563_v18 = vmax.f32 %v451_v10, 0.0  ;;  %v7386_v15 = vcombine.low %v1391_v44, %v6908_v1 }
  0xfa   : > { %v7383_v55 = vpack.c.bf16 %v565_v34, %v564_v49  ;;  %v7389_v58 = vcombine.low %v1405_v5, %v6908_v1  ;;  %v7391_v59 = vpack.c.bf16 %v581_v53, %v580_v60  ;;  %v6643_v4 = vpop.f32.mrb[8].mxu0  ;;  %v7394_v14 = vadd.s32 216, %v6892_v50 }
  0xfb   : > { %9366 = vst [vmem:[#allocation23_spill] sm:$0xff] %v7386_v15  ;;  %v579_v48 = vmax.f32 %v515_v29, 0.0  ;;  %v592_v40 = vpack.c.bf16 %v563_v18, %v562_v31  ;;  %v472_v10 = vadd.f32 %v6643_v4, %v7250_v12  ;;  %v6659_v44 = vpop.f32.mrb[8].mxu1  ;;  %v463_v34 = vpop.f32.mrb[9].mxu0  ;;  %v7402_v5 = vcombine.low %v6908_v1, %v2325_v56 }
  0xfc   : > { %v536_v29 = vadd.f32 %v6659_v44, %v7250_v12  ;;  %v464_v57 = vadd.f32 %v7250_v12, %v463_v34  ;;  %v527_v25 = vpop.f32.mrb[9].mxu1  ;;  %v6644_v6 = vpop.f32.mrb[10].mxu0  ;;  %v9367_v44 = vrot.slane %v7313_v22, 4  ;;  %v9373_v22 = vrot.slane %v7319_v8, 4 }
  0xfd   : > { %v600_v60 = vpack.c.bf16 %v579_v48, %v578_v39  ;;  %v626_v35 = vrot.slane %v592_v40, 4  ;;  %v568_v36 = vmax.f32 %v472_v10, 0.0  ;;  %v528_v18 = vadd.f32 %v7250_v12, %v527_v25  ;;  %v6660_v4 = vpop.f32.mrb[10].mxu1  ;;  %v466_v49 = vpop.f32.mrb[11].mxu0  ;;  %v1825_v48 = vld [vmem:[#allocation2 + $0x8] sm:$0xff] }
  0xfe   : > { %v475_v31 = vadd.f32 %v6644_v6, %v7250_v12  ;;  %v584_v56 = vmax.f32 %v536_v29, 0.0  ;;  %v566_v43 = vmax.f32 %v464_v57, 0.0  ;;  %v539_v53 = vadd.f32 %v6660_v4, %v7250_v12  ;;  %v530_v39 = vpop.f32.mrb[11].mxu1 }
  0xff   : > { %v642_v11 = vrot.slane %v600_v60, 4  ;;  %v627_v34 = vsel %vm622_vm13, %v9367_v44, %v626_v35  ;;  %v9368_v40 = vrot.slane %v7383_v55, 4  ;;  %v582_v25 = vmax.f32 %v528_v18, 0.0 }
 0x100   : > { %v569_v33 = vmax.f32 %v475_v31, 0.0  ;;  %v9369_v6 = vcombine.low %v6908_v1, %v6908_v1  ;;  %v9370_v57 = vmov 0  ;;  %675 = vst.msk [vmem:[#allocation2 + $0x18] sm:$0xff] %vm9267_vm1, %v627_v34  ;;  %v585_v18 = vmax.f32 %v539_v53, 0.0 }
 0x101   : > { %v629_v10 = vsel %vm622_vm13, %v626_v35, %v9368_v40  ;;  %v643_v60 = vsel %vm622_vm13, %v9373_v22, %v642_v11  ;;  %v9374_v35 = vrot.slane %v7391_v59, 4  ;;  %v467_v31 = vadd.f32 %v7250_v12, %v466_v49 }
 0x102   : > { %vm7420_vm15 = vcmp.ne.s16.totalorder %v9369_v6, 0  ;;  %676 = vst.msk [vmem:[#allocation2 + $0x20] sm:$0xff] %vm9267_vm1, %v629_v10  ;;  %683 = vst.msk [vmem:[#allocation2 + $0x58] sm:$0xff] %vm9267_vm1, %v643_v60  ;;  %v7435_v4 = vpack.c.bf16 %v569_v33, %v568_v36  ;;  %v531_v44 = vadd.f32 %v7250_v12, %v530_v39  ;;  %v2036_v8 = vsel %vm7357_vm9, %v1825_v48, 0  ;;  %v6647_v53 = vpop.f32.mrb[12].mxu0 }
 0x103   : > { %v9371_v57 = vsel %vm7420_vm15, 4294967295, %v9370_v57  ;;  %v645_v29 = vsel %vm622_vm13, %v642_v11, %v9374_v35  ;;  %v2553_v34 = vsel %vm2536_vm0, %v1825_v48, 0  ;;  %v7444_v11 = vpack.c.bf16 %v585_v18, %v584_v56  ;;  %v479_v10 = vpop.f32.mrb[13].mxu0  ;;  %v7450_v63 = vpop.f32.mrb[12].mxu1  ;;  %v3373_v18 = vld [vmem:[#allocation2 + $0x8] sm:$0xf0] }
 0x104   : > { %9372 = vst [vmem:[#allocation24_spill] sm:$0xff] %v9371_v57  ;;  %684 = vst.msk [vmem:[#allocation2 + $0x60] sm:$0xff] %vm9267_vm1, %v645_v29  ;;  %v567_v49 = vmax.f32 %v467_v31, 0.0  ;;  %v7446_v40 = vrot.slane %v2036_v8, 4  ;;  %v2578_v36 = vshrl.u32 %v2553_v34, 16  ;;  %v583_v39 = vmax.f32 %v531_v44, 0.0 }
 0x105   : > { %v488_v37 = vadd.f32 %v6647_v53, %v7250_v12  ;;  %v2581_v6 = vshll.u32 %v2553_v34, 16  ;;  %v9375_v56 = vrot.slane %v6955_v32, 4  ;;  %v480_v35 = vadd.f32 %v7250_v12, %v479_v10  ;;  %v6648_v29 = vpop.f32.mrb[14].mxu0  ;;  %v7458_v31 = vld [vmem:[#allocation2 + $0x10] sm:$0xff]  ;;  %v7460_v44 = vpop.f32.mrb[13].mxu1 }
 0x106   : > { %v594_v22 = vpack.c.bf16 %v567_v49, %v566_v43  ;;  %v602_v8 = vpack.c.bf16 %v583_v39, %v582_v25  ;;  %v491_v43 = vadd.f32 %v6648_v29, %v7250_v12  ;;  %v482_v49 = vpop.f32.mrb[15].mxu0  ;;  %v2580_v53 = vrot.slane %v2578_v36, 4  ;;  %v7465_v32 = vpop.f32.mrb[14].mxu1 }
 0x107   : > { %v2071_v60 = vsel %vm622_vm13, %v9375_v56, %v7446_v40  ;;  %v572_v34 = vmax.f32 %v488_v37, 0.0  ;;  %vm3841_vm6 = vcmp.ne.s16.totalorder %v7043_v42, 0  ;;  %v570_v56 = vmax.f32 %v480_v35, 0.0  ;;  %v7468_v46 = vpop.f32.mrb[15].mxu1  ;;  %v7487_v2 = vld [vmem:[#allocation2 + $0x18] sm:$0xff] }
 0x108   : > { %2102 = vrot.lane.b32.xlu0 %v2071_v60, %s6775_s12  ;;  %v630_v10 = vrot.slane %v594_v22, 4  ;;  %v483_v48 = vadd.f32 %v7250_v12, %v482_v49  ;;  %v2583_v33 = vrot.slane %v2581_v6, 5  ;;  %v646_v25 = vrot.slane %v602_v8, 4 }
 0x109   : > { %v573_v39 = vmax.f32 %v491_v43, 0.0  ;;  %v3407_v37 = vrot.slane %v3373_v18, 4  ;;  %v3408_v60 = vrot.slane %v7458_v31, 4  ;;  %v9376_v36 = vrot.slane %v7383_v55, 4 }
 0x10a   : > { %v9377_v28 = vrot.slane %v7435_v4, 4  ;;  %v571_v35 = vmax.f32 %v483_v48, 0.0  ;;  %v2584_v49 = vor.u32 %v2583_v33, %v2580_v53  ;;  %v9378_v6 = vrot.slane %v7391_v59, 4 }
 0x10b   : > { %v631_v29 = vsel %vm622_vm13, %v9376_v36, %v630_v10  ;;  %v9379_v8 = vrot.slane %v7444_v11, 4  ;;  %v597_v43 = vpack.c.bf16 %v573_v39, %v572_v34  ;;  %v3409_v36 = vsel %vm622_vm13, %v3407_v37, %v3408_v60 }
 0x10c   : > { %v633_v22 = vsel %vm622_vm13, %v630_v10, %v9377_v28  ;;  %677 = vst.msk [vmem:[#allocation2 + $0x28] sm:$0xff] %vm9267_vm1, %v631_v29  ;;  %v647_v18 = vsel %vm622_vm13, %v9378_v6, %v646_v25  ;;  %v2786_v28 = vld [vmem:[#allocation2 + $0x8] sm:$0xf8]  ;;  %v596_v33 = vpack.c.bf16 %v571_v35, %v570_v56  ;;  %v9380_v59 = vor.u32 %v6976_v54, %v6973_v47 }
 0x10d   : > { %678 = vst.msk [vmem:[#allocation2 + $0x30] sm:$0xff] %vm9267_vm1, %v633_v22  ;;  %v649_v55 = vsel %vm622_vm13, %v646_v25, %v9379_v8  ;;  %685 = vst.msk [vmem:[#allocation2 + $0x68] sm:$0xff] %vm9267_vm1, %v647_v18  ;;  %3440 = vrot.lane.b32.xlu0 %v3409_v36, %s6776_s13  ;;  %v2554_v34 = vsel %vm2537_vm10, %v7458_v31, 0  ;;  %v2037_v53 = vsel %vm7420_vm15, %v7458_v31, 0  ;;  %v636_v10 = vrot.slane %v597_v43, 4 }
 0x10e   : > { %686 = vst.msk [vmem:[#allocation2 + $0x70] sm:$0xff] %vm9267_vm1, %v649_v55  ;;  %v2585_v48 = vsel %vm1461_vm2, %v9380_v59, %v2584_v49  ;;  %v2587_v56 = vshrl.u32 %v2554_v34, 16  ;;  %v2590_v25 = vshll.u32 %v2554_v34, 16  ;;  %v7503_v47 = vrot.slane %v2037_v53, 4  ;;  %v3505_v55 = vld [vmem:[#allocation2 + $0x8] sm:$0xf0] }
 0x10f   : > { %2721 = vrot.lane.b32.xlu1 %v2585_v48, %s6777_s14  ;;  %v634_v54 = vrot.slane %v596_v33, 4  ;;  %v3410_v39 = vrot.slane %v7487_v2, 4  ;;  %v3139_v37 = vsel %vm3122_vm3, %v2786_v28, 0  ;;  %v3140_v29 = vsel %vm3123_vm4, %v7458_v31, 0  ;;  %v7528_v53 = vld [vmem:[#allocation2 + $0x58] sm:$0xff] }
 0x110   : > { %v9381_v22 = vrot.slane %v7328_v0, 4  ;;  %v2589_v6 = vrot.slane %v2587_v56, 4  ;;  %v2592_v18 = vrot.slane %v2590_v25, 5  ;;  %v2073_v8 = vsel %vm622_vm13, %v7446_v40, %v7503_v47 }
 0x111   : > { %v9382_v43 = vrot.slane %v7435_v4, 4  ;;  %v637_v28 = vsel %vm622_vm13, %v634_v54, %v636_v10  ;;  %2104 = vrot.lane.b32.xlu0 %v2073_v8, %s6775_s12  ;;  %v3157_v0 = vshrl.u32 %v3139_v37, 16  ;;  %v3160_v40 = vshll.u32 %v3139_v37, 16 }
 0x112   : > { %v639_v35 = vsel %vm622_vm13, %v636_v10, %v9381_v22  ;;  %680 = vst.msk [vmem:[#allocation2 + $0x40] sm:$0xff] %vm9267_vm1, %v637_v28  ;;  %v7526_v59 = vor.u32 %v2592_v18, %v2589_v6  ;;  %v3165_v48 = vshrl.u32 %v3140_v29, 16  ;;  %v3168_v34 = vshll.u32 %v3140_v29, 16  ;;  %v7538_v6 = vld [vmem:[#allocation2 + $0x20] sm:$0xff] }
 0x113   : > { %681 = vst.msk [vmem:[#allocation2 + $0x48] sm:$0xff] %vm9267_vm1, %v639_v35  ;;  %v635_v36 = vsel %vm622_vm13, %v9382_v43, %v634_v54  ;;  %v3411_v4 = vsel %vm622_vm13, %v3408_v60, %v3410_v39  ;;  %v3159_v10 = vrot.slane %v3157_v0, 3  ;;  %v3858_v56 = vsel %vm3841_vm6, %v3505_v55, 0 }
 0x114   : > { %679 = vst.msk [vmem:[#allocation2 + $0x38] sm:$0xff] %vm9267_vm1, %v635_v36  ;;  %v917_v25 = vand.u32 15, %v7394_v14  ;;  %v2594_v54 = vsel %vm1461_vm2, %v2584_v49, %v7526_v59  ;;  %v3162_v22 = vrot.slane %v3160_v40, 4  ;;  %v3167_v35 = vrot.slane %v3165_v48, 3  ;;  %v7547_v36 = vld [vmem:[#allocation2 + $0x50] sm:$0xff] }
 0x115   : > { %v3170_v37 = vrot.slane %v3168_v34, 4  ;;  %2723 = vrot.lane.b32.xlu1 %v2594_v54, %s6777_s14  ;;  %v3426_v29 = vrot.slane %v7528_v53, 4  ;;  %v3859_v60 = vsel %vm3842_vm7, %v7458_v31, 0  ;;  %v3876_v18 = vshrl.u32 %v3858_v56, 16  ;;  %v7559_v54 = vld [vmem:[#allocation2 + $0x60] sm:$0xff] }
 0x116   : > { %v3879_v8 = vshll.u32 %v3858_v56, 16  ;;  %v3163_v55 = vor.u32 %v3162_v22, %v3159_v10  ;;  %v3884_v43 = vshrl.u32 %v3859_v60, 16  ;;  %v3887_v49 = vshll.u32 %v3859_v60, 16 }
 0x117   : > { %v7545_v14 = vor.u32 %v3170_v37, %v3167_v35  ;;  %v3878_v28 = vrot.slane %v3876_v18, 4  ;;  %v4923_v40 = vsel %vm7420_vm15, %v7487_v2, 0  ;;  %v4924_v48 = vsel %vm7420_vm15, %v7538_v6, 0 }
 0x118   : > { %v3881_v0 = vrot.slane %v3879_v8, 5  ;;  %v3886_v34 = vrot.slane %v3884_v43, 4  ;;  %v3889_v10 = vrot.slane %v3887_v49, 5  ;;  %v7557_v56 = vrot.slane %v4923_v40, 4  ;;  %v4711_v43 = vld [vmem:[#allocation2 + $0x10] sm:$0xf0] }
 0x119   : > { %v3172_v31 = vsel %vm1639_vm5, %v3163_v55, %v7545_v14  ;;  %3442 = vrot.lane.b32.xlu1 %v3411_v4, %s6776_s13  ;;  %v7563_v35 = vrot.slane %v4924_v48, 4  ;;  %vm1607_vm8 = vcmp.ne.s16.totalorder %v7142_v61, 0  ;;  %v9254_v18 = vrot.slane %v7547_v36, 4  ;;  %v4092_v4 = vld [vmem:[#allocation2 + $0x10] sm:$0xf8] }
 0x11a   : > { %3308 = vrot.lane.b32.xlu0 %v3172_v31, %s6778_s15  ;;  %v3882_v22 = vor.u32 %v3881_v0, %v3878_v28  ;;  %v7569_v8 = vor.u32 %v3889_v10, %v3886_v34  ;;  %v9255_v55 = vrot.slane %v7538_v6, 4  ;;  %v7574_v49 = vor.u32 %v7321_v9, %v7315_v27  ;;  %v5054_v9 = vld [vmem:[#allocation2 + $0x10] sm:$0xf0] }
 0x11b   : > { %9383 = vst [vmem:[#allocation25_spill] sm:$0xff] %v7563_v35  ;;  %v9256_v28 = vrot.slane %v7559_v54, 4  ;;  %v3427_v31 = vsel %vm622_vm13, %v9254_v18, %v3426_v29  ;;  %v2075_v27 = vsel %vm622_vm13, %v7503_v47, %v7557_v56  ;;  %vm2538_vm11 = vcmp.ne.s16.totalorder %v7147_v62, 0 }
 0x11c   : > { %9384 = vst [vmem:[#allocation26_spill] sm:$0xff] %v7574_v49  ;;  %v3891_v34 = vsel %vm1461_vm2, %v3882_v22, %v7569_v8  ;;  %vm7589_vm9 = vcmp.le.s32.totalorder %v917_v25, 14  ;;  %v4960_v22 = vsel %vm622_vm13, %v7557_v56, %v7563_v35  ;;  %v4922_v18 = vsel %vm7420_vm15, %v4711_v43, 0 }
 0x11d   : > { %3458 = vrot.lane.b32.xlu1 %v3427_v31, %s6776_s13  ;;  %v4931_v47 = vsel %vm7420_vm15, %v7528_v53, 0  ;;  %v4477_v25 = vsel %vm3122_vm3, %v4092_v4, 0  ;;  %v3413_v31 = vsel %vm622_vm13, %v3410_v39, %v9255_v55  ;;  %v3429_v43 = vsel %vm622_vm13, %v3426_v29, %v9256_v28 }
 0x11e   : > { %4027 = vrot.lane.b32.xlu0 %v3891_v34, %s6779_s16  ;;  %v4478_v34 = vsel %vm3123_vm4, %v7487_v2, 0  ;;  %v4495_v40 = vshrl.u32 %v4477_v25, 16  ;;  %v4498_v0 = vshll.u32 %v4477_v25, 16  ;;  %v5439_v41 = vsel %vm3841_vm6, %v5054_v9, 0 }
 0x11f   : > { %v4503_v37 = vshrl.u32 %v4478_v34, 16  ;;  %v4506_v60 = vshll.u32 %v4478_v34, 16  ;;  %v4956_v4 = vrot.slane %v4922_v18, 4  ;;  %v4932_v39 = vsel %vm7420_vm15, %v7559_v54, 0 }
 0x120   : > { %v4973_v55 = vrot.slane %v4931_v47, 4  ;;  %v5440_v38 = vsel %vm3842_vm7, %v7487_v2, 0  ;;  %vm1608_vm0 = vcmp.ne.s16.totalorder %v7226_v7, 0  ;;  %v4930_v42 = vsel %vm7420_vm15, %v7547_v36, 0 }
 0x121   : > { %4991 = vrot.lane.b32.xlu1 %v4960_v22, %s6780_s17  ;;  %v4497_v29 = vrot.slane %v4495_v40, 3  ;;  %v4500_v18 = vrot.slane %v4498_v0, 4  ;;  %v5465_v9 = vshrl.u32 %v5440_v38, 16  ;;  %v5457_v25 = vshrl.u32 %v5439_v41, 16 }
 0x122   : > { %3444 = vrot.lane.b32.xlu0 %v3413_v31, %s6776_s13  ;;  %v5460_v47 = vshll.u32 %v5439_v41, 16  ;;  %v5468_v34 = vshll.u32 %v5440_v38, 16  ;;  %v3141_v51 = vsel %vm1607_vm8, %v7487_v2, 0  ;;  %vm2539_vm3 = vcmp.ne.s16.totalorder %v7231_v30, 0 }
 0x123   : > { %v4505_v28 = vrot.slane %v4503_v37, 3  ;;  %v4508_v33 = vrot.slane %v4506_v60, 4  ;;  %v5467_v48 = vrot.slane %v5465_v9, 4  ;;  %v3174_v31 = vshrl.u32 %v3141_v51, 16 }
 0x124   : > { %v5470_v35 = vrot.slane %v5468_v34, 5  ;;  %v3177_v49 = vshll.u32 %v3141_v51, 16  ;;  %v5441_v0 = vsel %vm2537_vm10, %v7538_v6, 0  ;;  %v3860_v40 = vsel %vm2537_vm10, %v7487_v2, 0  ;;  %vm2307_vm10 = vmpackc.low %vm7589_vm9, %vm7589_vm9 }
 0x125   : > { %2106 = vrot.lane.b32.xlu1 %v2075_v27, %s6775_s12  ;;  %v4958_v37 = vsel %vm622_vm13, %v4956_v4, %v7557_v56  ;;  %v7644_v60 = vrot.slane %v4932_v39, 4  ;;  %v7646_v41 = vrot.slane %v4930_v42, 4  ;;  %v5474_v38 = vshrl.u32 %v5441_v0, 16 }
 0x126   : > { %3460 = vrot.lane.b32.xlu0 %v3429_v43, %s6776_s13  ;;  %v5459_v9 = vrot.slane %v5457_v25, 4  ;;  %v5462_v34 = vrot.slane %v5460_v47, 5  ;;  %v5477_v51 = vshll.u32 %v5441_v0, 16  ;;  %v3893_v57 = vshrl.u32 %v3860_v40, 16 }
 0x127   : > { %v4501_v50 = vor.u32 %v4500_v18, %v4497_v29  ;;  %v7648_v15 = vor.u32 %v4508_v33, %v4505_v28  ;;  %v3896_v13 = vshll.u32 %v3860_v40, 16  ;;  %v2555_v27 = vsel %vm2538_vm11, %v7487_v2, 0 }
 0x128   : > { %v7656_v56 = vor.u32 %v5470_v35, %v5467_v48  ;;  %v3176_v43 = vrot.slane %v3174_v31, 3  ;;  %v3179_v4 = vrot.slane %v3177_v49, 4  ;;  %v5476_v39 = vrot.slane %v5474_v38, 4 }
 0x129   : > { %vm9268_vm4 = vcmp.ne.s16.totalorder %v7239_v26, 0  ;;  %2108 = vrot.lane.b32.xlu1 %v4960_v22, %s6775_s12  ;;  %v5479_v33 = vrot.slane %v5477_v51, 5  ;;  %v3895_v28 = vrot.slane %v3893_v57, 4  ;;  %v3898_v42 = vrot.slane %v3896_v13, 5 }
 0x12a   : > { %4989 = vrot.lane.b32.xlu0 %v4958_v37, %s6780_s17  ;;  %v4479_v2 = vsel %vm1607_vm8, %v7538_v6, 0  ;;  %v4976_v35 = vsel %vm622_vm13, %v4973_v55, %v7644_v60  ;;  %v5463_v48 = vor.u32 %v5462_v34, %v5459_v9  ;;  %v2596_v10 = vshrl.u32 %v2555_v27, 16 }
 0x12b   : > { %v7667_v49 = vsel %vm2307_vm10, 65537, %v9362_v52  ;;  %v4974_v22 = vsel %vm622_vm13, %v7646_v41, %v4973_v55  ;;  %v4510_v29 = vsel %vm1639_vm5, %v4501_v50, %v7648_v15  ;;  %v2599_v57 = vshll.u32 %v2555_v27, 16 }
 0x12c   : > { %v3142_v18 = vsel %vm1608_vm0, %v7538_v6, 0  ;;  %vm9277_vm6 = vcmp.ne.s16.totalorder %v7242_v45, 0  ;;  %v5472_v25 = vsel %vm1461_vm2, %v5463_v48, %v7656_v56  ;;  %v7679_v47 = vor.u32 %v3179_v4, %v3176_v43 }
 0x12d   : > { %v4512_v31 = vshrl.u32 %v4479_v2, 16  ;;  %v4515_v0 = vshll.u32 %v4479_v2, 16  ;;  %vm689_vm7 = vcmask 27648   ;;  %5007 = vrot.lane.b32.xlu1 %v4976_v35, %s6780_s17  ;;  %v7683_v50 = vor.u32 %v5479_v33, %v5476_v39 }
 0x12e   : > { %5005 = vrot.lane.b32.xlu0 %v4974_v22, %s6780_s17  ;;  %v7685_v55 = vor.u32 %v3898_v42, %v3895_v28  ;;  %v552_v40 = vadd.f32 %v7450_v63, %v7250_v12  ;;  %v2556_v37 = vsel %vm2539_vm3, %v7538_v6, 0  ;;  %v2598_v38 = vrot.slane %v2596_v10, 4 }
 0x12f   : > { %v3183_v9 = vshrl.u32 %v3142_v18, 16  ;;  %v3186_v34 = vshll.u32 %v3142_v18, 16  ;;  %v544_v51 = vadd.f32 %v7250_v12, %v7460_v44  ;;  %vm9269_vm9 = vcmp.ne.s16.totalorder %v7255_v16, 0 }
 0x130   : > { %v2601_v13 = vrot.slane %v2599_v57, 5  ;;  %v588_v27 = vmax.f32 %v552_v40, 0.0  ;;  %v555_v43 = vadd.f32 %v7465_v32, %v7250_v12  ;;  %v547_v63 = vadd.f32 %v7250_v12, %v7468_v46  ;;  %v6761_v12 = vld [vmem:[%s9226_s3] sm:$0xff]  }
 0x131   : > { %vm9270_vm10 = vcmp.ne.s16.totalorder %v7258_v17, 0  ;;  %v4514_v4 = vrot.slane %v4512_v31, 3  ;;  %v4517_v39 = vrot.slane %v4515_v0, 4  ;;  %v586_v33 = vmax.f32 %v544_v51, 0.0  ;;  %2122 = vrot.lane.b32.xlu1 %v4974_v22, %s6775_s12  ;;  %6665 = vmatprep.subr.bf16.mxu1 %v6761_v12 }
 0x132   : > { %v2605_v28 = vshrl.u32 %v2556_v37, 16  ;;  %4646 = vrot.lane.b32.xlu0 %v4510_v29, %s6781_s18  ;;  %v589_v44 = vmax.f32 %v555_v43, 0.0  ;;  %v587_v42 = vmax.f32 %v547_v63, 0.0  ;;  %v2608_v2 = vshll.u32 %v2556_v37, 16  ;;  %6666 = vmatpush3.bf16.msra.mxu1 %v6761_v12 }
 0x133   : > { %v3861_v32 = vsel %vm2538_vm11, %v7538_v6, 0  ;;  %v3185_v46 = vrot.slane %v3183_v9, 3  ;;  %v3188_v48 = vrot.slane %v3186_v34, 4  ;;  %v3148_v31 = vsel %vm9268_vm4, %v7547_v36, 0 }
 0x134   : > { %v3902_v10 = vshrl.u32 %v3861_v32, 16  ;;  %v3905_v57 = vshll.u32 %v3861_v32, 16  ;;  %v605_v22 = vpack.c.bf16 %v589_v44, %v588_v27  ;;  %v604_v18 = vpack.c.bf16 %v587_v42, %v586_v33 }
 0x135   : > { %v2607_v29 = vrot.slane %v2605_v28, 4  ;;  %v2610_v0 = vrot.slane %v2608_v2, 5  ;;  %v3149_v9 = vsel %vm9277_vm6, %v7528_v53, 0  ;;  %2124 = vrot.lane.b32.xlu1 %v4976_v35, %s6775_s12  ;;  %v2602_v34 = vor.u32 %v2601_v13, %v2598_v38  ;;  %v6762_v35 = vld [vmem:[%s9226_s3 + $0x8] sm:$0xff]  }
 0x136   : > { %v3904_v40 = vrot.slane %v3902_v10, 4  ;;  %v3907_v37 = vrot.slane %v3905_v57, 5  ;;  %5608 = vrot.lane.b32.xlu0 %v5472_v25, %s6782_s21  ;;  %v7718_v51 = vor.u32 %v4517_v39, %v4514_v4  ;;  %v652_v27 = vrot.slane %v605_v22, 4  ;;  %6667 = vmatprep.subr.bf16.mxu1 %v6762_v35 }
 0x137   : > { %v650_v43 = vrot.slane %v604_v18, 4  ;;  %v3181_v63 = vsel %vm1639_vm5, %v7545_v14, %v7679_v47  ;;  %v5481_v33 = vsel %vm1461_vm2, %v7656_v56, %v7683_v50  ;;  %v3237_v28 = vshrl.u32 %v3148_v31, 16  ;;  %6668 = vmatpush3.bf16.msra.mxu1 %v6762_v35 }
 0x138   : > { %v3240_v44 = vshll.u32 %v3148_v31, 16  ;;  %690 = vst.msk [vmem:[#allocation2 + $0x88] sm:$0xf] %vm689_vm7, %v652_v27  ;;  %v9387_v25 = vrot.slane %v7444_v11, 4  ;;  %v3246_v4 = vshrl.u32 %v3149_v9, 16  ;;  %v3249_v14 = vshll.u32 %v3149_v9, 16 }
 0x139   : > { %v653_v13 = vsel %vm622_vm13, %v650_v43, %v652_v27  ;;  %v3900_v56 = vsel %vm1461_vm2, %v7569_v8, %v7685_v55  ;;  %v7737_v39 = vor.u32 %v3188_v48, %v3185_v46  ;;  %v7741_v42 = vor.u32 %v2610_v0, %v2607_v29  ;;  %3310 = vrot.lane.b32.xlu1 %v3181_v63, %s6778_s15 }
 0x13a   : > { %v651_v38 = vsel %vm622_vm13, %v9387_v25, %v650_v43  ;;  %688 = vst.msk [vmem:[#allocation2 + $0x80] sm:$0xff] %vm9267_vm1, %v653_v13  ;;  %v7743_v2 = vor.u32 %v3907_v37, %v3904_v40  ;;  %vm2546_vm7 = vcmp.ne.s16.totalorder %v7270_v21, 0  ;;  %5610 = vrot.lane.b32.xlu0 %v5481_v33, %s6782_s21  ;;  %v2603_v11 = vsel %vm1461_vm2, %v7526_v59, %v2602_v34 }
 0x13b   : > { %687 = vst.msk [vmem:[#allocation2 + $0x78] sm:$0xff] %vm9267_vm1, %v651_v38  ;;  %v4519_v8 = vsel %vm1639_vm5, %v7648_v15, %v7718_v51  ;;  %v4485_v32 = vsel %vm9269_vm9, %v7547_v36, 0  ;;  %v4486_v12 = vsel %vm9268_vm4, %v7528_v53, 0  ;;  %v3239_v46 = vrot.slane %v3237_v28, 3 }
 0x13c   : > { %v4575_v48 = vshrl.u32 %v4486_v12, 16  ;;  %v4578_v10 = vshll.u32 %v4486_v12, 16  ;;  %v3867_v57 = vsel %vm9270_vm10, %v7547_v36, 0  ;;  %vm2547_vm1 = vcmp.ne.s16.totalorder %v7274_v23, 0 }
 0x13d   : > { %v3242_v59 = vrot.slane %v3240_v44, 4  ;;  %v3248_v15 = vrot.slane %v3246_v4, 3  ;;  %v3251_v22 = vrot.slane %v3249_v14, 4  ;;  %v3868_v18 = vsel %vm2545_vm12, %v7528_v53, 0  ;;  %4029 = vrot.lane.b32.xlu1 %v3900_v56, %s6779_s16 }
 0x13e   : > { %v9388_v29 = vand.u32 15, %v7397_v3  ;;  %v3190_v0 = vsel %vm1639_vm5, %v7679_v47, %v7737_v39  ;;  %v2612_v40 = vsel %vm1461_vm2, %v2602_v34, %v7741_v42  ;;  %v3909_v37 = vsel %vm1461_vm2, %v7685_v55, %v7743_v2  ;;  %2725 = vrot.lane.b32.xlu0 %v2603_v11, %s6777_s14 }
 0x13f   : > { %v4566_v9 = vshrl.u32 %v4485_v32, 16  ;;  %v4569_v3 = vshll.u32 %v4485_v32, 16  ;;  %v4577_v27 = vrot.slane %v4575_v48, 3  ;;  %v4580_v43 = vrot.slane %v4578_v10, 4 }
 0x140   : > { %vm7768_vm4 = vcmp.le.s32.totalorder %v9388_v29, 14  ;;  %v3956_v63 = vshrl.u32 %v3867_v57, 16  ;;  %v3959_v33 = vshll.u32 %v3867_v57, 16  ;;  %v3965_v28 = vshrl.u32 %v3868_v18, 16 }
 0x141   : > { %v5447_v47 = vsel %vm9275_vm14, %v7547_v36, 0  ;;  %v5448_v34 = vsel %vm9270_vm10, %v7528_v53, 0  ;;  %v7788_v55 = vor.u32 %v3242_v59, %v3239_v46  ;;  %v7790_v44 = vor.u32 %v3251_v22, %v3248_v15  ;;  %4648 = vrot.lane.b32.xlu1 %v4519_v8, %s6781_s18  ;;  %vm2309_vm10 = vmpackc.low %vm7768_vm4, %vm7768_vm4 }
 0x142   : > { %v3968_v35 = vshll.u32 %v3868_v18, 16  ;;  %v5528_v25 = vshrl.u32 %v5447_v47, 16  ;;  %vm1616_vm9 = vcmp.ne.s16.totalorder %v7278_v24, 0  ;;  %v4568_v38 = vrot.slane %v4566_v9, 3  ;;  %3312 = vrot.lane.b32.xlu0 %v3190_v0, %s6778_s15 }
 0x143   : > { %9391 = vst [vmem:[#allocation27_spill] sm:$0xff] %v7788_v55  ;;  %v5531_v13 = vshll.u32 %v5447_v47, 16  ;;  %v5537_v4 = vshrl.u32 %v5448_v34, 16  ;;  %v5540_v14 = vshll.u32 %v5448_v34, 16  ;;  %v4571_v56 = vrot.slane %v4569_v3, 4 }
 0x144   : > { %v7795_v11 = vor.u32 %v4580_v43, %v4577_v27  ;;  %v3958_v32 = vrot.slane %v3956_v63, 4  ;;  %v4487_v12 = vsel %vm9277_vm6, %v7559_v54, 0  ;;  %v3961_v46 = vrot.slane %v3959_v33, 5 }
 0x145   : > { %v3967_v48 = vrot.slane %v3965_v28, 4  ;;  %v4584_v10 = vshrl.u32 %v4487_v12, 16  ;;  %v4587_v57 = vshll.u32 %v4487_v12, 16  ;;  %v3970_v59 = vrot.slane %v3968_v35, 5  ;;  %2727 = vrot.lane.b32.xlu1 %v2612_v40, %s6777_s14 }
 0x146   : > { %v5530_v15 = vrot.slane %v5528_v25, 4  ;;  %v5449_v8 = vsel %vm2545_vm12, %v7559_v54, 0  ;;  %v2563_v22 = vsel %vm2546_vm7, %v7528_v53, 0  ;;  %v5533_v18 = vrot.slane %v5531_v13, 5  ;;  %4031 = vrot.lane.b32.xlu0 %v3909_v37, %s6779_s16 }
 0x147   : > { %v5539_v29 = vrot.slane %v5537_v4, 4  ;;  %v5542_v0 = vrot.slane %v5540_v14, 5  ;;  %v5546_v9 = vshrl.u32 %v5449_v8, 16  ;;  %v4586_v3 = vrot.slane %v4584_v10, 3 }
 0x148   : > { %v4589_v27 = vrot.slane %v4587_v57, 4  ;;  %v5549_v43 = vshll.u32 %v5449_v8, 16  ;;  %v2564_v63 = vsel %vm2547_vm1, %v7559_v54, 0  ;;  %v3253_v33 = vsel %vm1639_vm5, %v7788_v55, %v7790_v44 }
 0x149   : > { %v7814_v53 = vor.u32 %v4571_v56, %v4568_v38  ;;  %v2668_v28 = vshrl.u32 %v2563_v22, 16  ;;  %v2671_v47 = vshll.u32 %v2563_v22, 16  ;;  %v5548_v40 = vrot.slane %v5546_v9, 4  ;;  %3326 = vrot.lane.b32.xlu1 %v3253_v33, %s6778_s15 }
 0x14a   : > { %v5551_v37 = vrot.slane %v5549_v43, 5  ;;  %v2677_v34 = vshrl.u32 %v2564_v63, 16  ;;  %v2680_v35 = vshll.u32 %v2564_v63, 16  ;;  %v7822_v13 = vor.u32 %v3970_v59, %v3967_v48 }
 0x14b   : > { %9392 = vst [vmem:[#allocation28_spill] sm:$0xff] %v7814_v53  ;;  %v4582_v25 = vsel %vm1639_vm5, %v7814_v53, %v7795_v11  ;;  %v5543_v4 = vor.u32 %v5542_v0, %v5539_v29  ;;  %v2562_v38 = vsel %vm2545_vm12, %v7547_v36, 0  ;;  %v7829_v31 = vor.u32 %v3961_v46, %v3958_v32 }
 0x14c   : > { %4662 = vrot.lane.b32.xlu0 %v4582_v25, %s6781_s18  ;;  %v7831_v14 = vor.u32 %v5533_v18, %v5530_v15  ;;  %v7833_v56 = vor.u32 %v4589_v27, %v4586_v3  ;;  %v2341_v12 = vsel %vm2309_vm10, 65537, %v9362_v52  ;;  %v2670_v10 = vrot.slane %v2668_v28, 4 }
 0x14d   : > { %9393 = vst [vmem:[#allocation29_spill] sm:$0xff] %v7829_v31  ;;  %v2659_v48 = vshrl.u32 %v2562_v38, 16  ;;  %v2662_v57 = vshll.u32 %v2562_v38, 16  ;;  %v3150_v19 = vsel %vm1616_vm9, %v7559_v54, 0  ;;  %v7839_v59 = vor.u32 %v5551_v37, %v5548_v40 }
 0x14e   : > { %9394 = vst [vmem:[#allocation30_spill] sm:$0xff] %v7831_v14  ;;  %v2673_v8 = vrot.slane %v2671_v47, 5  ;;  %v2679_v22 = vrot.slane %v2677_v34, 4  ;;  %v2682_v29 = vrot.slane %v2680_v35, 5  ;;  %v3972_v32 = vsel %vm1461_vm2, %v7829_v31, %v7822_v13 }
 0x14f   : > { %v5544_v46 = vsel %vm1461_vm2, %v7831_v14, %v5543_v4  ;;  %v3255_v15 = vshrl.u32 %v3150_v19, 16  ;;  %v3258_v18 = vshll.u32 %v3150_v19, 16  ;;  %4045 = vrot.lane.b32.xlu1 %v3972_v32, %s6779_s16  ;;  %v3869_v0 = vsel %vm2546_vm7, %v7559_v54, 0 }
 0x150   : > { %5624 = vrot.lane.b32.xlu0 %v5544_v46, %s6782_s21  ;;  %v2449_v9 = vshll.u32 %v7402_v5, 16  ;;  %v6455_v3 = vcombine.low %v6908_v1, %v7667_v49  ;;  %v6456_v27 = vcombine.low %v6908_v1, %v2341_v12  ;;  %v2661_v43 = vrot.slane %v2659_v48, 4  ;;  %v7866_v49 = vld [vmem:[#allocation2 + $0x28] sm:$0xff] }
 0x151   : > { %v2664_v63 = vrot.slane %v2662_v57, 5  ;;  %v9395_v33 = vshrl.u32 %v7389_v58, 16  ;;  %v9396_v47 = vshll.u32 %v7389_v58, 16  ;;  %v4591_v37 = vsel %vm1639_vm5, %v7795_v11, %v7833_v56 }
 0x152   : > { %v5553_v34 = vsel %vm1461_vm2, %v5543_v4, %v7839_v59  ;;  %v2674_v35 = vor.u32 %v2673_v8, %v2670_v10  ;;  %v7864_v25 = vor.u32 %v2682_v29, %v2679_v22  ;;  %v3257_v38 = vrot.slane %v3255_v15, 3  ;;  %v9398_v4 = vld [vmem:[#allocation23_spill] sm:$0xff]  ;;  %v9401_v15 = vld [vmem:[#allocation4_spill] sm:$0xff] }
 0x153   : > { %v1572_v28 = vrot.slane %v9395_v33, 4  ;;  %v1575_v40 = vrot.slane %v9396_v47, 5  ;;  %v3260_v12 = vrot.slane %v3258_v18, 4  ;;  %v3974_v48 = vshrl.u32 %v3869_v0, 16  ;;  %4664 = vrot.lane.b32.xlu1 %v4591_v37, %s6781_s18  ;;  %v7880_v47 = vld [vmem:[#allocation2 + $0x68] sm:$0xff] }
 0x154   : > { %v3977_v57 = vshll.u32 %v3869_v0, 16  ;;  %5626 = vrot.lane.b32.xlu0 %v5553_v34, %s6782_s21  ;;  %v2509_v58 = vshrl.u32 %v6455_v3, 16  ;;  %v2512_v19 = vshll.u32 %v6455_v3, 16  ;;  %v2518_v32 = vshrl.u32 %v6456_v27, 16 }
 0x155   : > { %v2521_v11 = vshll.u32 %v6456_v27, 16  ;;  %v7870_v46 = vor.u32 %v2664_v63, %v2661_v43  ;;  %v9399_v10 = vshrl.u32 %v9398_v4, 16  ;;  %v9400_v22 = vshll.u32 %v9398_v4, 16 }
 0x156   : > { %v718_v18 = vadd.s32 208, %v9401_v15  ;;  %v2684_v0 = vsel %vm1461_vm2, %v2674_v35, %v7864_v25  ;;  %v9402_v3 = vshrl.u32 %v7402_v5, 16  ;;  %v2451_v43 = vrot.slane %v2449_v9, 4 }
 0x157   : > { %9397 = vst [vmem:[#allocation31_spill] sm:$0xff] %v7870_v46  ;;  %v1509_v8 = vrot.slane %v9399_v10, 4  ;;  %v1512_v29 = vrot.slane %v9400_v22, 5  ;;  %v2675_v63 = vsel %vm1461_vm2, %v7870_v46, %v2674_v35  ;;  %v7886_v37 = vor.u32 %v3260_v12, %v3257_v38  ;;  %2743 = vrot.lane.b32.xlu1 %v2684_v0, %s6777_s14  ;;  %v7890_v10 = vld [vmem:[#allocation2 + $0x30] sm:$0xff]  ;;  %v9407_v0 = vld [vmem:[#allocation9_spill] sm:$0xff] }
 0x158   : > { %v2448_v27 = vrot.slane %v9402_v3, 3  ;;  %v3976_v34 = vrot.slane %v3974_v48, 4  ;;  %v3979_v4 = vrot.slane %v3977_v57, 5  ;;  %2741 = vrot.lane.b32.xlu0 %v2675_v63, %s6777_s14  ;;  %v2511_v22 = vrot.slane %v2509_v58, 3  ;;  %v9406_v57 = vld [vmem:[#allocation26_spill] sm:$0xff]  ;;  %v7923_v63 = vld [vmem:[#allocation2 + $0x70] sm:$0xff] }
 0x159   : > { %v2514_v33 = vrot.slane %v2512_v19, 4  ;;  %v2520_v26 = vrot.slane %v2518_v32, 3  ;;  %v2523_v53 = vrot.slane %v2521_v11, 4  ;;  %v3430_v5 = vrot.slane %v7880_v47, 4  ;;  %v9408_v19 = vld [vmem:[#allocation19_spill] sm:$0xff]  ;;  %v9409_v32 = vld [vmem:[#allocation21_spill] sm:$0xff] }
 0x15a   : > { %v7893_v9 = vor.u32 %v1512_v29, %v1509_v8  ;;  %v7895_v3 = vor.u32 %v1575_v40, %v1572_v28  ;;  %v910_v35 = vand.u32 15, %v718_v18  ;;  %v9404_v38 = vrot.slane %v7866_v49, 4  ;;  %v9410_v11 = vld [vmem:[#allocation22_spill] sm:$0xff]  ;;  %v9417_v46 = vld [vmem:[#allocation13_spill] sm:$0xff] }
 0x15b   : > { %v9405_v12 = vrot.slane %v7538_v6, 4  ;;  %v7905_v58 = vsel %vm1639_vm5, %v9407_v0, %v9406_v57  ;;  %vm1606_vm12 = vcmp.ne.s16.totalorder %v9408_v19, 0  ;;  %v3262_v28 = vsel %vm1639_vm5, %v7790_v44, %v7886_v37 }
 0x15c   : > { %9403 = vst [vmem:[#allocation23_spill] sm:$0xff] %v7893_v9  ;;  %v7913_v40 = vor.u32 %v3979_v4, %v3976_v34  ;;  %v4925_v29 = vsel %vm7420_vm15, %v7866_v49, 0  ;;  %v4926_v18 = vsel %vm7420_vm15, %v7890_v10, 0  ;;  %3328 = vrot.lane.b32.xlu0 %v3262_v28, %s6778_s15  ;;  %v7926_v44 = vor.u32 %v2451_v43, %v2448_v27 }
 0x15d   : > { %v3415_v48 = vsel %vm622_vm13, %v9405_v12, %v9404_v38  ;;  %v9412_v38 = vld [vmem:[#allocation20_spill] sm:$0xff]  ;;  %v1237_v12 = vld [vmem:[#allocation2 + $0x8] sm:$0xff]  ;;  %v2515_v34 = vor.u32 %v2514_v33, %v2511_v22  ;;  %v7928_v4 = vor.u32 %v2523_v53, %v2520_v26  ;;  %v9415_v0 = vrot.slane %v7559_v54, 4 }
 0x15e   : > { %3446 = vrot.lane.b32.xlu1 %v3415_v48, %s6776_s13  ;;  %vm1609_vm4 = vcmp.ne.s16.totalorder %v9412_v38, 0  ;;  %9413 = vst [vmem:[#allocation4_spill] sm:$0xff] %v7926_v44  ;;  %vm2540_vm10 = vcmp.ne.s16.totalorder %v7905_v58, 0  ;;  %v9416_v48 = vld [vmem:[#allocation15_spill] sm:$0xff]  ;;  %v7942_v31 = vsel %vm1461_vm2, %v9417_v46, %v7895_v3  ;;  %vm7944_vm14 = vcmp.ge.s32.totalorder %v910_v35, 1 }
 0x15f   : > { %9414 = vst [vmem:[#allocation26_spill] sm:$0xff] %v7928_v4  ;;  %v3431_v8 = vsel %vm622_vm13, %v9415_v0, %v3430_v5  ;;  %v7937_v28 = vsel %vm1461_vm2, %v9416_v48, %v7893_v9  ;;  %v4961_v26 = vrot.slane %v4925_v29, 4  ;;  %v7948_v54 = vrot.slane %v4926_v18, 4  ;;  %v9421_v18 = vld [vmem:[#allocation12_spill] sm:$0xff] }
 0x160   : > { %v4933_v27 = vsel %vm7420_vm15, %v7880_v47, 0  ;;  %v3981_v43 = vsel %vm1461_vm2, %v7822_v13, %v7913_v40  ;;  %v4934_v46 = vsel %vm7420_vm15, %v7923_v63, 0  ;;  %v4480_v22 = vsel %vm1608_vm0, %v7866_v49, 0 }
 0x161   : > { %9420 = vst [vmem:[#allocation9_spill] sm:$0xff] %v7948_v54  ;;  %v1623_v35 = vsel %vm1606_vm12, %v1237_v12, 0  ;;  %4047 = vrot.lane.b32.xlu0 %v3981_v43, %s6779_s16  ;;  %v7970_v13 = vsel %vm1639_vm5, %v9406_v57, %v7926_v44  ;;  %v7974_v0 = vsel %vm1639_vm5, %v9421_v18, %v2515_v34  ;;  %v7978_v48 = vsel %vm1639_vm5, %v2515_v34, %v7928_v4  ;;  %vm1375_vm12 = vmpackc.low %vm7944_vm14, %vm7944_vm14 }
 0x162   : > { %3462 = vrot.lane.b32.xlu1 %v3431_v8, %s6776_s13  ;;  %v1649_v29 = vshrl.u32 %v1623_v35, 16  ;;  %v4977_v8 = vrot.slane %v4933_v27, 4  ;;  %v5442_v57 = vsel %vm2538_vm11, %v7866_v49, 0  ;;  %v1652_v12 = vshll.u32 %v1623_v35, 16 }
 0x163   : > { %v7987_v43 = vrot.slane %v4934_v46, 4  ;;  %v4521_v18 = vshrl.u32 %v4480_v22, 16  ;;  %v4524_v53 = vshll.u32 %v4480_v22, 16  ;;  %vm1610_vm6 = vcmp.ne.s16.totalorder %v7937_v28, 0  ;;  %v9425_v46 = vld [vmem:[#allocation25_spill] sm:$0xff] }
 0x164   : > { %v1651_v55 = vrot.slane %v1649_v29, 3  ;;  %v4964_v34 = vsel %vm622_vm13, %v4961_v26, %v7948_v54  ;;  %v9423_v33 = vrot.slane %v7890_v10, 4  ;;  %v9424_v19 = vrot.slane %v7866_v49, 4 }
 0x165   : > { %9422 = vst [vmem:[#allocation19_spill] sm:$0xff] %v7987_v43  ;;  %v1654_v4 = vrot.slane %v1652_v12, 4  ;;  %vm9290_vm14 = vcmp.ne.s16.totalorder %v7970_v13, 0  ;;  %v7999_v62 = vsel %vm1375_vm12, 65537, %v9362_v52  ;;  %v2079_v22 = vsel %vm622_vm13, %v9425_v46, %v4961_v26 }
 0x166   : > { %v3417_v27 = vsel %vm622_vm13, %v9424_v19, %v9423_v33  ;;  %4995 = vrot.lane.b32.xlu1 %v4964_v34, %s6780_s17  ;;  %v5483_v35 = vshrl.u32 %v5442_v57, 16  ;;  %v5486_v29 = vshll.u32 %v5442_v57, 16  ;;  %v3143_v17 = vsel %vm1609_vm4, %v7866_v49, 0  ;;  %v1238_v19 = vld [vmem:[#allocation2 + $0x10] sm:$0xff] }
 0x167   : > { %3448 = vrot.lane.b32.xlu0 %v3417_v27, %s6776_s13  ;;  %v9426_v12 = vrot.slane %v7923_v63, 4  ;;  %v8013_v14 = vsel %vm622_vm13, %v7644_v60, %v4977_v8  ;;  %v1655_v20 = vor.u32 %v1654_v4, %v1651_v55  ;;  %v8017_v27 = vsel %vm622_vm13, %v4977_v8, %v7987_v43 }
 0x168   : > { %v4523_v26 = vrot.slane %v4521_v18, 3  ;;  %v4526_v57 = vrot.slane %v4524_v53, 4  ;;  %v5443_v46 = vsel %vm2539_vm3, %v7890_v10, 0  ;;  %v3192_v16 = vshrl.u32 %v3143_v17, 16 }
 0x169   : > { %v3433_v33 = vsel %vm622_vm13, %v3430_v5, %v9426_v12  ;;  %v3862_v5 = vsel %vm2539_vm3, %v7866_v49, 0  ;;  %v9427_v60 = vor.u32 %v9410_v11, %v9409_v32  ;;  %v1624_v4 = vsel %vm1607_vm8, %v1238_v19, 0 }
 0x16a   : > { %2110 = vrot.lane.b32.xlu1 %v2079_v22, %s6775_s12  ;;  %v5485_v53 = vrot.slane %v5483_v35, 4  ;;  %v5488_v8 = vrot.slane %v5486_v29, 5  ;;  %v3195_v18 = vshll.u32 %v3143_v17, 16  ;;  %v2557_v30 = vsel %vm2540_vm10, %v7866_v49, 0 }
 0x16b   : > { %v1656_v55 = vsel %vm1639_vm5, %v9427_v60, %v1655_v20  ;;  %3464 = vrot.lane.b32.xlu0 %v3433_v33, %s6776_s13  ;;  %vm9428_vm11 = vcmask 31744   ;;  %v5492_v12 = vshrl.u32 %v5443_v46, 16  ;;  %v4481_v32 = vsel %vm1609_vm4, %v7890_v10, 0 }
 0x16c   : > { %1808 = vst.msk [vmem:[#allocation3] sm:$0xff] %vm9428_vm11, %v1656_v55  ;;  %v1658_v61 = vshrl.u32 %v1624_v4, 16  ;;  %v1661_v11 = vshll.u32 %v1624_v4, 16  ;;  %v8040_v19 = vor.u32 %v4526_v57, %v4523_v26  ;;  %v5495_v60 = vshll.u32 %v5443_v46, 16  ;;  %vm9429_vm3 = vmmov %vm9428_vm11 }
 0x16d   : > { %v3911_v33 = vshrl.u32 %v3862_v5, 16  ;;  %v3914_v35 = vshll.u32 %v3862_v5, 16  ;;  %vm1617_vm8 = vcmp.ne.s16.totalorder %v7942_v31, 0  ;;  %v2614_v17 = vshrl.u32 %v2557_v30, 16 }
 0x16e   : > { %v2617_v29 = vshll.u32 %v2557_v30, 16  ;;  %v1660_v43 = vrot.slane %v1658_v61, 3  ;;  %v1663_v49 = vrot.slane %v1661_v11, 4  ;;  %2112 = vrot.lane.b32.xlu1 %v4964_v34, %s6775_s12  ;;  %v5489_v55 = vor.u32 %v5488_v8, %v5485_v53 }
 0x16f   : > { %4993 = vrot.lane.b32.xlu0 %v2079_v22, %s6780_s17  ;;  %v3194_v54 = vrot.slane %v3192_v16, 3  ;;  %v4530_v9 = vshrl.u32 %v4481_v32, 16  ;;  %v4533_v44 = vshll.u32 %v4481_v32, 16  ;;  %v3197_v4 = vrot.slane %v3195_v18, 4 }
 0x170   : > { %v5494_v26 = vrot.slane %v5492_v12, 4  ;;  %v3144_v57 = vsel %vm1610_vm6, %v7890_v10, 0  ;;  %v8048_v46 = vor.u32 %v1663_v49, %v1660_v43  ;;  %v5497_v5 = vrot.slane %v5495_v60, 5 }
 0x171   : > { %v3913_v30 = vrot.slane %v3911_v33, 4  ;;  %v2558_v34 = vsel %vm9290_vm14, %v7890_v10, 0  ;;  %v3863_v16 = vsel %vm2540_vm10, %v7890_v10, 0  ;;  %v3916_v22 = vrot.slane %v3914_v35, 5 }
 0x172   : > { %v2616_v53 = vrot.slane %v2614_v17, 4  ;;  %v2619_v8 = vrot.slane %v2617_v29, 5  ;;  %v1665_v18 = vsel %vm1639_vm5, %v1655_v20, %v8048_v46  ;;  %5011 = vrot.lane.b32.xlu1 %v8017_v27, %s6780_s17  ;;  %v4532_v43 = vrot.slane %v4530_v9, 3 }
 0x173   : > { %5009 = vrot.lane.b32.xlu0 %v8013_v14, %s6780_s17  ;;  %v4535_v12 = vrot.slane %v4533_v44, 4  ;;  %v3201_v32 = vshrl.u32 %v3144_v57, 16  ;;  %v3204_v61 = vshll.u32 %v3144_v57, 16  ;;  %1809 = vst.msk [vmem:[#allocation3 + $0x8] sm:$0xff] %vm9429_vm3, %v1665_v18  ;;  %v8063_v11 = vor.u32 %v3197_v4, %v3194_v54 }
 0x174   : > { %v2623_v60 = vshrl.u32 %v2558_v34, 16  ;;  %v2626_v33 = vshll.u32 %v2558_v34, 16  ;;  %v3920_v35 = vshrl.u32 %v3863_v16, 16  ;;  %v4528_v20 = vsel %vm1639_vm5, %v7718_v51, %v8040_v19 }
 0x175   : > { %v5490_v17 = vsel %vm1461_vm2, %v7683_v50, %v5489_v55  ;;  %v3923_v29 = vshll.u32 %v3863_v16, 16  ;;  %v6422_v9 = vcombine.low %v7999_v62, %v6908_v1  ;;  %v8072_v44 = vor.u32 %v5497_v5, %v5494_v26 }
 0x176   : > { %v8074_v49 = vor.u32 %v3916_v22, %v3913_v30  ;;  %v2620_v54 = vor.u32 %v2619_v8, %v2616_v53  ;;  %vm9294_vm12 = vcmask 64544   ;;  %v3151_v4 = vsel %vm1617_vm8, %v7880_v47, 0  ;;  %2126 = vrot.lane.b32.xlu1 %v8013_v14, %s6775_s12  ;;  %v1239_v8 = vld [vmem:[#allocation2 + $0x18] sm:$0xff] }
 0x177   : > { %4650 = vrot.lane.b32.xlu0 %v4528_v20, %s6781_s18  ;;  %v8082_v50 = vor.u32 %v4535_v12, %v4532_v43  ;;  %v3203_v51 = vrot.slane %v3201_v32, 3  ;;  %v3206_v57 = vrot.slane %v3204_v61, 4  ;;  %v4488_v62 = vsel %vm1616_vm9, %v7880_v47, 0 }
 0x178   : > { %v3199_v26 = vsel %vm1639_vm5, %v7737_v39, %v8063_v11  ;;  %v2625_v5 = vrot.slane %v2623_v60, 4  ;;  %v2628_v30 = vrot.slane %v2626_v33, 5  ;;  %v3922_v34 = vrot.slane %v3920_v35, 4 }
 0x179   : > { %v3925_v16 = vrot.slane %v3923_v29, 5  ;;  %v3264_v22 = vshrl.u32 %v3151_v4, 16  ;;  %v3267_v14 = vshll.u32 %v3151_v4, 16  ;;  %v3870_v53 = vsel %vm2547_vm1, %v7880_v47, 0  ;;  %v1240_v29 = vld [vmem:[#allocation2 + $0x20] sm:$0xff] }
 0x17a   : > { %v5499_v18 = vsel %vm1461_vm2, %v5489_v55, %v8072_v44  ;;  %v3918_v43 = vsel %vm1461_vm2, %v7743_v2, %v8074_v49  ;;  %v4593_v12 = vshrl.u32 %v4488_v62, 16  ;;  %v4596_v39 = vshll.u32 %v4488_v62, 16  ;;  %2128 = vrot.lane.b32.xlu1 %v8017_v27, %s6775_s12 }
 0x17b   : > { %5612 = vrot.lane.b32.xlu0 %v5490_v17, %s6782_s21  ;;  %v2621_v32 = vsel %vm1461_vm2, %v7741_v42, %v2620_v54  ;;  %v4537_v61 = vsel %vm1639_vm5, %v8040_v19, %v8082_v50  ;;  %v8106_v60 = vor.u32 %v3206_v57, %v3203_v51  ;;  %v5450_v2 = vsel %vm2546_vm7, %v7880_v47, 0 }
 0x17c   : > { %vm2769_vm11 = vcmask 97344   ;;  %v8111_v55 = vor.u32 %v2628_v30, %v2625_v5  ;;  %v3983_v33 = vshrl.u32 %v3870_v53, 16  ;;  %v3986_v27 = vshll.u32 %v3870_v53, 16 }
 0x17d   : > { %vm9293_vm3 = vcmp.ne.s16.totalorder %v7974_v0, 0  ;;  %v1625_v42 = vsel %vm1608_vm0, %v1239_v8, 0  ;;  %v8116_v35 = vor.u32 %v3925_v16, %v3922_v34  ;;  %v3266_v20 = vrot.slane %v3264_v22, 3  ;;  %v2103_v34 = vpop.permute.xlu0 %2102 }
 0x17e   : > { %v3269_v19 = vrot.slane %v3267_v14, 4  ;;  %vm9292_vm14 = vcmp.ne.s16.totalorder %v7978_v48, 0  ;;  %v1667_v17 = vshrl.u32 %v1625_v42, 16  ;;  %v4595_v21 = vrot.slane %v4593_v12, 3  ;;  %3314 = vrot.lane.b32.xlu1 %v3199_v26, %s6778_s15  ;;  %2151 = vst.msk [vmem:[#allocation3] sm:$0xff] %vm9294_vm12, %v2103_v34 }
 0x17f   : > { %v4598_v4 = vrot.slane %v4596_v39, 4  ;;  %v5555_v51 = vshrl.u32 %v5450_v2, 16  ;;  %v1670_v57 = vshll.u32 %v1625_v42, 16  ;;  %5614 = vrot.lane.b32.xlu0 %v5499_v18, %s6782_s21  ;;  %v5558_v62 = vshll.u32 %v5450_v2, 16 }
 0x180   : > { %v1669_v5 = vrot.slane %v1667_v17, 3  ;;  %v1579_v7 = vshrl.u32 %v6422_v9, 16  ;;  %v1582_v30 = vshll.u32 %v6422_v9, 16  ;;  %v3985_v16 = vrot.slane %v3983_v33, 4 }
 0x181   : > { %v3988_v22 = vrot.slane %v3986_v27, 5  ;;  %v1672_v14 = vrot.slane %v1670_v57, 4  ;;  %v1626_v53 = vsel %vm1609_vm4, %v1240_v29, 0  ;;  %v4489_v8 = vsel %vm1617_vm8, %v7923_v63, 0  ;;  %v1246_v29 = vld [vmem:[#allocation2 + $0x50] sm:$0xff] }
 0x182   : > { %v1581_v26 = vrot.slane %v1579_v7, 4  ;;  %v1584_v12 = vrot.slane %v1582_v30, 5  ;;  %v1676_v18 = vshrl.u32 %v1626_v53, 16  ;;  %v3208_v9 = vsel %vm1639_vm5, %v8063_v11, %v8106_v60  ;;  %4033 = vrot.lane.b32.xlu1 %v3918_v43, %s6779_s16  ;;  %v1247_v43 = vld [vmem:[#allocation2 + $0x58] sm:$0xff]  ;;  %v8142_v7 = vpop.permute.xlu0 %3440  ;;  %v2722_v30 = vpop.permute.xlu1 %2721 }
 0x183   : > { %v2630_v39 = vsel %vm1461_vm2, %v2620_v54, %v8111_v55  ;;  %v1673_v2 = vor.u32 %v1672_v14, %v1669_v5  ;;  %v1679_v33 = vshll.u32 %v1626_v53, 16  ;;  %2729 = vrot.lane.b32.xlu0 %v2621_v32, %s6777_s14  ;;  %v5557_v38 = vrot.slane %v5555_v51, 4  ;;  %2770 = vst.msk [vmem:[#allocation3] sm:$0xff] %vm2769_vm11, %v2722_v30 }
 0x184   : > { %v5560_v27 = vrot.slane %v5558_v62, 5  ;;  %v5451_v42 = vsel %vm2547_vm1, %v7923_v63, 0  ;;  %v1678_v17 = vrot.slane %v1676_v18, 3  ;;  %v3927_v11 = vsel %vm1461_vm2, %v8074_v49, %v8116_v35 }
 0x185   : > { %v4602_v57 = vshrl.u32 %v4489_v8, 16  ;;  %v1674_v54 = vsel %vm1639_vm5, %v8048_v46, %v1673_v2  ;;  %v1681_v5 = vrot.slane %v1679_v33, 4  ;;  %v8144_v32 = vor.u32 %v3269_v19, %v3266_v20 }
 0x186   : > { %v8146_v51 = vor.u32 %v4598_v4, %v4595_v21  ;;  %v8148_v23 = vor.u32 %v3988_v22, %v3985_v16  ;;  %vm9430_vm1 = vcmask 31744   ;;  %v8151_v62 = vor.u32 %v1584_v12, %v1581_v26  ;;  %4652 = vrot.lane.b32.xlu1 %v4537_v61, %s6781_s18  ;;  %v2105_v53 = vpop.permute.xlu0 %2104  ;;  %v1248_v12 = vld [vmem:[#allocation2 + $0x60] sm:$0xff] }
 0x187   : > { %1810 = vst.msk [vmem:[#allocation3 + $0x10] sm:$0xff] %vm9430_vm1, %v1674_v54  ;;  %v4605_v49 = vshll.u32 %v4489_v8, 16  ;;  %v5564_v34 = vshrl.u32 %v5451_v42, 16  ;;  %v8153_v14 = vor.u32 %v1681_v5, %v1678_v17  ;;  %vm9431_vm0 = vcmp.ne.s16.totalorder %v7242_v45, 0  ;;  %3316 = vrot.lane.b32.xlu0 %v3208_v9, %s6778_s15  ;;  %vm9432_vm4 = vmmov %vm9430_vm1  ;;  %v2724_v54 = vpop.permute.xlu1 %2723 }
 0x188   : > { %v1632_v46 = vsel %vm9431_vm0, %v1246_v29, 0  ;;  %vm3356_vm7 = vcmask 130144   ;;  %v8160_v20 = vor.u32 %v5560_v27, %v5557_v38  ;;  %v5567_v19 = vshll.u32 %v5451_v42, 16  ;;  %2152 = vst.msk [vmem:[#allocation3 + $0x8] sm:$0xff] %vm9294_vm12, %v2105_v53 }
 0x189   : > { %v2565_v21 = vsel %vm9293_vm3, %v7880_v47, 0  ;;  %v1633_v4 = vsel %vm1616_vm9, %v1247_v43, 0  ;;  %v4604_v16 = vrot.slane %v4602_v57, 3  ;;  %v2566_v45 = vsel %vm9292_vm14, %v7923_v63, 0  ;;  %2771 = vst.msk [vmem:[#allocation3 + $0x8] sm:$0xff] %vm2769_vm11, %v2724_v54 }
 0x18a   : > { %v1683_v61 = vsel %vm1639_vm5, %v1673_v2, %v8153_v14  ;;  %v1730_v22 = vshrl.u32 %v1632_v46, 16  ;;  %v8175_v8 = vsel %vm1461_vm2, %v7895_v3, %v8151_v62  ;;  %v1733_v47 = vshll.u32 %v1632_v46, 16  ;;  %2731 = vrot.lane.b32.xlu1 %v2630_v39, %s6777_s14 }
 0x18b   : > { %1811 = vst.msk [vmem:[#allocation3 + $0x18] sm:$0xff] %vm9432_vm4, %v1683_v61  ;;  %v1739_v24 = vshrl.u32 %v1633_v4, 16  ;;  %v1742_v26 = vshll.u32 %v1633_v4, 16  ;;  %v4607_v18 = vrot.slane %v4605_v49, 4  ;;  %v5566_v9 = vrot.slane %v5564_v34, 4  ;;  %4035 = vrot.lane.b32.xlu0 %v3927_v11, %s6779_s16 }
 0x18c   : > { %v2686_v33 = vshrl.u32 %v2565_v21, 16  ;;  %v1732_v38 = vrot.slane %v1730_v22, 3  ;;  %v5569_v2 = vrot.slane %v5567_v19, 5  ;;  %v1735_v27 = vrot.slane %v1733_v47, 4  ;;  %v8214_v22 = vpop.permute.xlu1 %3442  ;;  %v3309_v53 = vpop.permute.xlu0 %3308 }
 0x18d   : > { %v1741_v3 = vrot.slane %v1739_v24, 3  ;;  %v1744_v42 = vrot.slane %v1742_v26, 4  ;;  %v2689_v17 = vshll.u32 %v2565_v21, 16  ;;  %v2695_v29 = vshrl.u32 %v2566_v45, 16  ;;  %3357 = vst.msk [vmem:[#allocation3] sm:$0xff] %vm3356_vm7, %v3309_v53 }
 0x18e   : > { %vm9295_vm9 = vcmp.ne.s16.totalorder %v8175_v8, 0  ;;  %v1634_v57 = vsel %vm1617_vm8, %v1248_v12, 0  ;;  %v8184_v5 = vor.u32 %v1735_v27, %v1732_v38  ;;  %v3271_v39 = vsel %vm1639_vm5, %v7886_v37, %v8144_v32  ;;  %vm9433_vm8 = vmmov %vm9432_vm4  ;;  %v6763_v61 = vld [vmem:[%s9226_s3 + $0x10] ss:$0 sps:$4 sm:$0x33]  }
 0x18f   : > { %v1745_v43 = vor.u32 %v1744_v42, %v1741_v3  ;;  %v1748_v30 = vshrl.u32 %v1634_v57, 16  ;;  %v1751_v49 = vshll.u32 %v1634_v57, 16  ;;  %v4600_v11 = vsel %vm1639_vm5, %v7833_v56, %v8146_v51  ;;  %3330 = vrot.lane.b32.xlu1 %v3271_v39, %s6778_s15 }
 0x190   : > { %vm3488_vm1 = vcmask 162944   ;;  %v2698_v34 = vshll.u32 %v2566_v45, 16  ;;  %4666 = vrot.lane.b32.xlu0 %v4600_v11, %s6781_s18  ;;  %v3152_v31 = vsel %vm9295_vm9, %v7923_v63, 0  ;;  %v3990_v37 = vsel %vm1461_vm2, %v7913_v40, %v8148_v23  ;;  %v4028_v27 = vpop.permute.xlu0 %4027  ;;  %v8254_v11 = vld [vmem:[#allocation2 + $0x40] sm:$0xff] }
 0x191   : > { %v1746_v46 = vsel %vm1639_vm5, %v8184_v5, %v1745_v43  ;;  %v1750_v19 = vrot.slane %v1748_v30, 3  ;;  %v1753_v21 = vrot.slane %v1751_v49, 4  ;;  %v5562_v56 = vsel %vm1461_vm2, %v7839_v59, %v8160_v20  ;;  %3489 = vst.msk [vmem:[#allocation3] sm:$0xff] %vm3488_vm1, %v8142_v7  ;;  %v8238_v7 = vpop.permute.xlu1 %3458 }
 0x192   : > { %v8206_v4 = vor.u32 %v4607_v18, %v4604_v16  ;;  %v8208_v45 = vor.u32 %v5569_v2, %v5566_v9  ;;  %1818 = vst.msk [vmem:[#allocation3 + $0x50] sm:$0xff] %vm9433_vm8, %v1746_v46  ;;  %v2688_v47 = vrot.slane %v2686_v33, 4  ;;  %v2691_v24 = vrot.slane %v2689_v17, 5  ;;  %v8226_v9 = vld [vmem:[#allocation2 + $0x38] sm:$0xff]  ;;  %9434 = vst [vmem:[#allocation21_spill] sm:$0xff] %v8238_v7 }
 0x193   : > { %v2697_v40 = vrot.slane %v2695_v29, 4  ;;  %v8216_v26 = vor.u32 %v1753_v21, %v1750_v19  ;;  %v2700_v59 = vrot.slane %v2698_v34, 5  ;;  %v3273_v16 = vshrl.u32 %v3152_v31, 16  ;;  %4049 = vrot.lane.b32.xlu1 %v3990_v37, %s6779_s16  ;;  %v8256_v34 = vld [vmem:[#allocation2 + $0x48] sm:$0xff] }
 0x194   : > { %v3276_v12 = vshll.u32 %v3152_v31, 16  ;;  %v3871_v18 = vsel %vm9293_vm3, %v7923_v63, 0  ;;  %5628 = vrot.lane.b32.xlu0 %v5562_v56, %s6782_s21  ;;  %vm4075_vm0 = vcmask 195744   ;;  %vm9291_vm4 = vcmask 1041408   ;;  %v8252_v39 = vpop.permute.xlu0 %3444 }
 0x195   : > { %v1755_v33 = vsel %vm1639_vm5, %v1745_v43, %v8216_v26  ;;  %v4609_v38 = vsel %vm1639_vm5, %v8146_v51, %v8206_v4  ;;  %v5571_v2 = vsel %vm1461_vm2, %v8160_v20, %v8208_v45  ;;  %6739 = vmatprep.subr.msk.bf16.mxu1 %vm9291_vm4, %v6763_v61  ;;  %v2692_v3 = vor.u32 %v2691_v24, %v2688_v47  ;;  %v8250_v49 = vpop.permute.xlu1 %4991 }
 0x196   : > { %1819 = vst.msk [vmem:[#allocation3 + $0x58] sm:$0xff] %vm9433_vm8, %v1755_v33  ;;  %v3992_v42 = vshrl.u32 %v3871_v18, 16  ;;  %v3995_v17 = vshll.u32 %v3871_v18, 16  ;;  %v5767_v29 = vsel %vm9291_vm4, %v6763_v61, 0  ;;  %v8242_v57 = vor.u32 %v2700_v59, %v2697_v40 }
 0x197   : > { %4076 = vst.msk [vmem:[#allocation3] sm:$0xff] %vm4075_vm0, %v4028_v27  ;;  %v3275_v51 = vrot.slane %v3273_v16, 3  ;;  %v3278_v54 = vrot.slane %v3276_v12, 4  ;;  %6670 = vmatpush3.bf16.msra.mxu1 %v5767_v29  ;;  %v4482_v20 = vsel %vm1610_vm6, %v8226_v9, 0  ;;  %4668 = vrot.lane.b32.xlu1 %v4609_v38, %s6781_s18  ;;  %v3418_v43 = vrot.slane %v8226_v9, 4  ;;  %v1241_v29 = vld [vmem:[#allocation2 + $0x28] sm:$0xff] }
 0x198   : > { %5630 = vrot.lane.b32.xlu0 %v5571_v2, %s6782_s21  ;;  %v4539_v30 = vshrl.u32 %v4482_v20, 16  ;;  %v3994_v31 = vrot.slane %v3992_v42, 4  ;;  %v3997_v46 = vrot.slane %v3995_v17, 5  ;;  %v4542_v19 = vshll.u32 %v4482_v20, 16  ;;  %v8276_v33 = vpop.permute.xlu0 %3460 }
 0x199   : > { %v2702_v21 = vsel %vm1461_vm2, %v2692_v3, %v8242_v57  ;;  %v2693_v37 = vsel %vm1461_vm2, %v7864_v25, %v2692_v3  ;;  %v8262_v56 = vor.u32 %v3278_v54, %v3275_v51  ;;  %v9435_v53 = vrot.slane %v7890_v10, 4  ;;  %v2107_v18 = vpop.permute.xlu1 %2106 }
 0x19a   : > { %v4541_v61 = vrot.slane %v4539_v30, 3  ;;  %v4544_v24 = vrot.slane %v4542_v19, 4  ;;  %v5444_v40 = vsel %vm2540_vm10, %v8226_v9, 0  ;;  %v3420_v25 = vrot.slane %v8254_v11, 4  ;;  %2153 = vst.msk [vmem:[#allocation3 + $0x10] sm:$0xff] %vm9294_vm12, %v2107_v18 }
 0x19b   : > { %2747 = vrot.lane.b32.xlu1 %v2702_v21, %s6777_s14  ;;  %v3419_v47 = vsel %vm622_vm13, %v9435_v53, %v3418_v43  ;;  %v3422_v59 = vrot.slane %v8256_v34, 4  ;;  %v5501_v16 = vshrl.u32 %v5444_v40, 16  ;;  %v5504_v12 = vshll.u32 %v5444_v40, 16 }
 0x19c   : > { %2745 = vrot.lane.b32.xlu0 %v2693_v37, %s6777_s14  ;;  %v8278_v38 = vor.u32 %v3997_v46, %v3994_v31  ;;  %v8280_v2 = vor.u32 %v4544_v24, %v4541_v61  ;;  %v704_v10 = vadd.s32 96, %v9401_v15  ;;  %vm9436_vm8 = vcmp.ne.s16.totalorder %v7970_v13, 0  ;;  %v4990_v19 = vpop.permute.xlu0 %4989 }
 0x19d   : > { %v5445_v58 = vsel %vm9436_vm8, %v8254_v11, 0  ;;  %v3280_v27 = vsel %vm1639_vm5, %v8144_v32, %v8262_v56  ;;  %v5503_v3 = vrot.slane %v5501_v16, 4  ;;  %v5506_v42 = vrot.slane %v5504_v12, 5  ;;  %v2109_v46 = vpop.permute.xlu1 %2108 }
 0x19e   : > { %v5510_v17 = vshrl.u32 %v5445_v58, 16  ;;  %v4929_v51 = vsel %vm7420_vm15, %v8256_v34, 0  ;;  %v8298_v54 = vsel %vm1639_vm5, %v8082_v50, %v8280_v2  ;;  %v812_v20 = vand.u32 15, %v704_v10  ;;  %2154 = vst.msk [vmem:[#allocation3 + $0x18] sm:$0xff] %vm9294_vm12, %v2109_v46 }
 0x19f   : > { %3450 = vrot.lane.b32.xlu1 %v3419_v47, %s6776_s13  ;;  %v5513_v30 = vshll.u32 %v5445_v58, 16  ;;  %v5507_v32 = vor.u32 %v5506_v42, %v5503_v3  ;;  %v1627_v37 = vsel %vm1610_vm6, %v1241_v29, 0  ;;  %v3423_v61 = vsel %vm622_vm13, %v3420_v25, %v3422_v59 }
 0x1a0   : > { %3332 = vrot.lane.b32.xlu0 %v3280_v27, %s6778_s15  ;;  %v5512_v31 = vrot.slane %v5510_v17, 4  ;;  %vm1120_vm10 = vcmp.ge.s32.totalorder %v812_v20, 1  ;;  %v3999_v50 = vsel %vm1461_vm2, %v8148_v23, %v8278_v38  ;;  %v8307_v53 = vrot.slane %v4929_v51, 4  ;;  %v8321_v18 = vpop.permute.xlu0 %5005  ;;  %v8336_v17 = vld [vmem:[#allocation2 + $0x78] sm:$0xff] }
 0x1a1   : > { %v5515_v21 = vrot.slane %v5513_v30, 5  ;;  %v8311_v47 = vsel %vm1461_vm2, %v8072_v44, %v5507_v32  ;;  %vm1361_vm8 = vmpackc.low %vm1120_vm10, %vm1120_vm10  ;;  %v1685_v40 = vshrl.u32 %v1627_v37, 16  ;;  %v1688_v12 = vshll.u32 %v1627_v37, 16  ;;  %v8319_v23 = vpop.permute.xlu1 %5007  ;;  %9438 = vst [vmem:[#allocation24_spill] sm:$0xff] %v8321_v18 }
 0x1a2   : > { %v1393_v28 = vsel %vm1361_vm8, 65537, %v9362_v52  ;;  %9437 = vst [vmem:[#allocation22_spill] sm:$0xff] %v8319_v23  ;;  %v9439_v44 = vrot.slane %v7547_v36, 4  ;;  %vm9440_vm6 = vcmp.ne.s16.totalorder %v7970_v13, 0  ;;  %v4972_v42 = vsel %vm622_vm13, %v8307_v53, %v7646_v41  ;;  %v8343_v13 = vld [vmem:[#allocation2 + $0x80] sm:$0xff] }
 0x1a3   : > { %3454 = vrot.lane.b32.xlu1 %v3423_v61, %s6776_s13  ;;  %v8316_v24 = vor.u32 %v5515_v21, %v5512_v31  ;;  %v6415_v16 = vcombine.low %v1393_v28, %v6908_v1  ;;  %v1687_v27 = vrot.slane %v1685_v40, 3  ;;  %v3864_v3 = vsel %vm9440_vm6, %v8226_v9, 0  ;;  %v3389_v61 = vld [vmem:[#allocation2 + $0x88] sm:$0xf]  ;;  %v9442_v28 = vld [vmem:[#allocation4_spill] sm:$0xff] }
 0x1a4   : > { %4051 = vrot.lane.b32.xlu0 %v3999_v50, %s6779_s16  ;;  %v3425_v10 = vsel %vm622_vm13, %v3422_v59, %v9439_v44  ;;  %v1690_v36 = vrot.slane %v1688_v12, 4  ;;  %vm9298_vm10 = vcmask 228544   ;;  %v3421_v59 = vsel %vm622_vm13, %v3418_v43, %v3420_v25  ;;  %v4647_v21 = vpop.permute.xlu0 %4646  ;;  %v9441_v50 = vld [vmem:[#allocation11_spill] sm:$0xff] }
 0x1a5   : > { %v8328_v58 = vsel %vm1461_vm2, %v5507_v32, %v8316_v24  ;;  %v1516_v29 = vshrl.u32 %v6415_v16, 16  ;;  %v1519_v51 = vshll.u32 %v6415_v16, 16  ;;  %v3929_v20 = vshrl.u32 %v3864_v3, 16  ;;  %v2123_v46 = vpop.permute.xlu1 %2122  ;;  %4695 = vst.msk [vmem:[#allocation3] sm:$0xff] %vm9298_vm10, %v4647_v21 }
 0x1a6   : > { %v3932_v30 = vshll.u32 %v3864_v3, 16  ;;  %vm9297_vm8 = vcmask 261344   ;;  %v8345_v31 = vor.u32 %v1690_v36, %v1687_v27  ;;  %v3434_v37 = vrot.slane %v8336_v17, 4  ;;  %2161 = vst.msk [vmem:[#allocation3 + $0x50] sm:$0xff] %vm9294_vm12, %v2123_v46  ;;  %v1242_v3 = vld [vmem:[#allocation2 + $0x30] sm:$0xff] }
 0x1a7   : > { %5003 = vrot.lane.b32.xlu1 %v4972_v42, %s6780_s17  ;;  %v1518_v41 = vrot.slane %v1516_v29, 4  ;;  %v1521_v32 = vrot.slane %v1519_v51, 5  ;;  %v8351_v40 = vsel %vm1639_vm5, %v9442_v28, %v9441_v50  ;;  %v3931_v43 = vrot.slane %v3929_v20, 4  ;;  %5038 = vst.msk [vmem:[#allocation3] sm:$0xff] %vm9297_vm8, %v4990_v19  ;;  %v9444_v51 = vld [vmem:[#allocation23_spill] sm:$0xff]  ;;  %v9446_v50 = vld [vmem:[#allocation9_spill] sm:$0xff] }
 0x1a8   : > { %3456 = vrot.lane.b32.xlu0 %v3425_v10, %s6776_s13  ;;  %v3934_v25 = vrot.slane %v3932_v30, 5  ;;  %v3436_v16 = vrot.slane %v8343_v13, 4  ;;  %v4927_v12 = vsel %vm7420_vm15, %v8226_v9, 0  ;;  %v1692_v10 = vsel %vm1639_vm5, %v8153_v14, %v8345_v31 }
 0x1a9   : > { %v8359_v44 = vor.u32 %v1521_v32, %v1518_v41  ;;  %vm9296_vm6 = vcmask 294144   ;;  %vm9443_vm4 = vcmask 31744   ;;  %v3438_v29 = vrot.slane %v3389_v61, 4  ;;  %v2125_v14 = vpop.permute.xlu1 %2124 }
 0x1aa   : > { %1812 = vst.msk [vmem:[#allocation3 + $0x20] sm:$0xff] %vm9443_vm4, %v1692_v10  ;;  %v8368_v27 = vor.u32 %v3934_v25, %v3931_v43  ;;  %vm2542_vm14 = vcmp.ne.s16.totalorder %v8351_v40, 0  ;;  %v4965_v20 = vrot.slane %v4927_v12, 4  ;;  %v3437_v41 = vsel %vm622_vm13, %v3434_v37, %v3436_v16  ;;  %v9447_v12 = vld [vmem:[#allocation16_spill] sm:$0xff] }
 0x1ab   : > { %2120 = vrot.lane.b32.xlu1 %v4972_v42, %s6775_s12  ;;  %v8374_v36 = vsel %vm1461_vm2, %v9444_v51, %v8359_v44  ;;  %v5609_v42 = vpop.permute.xlu0 %5608  ;;  %2162 = vst.msk [vmem:[#allocation3 + $0x58] sm:$0xff] %vm9294_vm12, %v2125_v14  ;;  %v4928_v32 = vsel %vm7420_vm15, %v8254_v11, 0  ;;  %v4935_v25 = vsel %vm7420_vm15, %v8336_v17, 0  ;;  %vm9448_vm4 = vcmp.ne.s16.totalorder %v9447_v12, 0 }
 0x1ac   : > { %3452 = vrot.lane.b32.xlu0 %v3421_v59, %s6776_s13  ;;  %vm1611_vm3 = vcmp.ne.s16.totalorder %v8374_v36, 0  ;;  %v8380_v19 = vsel %vm1461_vm2, %v8116_v35, %v8368_v27  ;;  %5657 = vst.msk [vmem:[#allocation3] sm:$0xff] %vm9296_vm6, %v5609_v42  ;;  %v9445_v59 = vrot.slane %v7923_v63, 4  ;;  %v5446_v35 = vsel %vm2542_vm14, %v8256_v34, 0 }
 0x1ad   : > { %v1628_v46 = vsel %vm1611_vm3, %v1242_v3, 0  ;;  %v3439_v63 = vsel %vm622_vm13, %v3436_v16, %v3438_v29  ;;  %v3311_v61 = vpop.permute.xlu1 %3310  ;;  %v4966_v28 = vsel %vm622_vm13, %v9446_v50, %v4965_v20  ;;  %v4967_v43 = vrot.slane %v4928_v32, 4  ;;  %v1249_v3 = vld [vmem:[#allocation2 + $0x68] sm:$0xff] }
 0x1ae   : > { %v3435_v30 = vsel %vm622_vm13, %v9445_v59, %v3434_v37  ;;  %v1694_v21 = vshrl.u32 %v1628_v46, 16  ;;  %v3147_v10 = vsel %vm9448_vm4, %v8256_v34, 0  ;;  %3358 = vst.msk [vmem:[#allocation3 + $0x8] sm:$0xff] %vm3356_vm7, %v3311_v61  ;;  %v5519_v51 = vshrl.u32 %v5446_v35, 16 }
 0x1af   : > { %3466 = vrot.lane.b32.xlu1 %v3435_v30, %s6776_s13  ;;  %v5611_v37 = vpop.permute.xlu0 %5610  ;;  %v5522_v16 = vshll.u32 %v5446_v35, 16  ;;  %v1697_v14 = vshll.u32 %v1628_v46, 16  ;;  %3490 = vst.msk [vmem:[#allocation3 + $0x8] sm:$0xff] %vm3488_vm1, %v8214_v22  ;;  %vm5716_vm12 = vcmask 293888   ;;  %v3228_v42 = vshrl.u32 %v3147_v10, 16 }
 0x1b0   : > { %3468 = vrot.lane.b32.xlu0 %v3437_v41, %s6776_s13  ;;  %v1696_v29 = vrot.slane %v1694_v21, 3  ;;  %v1635_v30 = vsel %vm9295_vm9, %v1249_v3, 0  ;;  %v4968_v35 = vsel %vm622_vm13, %v4965_v20, %v4967_v43  ;;  %v8415_v21 = vrot.slane %v4935_v25, 4  ;;  %v9449_v20 = vld [vmem:[#allocation18_spill] sm:$0xff] }
 0x1b1   : > { %v1699_v59 = vrot.slane %v1697_v14, 4  ;;  %v4030_v41 = vpop.permute.xlu1 %4029  ;;  %v3231_v46 = vshll.u32 %v3147_v10, 16  ;;  %v4970_v22 = vsel %vm622_vm13, %v4967_v43, %v8307_v53  ;;  %v5524_v50 = vrot.slane %v5522_v16, 5 }
 0x1b2   : > { %4077 = vst.msk [vmem:[#allocation3 + $0x8] sm:$0xff] %vm4075_vm0, %v4030_v41  ;;  %vm9450_vm4 = vcmp.ne.s16.totalorder %v9449_v20, 0  ;;  %v1757_v10 = vshrl.u32 %v1635_v30, 16  ;;  %v1760_v14 = vshll.u32 %v1635_v30, 16  ;;  %v3230_v41 = vrot.slane %v3228_v42, 3  ;;  %v9452_v30 = vld [vmem:[#allocation19_spill] sm:$0xff] }
 0x1b3   : > { %3470 = vrot.lane.b32.xlu1 %v3439_v63, %s6776_s13  ;;  %v2726_v32 = vpop.permute.xlu0 %2725  ;;  %v5673_v61 = vld [vmem:[#allocation3] sm:$0xff]  ;;  %v5521_v63 = vrot.slane %v5519_v51, 4  ;;  %v8422_v3 = vor.u32 %v1699_v59, %v1696_v29  ;;  %v3866_v25 = vsel %vm9450_vm4, %v8256_v34, 0  ;;  %v3233_v51 = vrot.slane %v3231_v46, 4 }
 0x1b4   : > { %4997 = vrot.lane.b32.xlu0 %v4966_v28, %s6780_s17  ;;  %2772 = vst.msk [vmem:[#allocation3 + $0x10] sm:$0xff] %vm2769_vm11, %v2726_v32  ;;  %6671 = vmatprep.mubr.msk.bf16.mxu1 %vm5716_vm12, %v5673_v61  ;;  %vm9451_vm9 = vcmask 31744   ;;  %v1759_v16 = vrot.slane %v1757_v10, 3  ;;  %v1762_v29 = vrot.slane %v1760_v14, 4  ;;  %v720_v59 = vadd.s32 224, %v9401_v15 }
 0x1b5   : > { %v1701_v32 = vsel %vm1639_vm5, %v8345_v31, %v8422_v3  ;;  %v4649_v53 = vpop.permute.xlu1 %4648  ;;  %v8439_v42 = vsel %vm622_vm13, %v9452_v30, %v8415_v21  ;;  %v8441_v61 = vor.u32 %v5524_v50, %v5521_v63  ;;  %v3947_v31 = vshrl.u32 %v3866_v25, 16  ;;  %v1840_v14 = vld [vmem:[#allocation2 + $0x80] sm:$0xf] }
 0x1b6   : > { %1813 = vst.msk [vmem:[#allocation3 + $0x28] sm:$0xff] %vm9451_vm9, %v1701_v32  ;;  %v3950_v18 = vshll.u32 %v3866_v25, 16  ;;  %v8450_v46 = vor.u32 %v1762_v29, %v1759_v16  ;;  %v924_v10 = vand.u32 15, %v720_v59  ;;  %v4936_v63 = vsel %vm7420_vm15, %v8343_v13, 0 }
 0x1b7   : > { %4999 = vrot.lane.b32.xlu1 %v4968_v35, %s6780_s17  ;;  %v3313_v43 = vpop.permute.xlu0 %3312  ;;  %4696 = vst.msk [vmem:[#allocation3 + $0x8] sm:$0xff] %vm9298_vm10, %v4649_v53  ;;  %v3949_v53 = vrot.slane %v3947_v31, 4  ;;  %v2051_v16 = vsel %vm7420_vm15, %v1840_v14, 0  ;;  %v8486_v30 = vrot.slane %v4936_v63, 4 }
 0x1b8   : > { %5001 = vrot.lane.b32.xlu0 %v4970_v22, %s6780_s17  ;;  %3359 = vst.msk [vmem:[#allocation3 + $0x10] sm:$0xff] %vm3356_vm7, %v3313_v43  ;;  %v1764_v32 = vsel %vm1639_vm5, %v8216_v26, %v8450_v46  ;;  %vm1136_vm9 = vcmp.ge.s32.totalorder %v924_v10, 1  ;;  %v3952_v43 = vrot.slane %v3950_v18, 5 }
 0x1b9   : > { %5039 = vst.msk [vmem:[#allocation3 + $0x8] sm:$0xff] %vm9297_vm8, %v8250_v49  ;;  %v2728_v50 = vpop.permute.xlu1 %2727  ;;  %v8456_v49 = vor.u32 %v3233_v51, %v3230_v41  ;;  %v9455_v51 = vld [vmem:[#allocation17_spill] sm:$0xff]  ;;  %vm1377_vm8 = vmpackc.low %vm1136_vm9, %vm1136_vm9 }
 0x1ba   : > { %3491 = vst.msk [vmem:[#allocation3 + $0x10] sm:$0xff] %vm3488_vm1, %v8252_v39  ;;  %v9453_v39 = vld [vmem:[#allocation10_spill] sm:$0xff]  ;;  %vm9456_vm4 = vcmp.ne.s16.totalorder %v9455_v51, 0  ;;  %v1409_v26 = vsel %vm1377_vm8, 65537, %v9362_v52 }
 0x1bb   : > { %2114 = vrot.lane.b32.xlu1 %v4966_v28, %s6775_s12  ;;  %5658 = vst.msk [vmem:[#allocation3 + $0x8] sm:$0xff] %vm9296_vm6, %v5611_v37  ;;  %v4032_v25 = vpop.permute.xlu0 %4031  ;;  %v8461_v28 = vsel %vm1461_vm2, %v8359_v44, %v9453_v39  ;;  %v9454_v37 = vld [vmem:[#allocation30_spill] sm:$0xff]  ;;  %v2561_v44 = vsel %vm9456_vm4, %v8256_v34, 0  ;;  %vm9457_vm6 = vcmask 31744   ;;  %v6423_v18 = vcombine.low %v1409_v26, %v6908_v1 }
 0x1bc   : > { %5013 = vrot.lane.b32.xlu0 %v8439_v42, %s6780_s17  ;;  %2773 = vst.msk [vmem:[#allocation3 + $0x18] sm:$0xff] %vm2769_vm11, %v2728_v50  ;;  %v5535_v41 = vsel %vm1461_vm2, %v8441_v61, %v9454_v37  ;;  %vm1612_vm10 = vcmp.ne.s16.totalorder %v8461_v28, 0  ;;  %v2650_v31 = vshrl.u32 %v2561_v44, 16  ;;  %v2653_v10 = vshll.u32 %v2561_v44, 16  ;;  %v9460_v50 = vld [vmem:[#allocation27_spill] sm:$0xff] }
 0x1bd   : > { %4078 = vst.msk [vmem:[#allocation3 + $0x10] sm:$0xff] %vm4075_vm0, %v4032_v25  ;;  %v8482_v29 = vpop.permute.xlu1 %3326  ;;  %v3244_v6 = vsel %vm1639_vm5, %v8456_v49, %v9460_v50  ;;  %v8494_v25 = vor.u32 %v3952_v43, %v3949_v53  ;;  %v1588_v14 = vshrl.u32 %v6423_v18, 16  ;;  %v1591_v39 = vshll.u32 %v6423_v18, 16 }
 0x1be   : > { %1820 = vst.msk [vmem:[#allocation3 + $0x60] sm:$0xff] %vm9457_vm6, %v1764_v32  ;;  %9458 = vst [vmem:[#allocation20_spill] sm:$0xff] %v8482_v29  ;;  %v2100_v32 = vrot.slane %v2051_v16, 4  ;;  %v4484_v37 = vsel %vm1612_vm10, %v8256_v34, 0  ;;  %v2652_v16 = vrot.slane %v2650_v31, 4  ;;  %v2655_v50 = vrot.slane %v2653_v10, 5 }
 0x1bf   : > { %2116 = vrot.lane.b32.xlu1 %v4968_v35, %s6775_s12  ;;  %v8484_v59 = vpop.permute.xlu0 %4662  ;;  %v2559_v35 = vsel %vm2542_vm14, %v8226_v9, 0  ;;  %v1590_v26 = vrot.slane %v1588_v14, 4  ;;  %v1593_v53 = vrot.slane %v1591_v39, 5  ;;  %v9463_v34 = vld [vmem:[#allocation29_spill] sm:$0xff]  ;;  %v9464_v39 = vld [vmem:[#allocation6_spill] sm:$0xff]  ;;  %v3145_v10 = vsel %vm1611_vm3, %v8226_v9, 0 }
 0x1c0   : > { %5622 = vrot.lane.b32.xlu0 %v5535_v41, %s6782_s21  ;;  %9459 = vst [vmem:[#allocation15_spill] sm:$0xff] %v8484_v59  ;;  %v4727_v41 = vld [vmem:[#allocation2 + $0x90] sm:$0xf]  ;;  %v2632_v51 = vshrl.u32 %v2559_v35, 16  ;;  %v2635_v44 = vshll.u32 %v2559_v35, 16  ;;  %v4557_v59 = vshrl.u32 %v4484_v37, 16  ;;  %v2101_v31 = vsel %vm622_vm13, %v8415_v21, %v2100_v32 }
 0x1c1   : > { %v8502_v43 = vpop.permute.xlu1 %4045  ;;  %v4560_v35 = vshll.u32 %v4484_v37, 16  ;;  %v8513_v14 = vor.u32 %v1593_v53, %v1590_v26  ;;  %vm9465_vm15 = vcmp.ne.s16.totalorder %v9464_v39, 0  ;;  %v722_v37 = vadd.s32 240, %v9401_v15 }
 0x1c2   : > { %v5674_v63 = vld [vmem:[#allocation3 + $0x8] sm:$0xff]  ;;  %9461 = vst [vmem:[#allocation13_spill] sm:$0xff] %v8502_v43  ;;  %v8517_v23 = vsel %vm9465_vm15, %v4727_v41, 0  ;;  %v2634_v26 = vrot.slane %v2632_v51, 4  ;;  %v2637_v53 = vrot.slane %v2635_v44, 5  ;;  %v3146_v9 = vsel %vm1612_vm10, %v8254_v11, 0 }
 0x1c3   : > { %2118 = vrot.lane.b32.xlu1 %v4970_v22, %s6775_s12  ;;  %6672 = vmatmul.mubr.msk.bf16.vlgmr.msra.gmra.mrb[16].mxu1 %vm5716_vm12, %v5674_v63  ;;  %v8504_v18 = vpop.permute.xlu0 %5624  ;;  %v4984_v22 = vsel %vm622_vm13, %v8415_v21, %v8486_v30  ;;  %v3963_v63 = vsel %vm1461_vm2, %v8494_v25, %v9463_v34  ;;  %v1250_v34 = vld [vmem:[#allocation2 + $0x70] sm:$0xff]  ;;  %v8530_v41 = vsel %vm1461_vm2, %v8151_v62, %v8513_v14  ;;  %v4559_v32 = vrot.slane %v4557_v59, 3 }
 0x1c4   : > { %3324 = vrot.lane.b32.xlu0 %v3244_v6, %s6778_s15  ;;  %9462 = vst [vmem:[#allocation12_spill] sm:$0xff] %v8504_v18  ;;  %v723_v6 = vadd.s32 248, %v9401_v15  ;;  %v8536_v21 = vor.u32 %v2655_v50, %v2652_v16  ;;  %v3865_v15 = vsel %vm2542_vm14, %v8254_v11, 0  ;;  %vm1619_vm8 = vcmp.ne.s16.totalorder %v8530_v41, 0 }
 0x1c5   : > { %v8532_v39 = vpop.permute.xlu1 %4664  ;;  %v4562_v62 = vrot.slane %v4560_v35, 4  ;;  %v3210_v51 = vshrl.u32 %v3145_v10, 16  ;;  %v1636_v44 = vsel %vm1619_vm8, %v1250_v34, 0  ;;  %v3213_v16 = vshll.u32 %v3145_v10, 16 }
 0x1c6   : > { %9466 = vst [vmem:[#allocation25_spill] sm:$0xff] %v8532_v39  ;;  %v1766_v50 = vshrl.u32 %v1636_v44, 16  ;;  %v938_v18 = vand.u32 15, %v722_v37  ;;  %v8551_v40 = vor.u32 %v2637_v53, %v2634_v26  ;;  %v9468_v39 = vld [vmem:[#allocation5_spill] sm:$0xff]  ;;  %v3219_v26 = vshrl.u32 %v3146_v9, 16 }
 0x1c7   : > { %5015 = vrot.lane.b32.xlu1 %v4984_v22, %s6780_s17  ;;  %v945_v22 = vand.u32 15, %v723_v6  ;;  %v1769_v6 = vshll.u32 %v1636_v44, 16  ;;  %v6521_v59 = vcombine.low %v6908_v1, %v9468_v39  ;;  %v8564_v37 = vor.u32 %v4562_v62, %v4559_v32  ;;  %v8577_v62 = vld [vmem:[#allocation2 + $0x88] sm:$0xff] }
 0x1c8   : > { %4043 = vrot.lane.b32.xlu0 %v3963_v63, %s6779_s16  ;;  %v8534_v63 = vpop.permute.xlu0 %5626  ;;  %v1768_v10 = vrot.slane %v1766_v50, 3  ;;  %v3222_v53 = vshll.u32 %v3146_v9, 16  ;;  %vm9471_vm6 = vcmp.ne.s16.totalorder %v9449_v20, 0  ;;  %v3212_v36 = vrot.slane %v3210_v51, 3 }
 0x1c9   : > { %9467 = vst [vmem:[#allocation11_spill] sm:$0xff] %v8534_v63  ;;  %v3938_v63 = vshrl.u32 %v3865_v15, 16  ;;  %vm8555_vm14 = vcmp.le.s32.totalorder %v945_v22, 14  ;;  %v2744_v34 = vpop.permute.xlu1 %2743  ;;  %v1771_v44 = vrot.slane %v1769_v6, 4  ;;  %v2560_v22 = vsel %vm9471_vm6, %v8254_v11, 0 }
 0x1ca   : > { %2781 = vst.msk [vmem:[#allocation3 + $0x58] sm:$0xff] %vm2769_vm11, %v2744_v34  ;;  %v3215_v39 = vrot.slane %v3213_v16, 4  ;;  %vm1138_vm9 = vcmp.ge.s32.totalorder %v938_v18, 1  ;;  %vm8579_vm4 = vcmp.ne.s16.totalorder %v6521_v59, 0  ;;  %v2641_v51 = vshrl.u32 %v2560_v22, 16 }
 0x1cb   : > { %2130 = vrot.lane.b32.xlu1 %v8439_v42, %s6775_s12  ;;  %v3941_v42 = vshll.u32 %v3865_v15, 16  ;;  %v8572_v15 = vor.u32 %v1771_v44, %v1768_v10  ;;  %vm1379_vm15 = vmpackc.low %vm1138_vm9, %vm1138_vm9  ;;  %v3221_v6 = vrot.slane %v3219_v26, 3  ;;  %v3224_v59 = vrot.slane %v3222_v53, 4 }
 0x1cc   : > { %4654 = vrot.lane.b32.xlu0 %v8298_v54, %s6781_s18  ;;  %v2742_v43 = vpop.permute.xlu0 %2741  ;;  %v4483_v54 = vsel %vm1611_vm3, %v8254_v11, 0  ;;  %vm2311_vm3 = vmpackc.low %vm8555_vm14, %vm8555_vm14  ;;  %v1411_v18 = vsel %vm1379_vm15, 65537, %v9362_v52  ;;  %vm9475_vm6 = vcmask 31744   ;;  %vm9480_vm9 = vcmp.ne.s16.totalorder %v7974_v0, 0 }
 0x1cd   : > { %2780 = vst.msk [vmem:[#allocation3 + $0x50] sm:$0xff] %vm2769_vm11, %v2742_v43  ;;  %v3940_v43 = vrot.slane %v3938_v63, 4  ;;  %v4548_v9 = vshrl.u32 %v4483_v54, 16  ;;  %v4551_v32 = vshll.u32 %v4483_v54, 16  ;;  %v1773_v16 = vsel %vm1639_vm5, %v8450_v46, %v8572_v15  ;;  %v9474_v63 = vld [vmem:[#allocation28_spill] sm:$0xff] }
 0x1ce   : > { %v4573_v50 = vsel %vm1639_vm5, %v8564_v37, %v9474_v63  ;;  %1821 = vst.msk [vmem:[#allocation3 + $0x68] sm:$0xff] %vm9475_vm6, %v1773_v16  ;;  %v6424_v34 = vcombine.low %v1411_v18, %v6908_v1  ;;  %v3216_v46 = vor.u32 %v3215_v39, %v3212_v36  ;;  %v2644_v54 = vshll.u32 %v2560_v22, 16  ;;  %v9476_v36 = vld [vmem:[#allocation31_spill] sm:$0xff] }
 0x1cf   : > { %2132 = vrot.lane.b32.xlu1 %v2101_v31, %s6775_s12  ;;  %v3943_v31 = vrot.slane %v3941_v42, 5  ;;  %v4937_v42 = vsel %vm8579_vm4, %v8577_v62, 0  ;;  %v2343_v10 = vsel %vm2311_vm3, 65537, %v9362_v52  ;;  %v4550_v44 = vrot.slane %v4548_v9, 3  ;;  %v4108_v22 = vld [vmem:[#allocation2 + $0x90] sm:$0xf] }
 0x1d0   : > { %5616 = vrot.lane.b32.xlu0 %v8311_v47, %s6782_s21  ;;  %v8583_v47 = vpop.permute.xlu1 %3446  ;;  %v3329_v20 = vpop.permute.xlu0 %3328  ;;  %v4553_v26 = vrot.slane %v4551_v32, 4  ;;  %v2666_v39 = vsel %vm1461_vm2, %v8536_v21, %v9476_v36  ;;  %v1600_v16 = vshll.u32 %v6424_v34, 16  ;;  %v2639_v52 = vsel %vm1461_vm2, %v8111_v55, %v8551_v40 }
 0x1d1   : > { %3367 = vst.msk [vmem:[#allocation3 + $0x50] sm:$0xff] %vm3356_vm7, %v3329_v20  ;;  %v3944_v11 = vor.u32 %v3943_v31, %v3940_v43  ;;  %v1597_v20 = vshrl.u32 %v6424_v34, 16  ;;  %v3225_v35 = vor.u32 %v3224_v59, %v3221_v6  ;;  %v8619_v9 = vrot.slane %v4937_v42, 4  ;;  %v9477_v6 = vld [vmem:[#allocation8_spill] sm:$0xff] }
 0x1d2   : > { %3499 = vst.msk [vmem:[#allocation3 + $0x50] sm:$0xff] %vm3488_vm1, %v8276_v33  ;;  %v6457_v32 = vcombine.low %v6908_v1, %v2343_v10  ;;  %v3217_v43 = vsel %vm1639_vm5, %v8106_v60, %v3216_v46  ;;  %v2643_v18 = vrot.slane %v2641_v51, 4  ;;  %v2646_v63 = vrot.slane %v2644_v54, 5 }
 0x1d3   : > { %4660 = vrot.lane.b32.xlu1 %v4573_v50, %s6781_s18  ;;  %v3945_v31 = vsel %vm1461_vm2, %v8368_v27, %v3944_v11  ;;  %v3226_v50 = vsel %vm1639_vm5, %v3216_v46, %v3225_v35  ;;  %v4554_v55 = vor.u32 %v4553_v26, %v4550_v44  ;;  %v4459_v59 = vsel %vm1461_vm2, %v8513_v14, %v9477_v6 }
 0x1d4   : > { %5618 = vrot.lane.b32.xlu0 %v8328_v58, %s6782_s21  ;;  %v8610_v53 = vpop.permute.xlu1 %3462  ;;  %v4048_v58 = vpop.permute.xlu0 %4047  ;;  %vm9478_vm14 = vcmp.ne.s16.totalorder %v9477_v6, 0  ;;  %vm9479_vm3 = vcmp.ne.s16.totalorder %v8175_v8, 0  ;;  %v5452_v27 = vsel %vm9480_vm9, %v8336_v17, 0  ;;  %v1599_v51 = vrot.slane %v1597_v20, 4 }
 0x1d5   : > { %4086 = vst.msk [vmem:[#allocation3 + $0x50] sm:$0xff] %vm4075_vm0, %v4048_v58  ;;  %v4493_v1 = vsel %vm9478_vm14, %v4108_v22, 0  ;;  %v4490_v60 = vsel %vm9479_vm3, %v8336_v17, 0  ;;  %v1602_v46 = vrot.slane %v1600_v16, 5  ;;  %v4986_v54 = vsel %vm622_vm13, %v8486_v30, %v8619_v9 }
 0x1d6   : > { %v8649_v10 = vsel %vm1639_vm5, %v3225_v35, %v8456_v49  ;;  %v2527_v44 = vshrl.u32 %v6457_v32, 16  ;;  %v2530_v26 = vshll.u32 %v6457_v32, 16  ;;  %v2647_v8 = vor.u32 %v2646_v63, %v2643_v18  ;;  %v1245_v63 = vld [vmem:[#allocation2 + $0x48] sm:$0xff] }
 0x1d7   : > { %2739 = vrot.lane.b32.xlu1 %v2666_v39, %s6777_s14  ;;  %v8656_v0 = vsel %vm1461_vm2, %v8316_v24, %v8441_v61  ;;  %vm4475_vm4 = vcmp.ne.s16.totalorder %v4459_v59, 0  ;;  %v4638_v58 = vshrl.u32 %v4493_v1, 16  ;;  %v4641_v36 = vshll.u32 %v4493_v1, 16 }
 0x1d8   : > { %2733 = vrot.lane.b32.xlu0 %v2639_v52, %s6777_s14  ;;  %v8634_v34 = vpop.permute.xlu1 %4995  ;;  %v4611_v30 = vshrl.u32 %v4490_v60, 16  ;;  %v4614_v39 = vshll.u32 %v4490_v60, 16  ;;  %v5573_v22 = vshrl.u32 %v5452_v27, 16  ;;  %v4555_v16 = vsel %vm1639_vm5, %v8280_v2, %v4554_v55  ;;  %v9483_v60 = vld [vmem:[#allocation14_spill] sm:$0xff] }
 0x1d9   : > { %v8636_v42 = vpop.permute.xlu0 %3448  ;;  %v4564_v52 = vsel %vm1639_vm5, %v4554_v55, %v8564_v37  ;;  %v8666_v35 = vsel %vm1461_vm2, %v3944_v11, %v8494_v25  ;;  %v8668_v24 = vor.u32 %v1602_v46, %v1599_v51  ;;  %vm9481_vm15 = vcmask 64544  }
 0x1da   : > { %v8672_v61 = vsel %vm4475_vm4, %v8577_v62, 0  ;;  %v5576_v32 = vshll.u32 %v5452_v27, 16  ;;  %v2532_v18 = vrot.slane %v2530_v26, 4  ;;  %v2648_v2 = vsel %vm1461_vm2, %v8551_v40, %v2647_v8  ;;  %vm9485_vm3 = vmmov %vm9481_vm15 }
 0x1db   : > { %3318 = vrot.lane.b32.xlu1 %v3217_v43, %s6778_s15  ;;  %v2529_v43 = vrot.slane %v2527_v44, 3  ;;  %v8681_v25 = vsel %vm1461_vm2, %v2647_v8, %v8536_v21  ;;  %v8683_v37 = vrot.slane %v4638_v58, 3  ;;  %vm9482_vm6 = vcmp.ne.s16.totalorder %v7978_v48, 0  ;;  %v1244_v58 = vld [vmem:[#allocation2 + $0x40] sm:$0xff] }
 0x1dc   : > { %3320 = vrot.lane.b32.xlu0 %v3226_v50, %s6778_s15  ;;  %v2111_v49 = vpop.permute.xlu1 %2110  ;;  %v1243_v50 = vld [vmem:[#allocation2 + $0x38] sm:$0xff]  ;;  %v8688_v11 = vsel %vm9482_vm6, %v8343_v13, 0  ;;  %v8690_v55 = vrot.slane %v4641_v36, 4  ;;  %v8692_v6 = vrot.slane %v4611_v30, 3  ;;  %v4629_v1 = vshrl.u32 %v8672_v61, 16 }
 0x1dd   : > { %v8658_v20 = vpop.permute.xlu0 %3464  ;;  %2155 = vst.msk [vmem:[#allocation3 + $0x20] sm:$0xff] %vm9481_vm15, %v2111_v49  ;;  %v8700_v21 = vsel %vm1461_vm2, %v8513_v14, %v8668_v24  ;;  %vm9484_vm14 = vcmp.ne.s16.totalorder %v9483_v60, 0  ;;  %v1629_v51 = vsel %vm1612_vm10, %v1243_v50, 0  ;;  %v8707_v46 = vrot.slane %v5576_v32, 5  ;;  %v1252_v32 = vld [vmem:[#allocation2 + $0x80] sm:$0xf]  ;;  %vm9488_vm15 = vmmov %vm9485_vm3 }
 0x1de   : > { %v1631_v27 = vsel %vm9484_vm14, %v1245_v63, 0  ;;  %v8711_v8 = vor.u32 %v2532_v18, %v2529_v43  ;;  %v4632_v14 = vshll.u32 %v8672_v61, 16  ;;  %v8719_v28 = vsel %vm1619_vm8, %v8336_v17, 0  ;;  %v9487_v50 = vld [vmem:[#allocation26_spill] sm:$0xff] }
 0x1df   : > { %4037 = vrot.lane.b32.xlu1 %v8380_v19, %s6779_s16  ;;  %v4616_v19 = vrot.slane %v4614_v39, 4  ;;  %v1721_v36 = vshrl.u32 %v1631_v27, 16  ;;  %v1724_v30 = vshll.u32 %v1631_v27, 16  ;;  %v1251_v39 = vld [vmem:[#allocation2 + $0x78] sm:$0xff]  ;;  %vm1620_vm10 = vcmp.ne.s16.totalorder %v8700_v21, 0 }
 0x1e0   : > { %4039 = vrot.lane.b32.xlu0 %v3945_v31, %s6779_s16  ;;  %v8694_v31 = vrot.slane %v5573_v22, 4  ;;  %v2113_v59 = vpop.permute.xlu1 %2112  ;;  %vm1621_vm9 = vcmp.ne.s16.totalorder %v8668_v24, 0  ;;  %v1703_v22 = vshrl.u32 %v1629_v51, 16  ;;  %v1706_v49 = vshll.u32 %v1629_v51, 16 }
 0x1e1   : > { %v4994_v40 = vpop.permute.xlu0 %4993  ;;  %2156 = vst.msk [vmem:[#allocation3 + $0x28] sm:$0xff] %vm9485_vm3, %v2113_v59  ;;  %v4631_v61 = vrot.slane %v4629_v1, 3  ;;  %v1723_v43 = vrot.slane %v1721_v36, 3  ;;  %v1726_v18 = vrot.slane %v1724_v30, 4  ;;  %vm9486_vm4 = vcmp.ne.s16.totalorder %v9447_v12, 0 }
 0x1e2   : > { %v1630_v63 = vsel %vm9486_vm4, %v1244_v58, 0  ;;  %v8732_v59 = vsel %vm1639_vm5, %v9487_v50, %v8711_v8  ;;  %v1705_v60 = vrot.slane %v1703_v22, 3  ;;  %v1708_v27 = vrot.slane %v1706_v49, 4 }
 0x1e3   : > { %4656 = vrot.lane.b32.xlu1 %v4555_v16, %s6781_s18  ;;  %v1712_v33 = vshrl.u32 %v1630_v63, 16  ;;  %v1727_v51 = vor.u32 %v1726_v18, %v1723_v43  ;;  %v1715_v26 = vshll.u32 %v1630_v63, 16  ;;  %v1637_v1 = vsel %vm1620_vm10, %v1251_v39, 0 }
 0x1e4   : > { %5017 = vrot.lane.b32.xlu0 %v4986_v54, %s6780_s17  ;;  %v8723_v16 = vpop.permute.xlu1 %5011  ;;  %v1638_v12 = vsel %vm1621_vm9, %v1252_v32, 0  ;;  %v1709_v58 = vor.u32 %v1708_v27, %v1705_v60  ;;  %v1775_v30 = vshrl.u32 %v1637_v1, 16  ;;  %v1778_v44 = vshll.u32 %v1637_v1, 16 }
 0x1e5   : > { %v8725_v54 = vpop.permute.xlu0 %5009  ;;  %v1714_v36 = vrot.slane %v1712_v33, 3  ;;  %v1737_v49 = vsel %vm1639_vm5, %v1727_v51, %v8184_v5  ;;  %v1784_v29 = vshrl.u32 %v1638_v12, 16  ;;  %vm9489_vm6 = vcmask 228544  }
 0x1e6   : > { %v4634_v39 = vrot.slane %v4632_v14, 4  ;;  %vm9490_vm14 = vcmask 31744   ;;  %v1710_v33 = vsel %vm1639_vm5, %v8422_v3, %v1709_v58  ;;  %v1777_v32 = vrot.slane %v1775_v30, 3 }
 0x1e7   : > { %2735 = vrot.lane.b32.xlu1 %v2648_v2, %s6777_s14  ;;  %v1717_v2 = vrot.slane %v1715_v26, 4  ;;  %1817 = vst.msk [vmem:[#allocation3 + $0x48] sm:$0xff] %vm9490_vm14, %v1737_v49  ;;  %v1780_v43 = vrot.slane %v1778_v44, 4  ;;  %vm9491_vm3 = vcmask 261344   ;;  %v8753_v5 = vor.u32 %v4616_v19, %v8692_v6  ;;  %vm9492_vm4 = vmmov %vm9490_vm14 }
 0x1e8   : > { %4658 = vrot.lane.b32.xlu0 %v4564_v52, %s6781_s18  ;;  %v2127_v7 = vpop.permute.xlu1 %2126  ;;  %v1787_v52 = vshll.u32 %v1638_v12, 16  ;;  %1814 = vst.msk [vmem:[#allocation3 + $0x30] sm:$0xff] %vm9492_vm4, %v1710_v33  ;;  %v1786_v26 = vrot.slane %v1784_v29, 3  ;;  %v3282_v3 = vshrl.u32 %v8719_v28, 16  ;;  %vm9494_vm14 = vcmask 64544  }
 0x1e9   : > { %v4651_v22 = vpop.permute.xlu0 %4650  ;;  %2163 = vst.msk [vmem:[#allocation3 + $0x60] sm:$0xff] %vm9488_vm15, %v2127_v7  ;;  %v1718_v7 = vor.u32 %v1717_v2, %v1714_v36  ;;  %vm9493_vm15 = vcmp.ne.s16.totalorder %v7978_v48, 0  ;;  %v8766_v29 = vor.u32 %v4634_v39, %v4631_v61  ;;  %v4644_v48 = vor.u32 %v8690_v55, %v8683_v37 }
 0x1ea   : > { %4697 = vst.msk [vmem:[#allocation3 + $0x10] sm:$0xff] %vm9489_vm6, %v4651_v22  ;;  %v1789_v14 = vrot.slane %v1787_v52, 4  ;;  %vm2550_vm6 = vcmp.ne.s16.totalorder %v8732_v59, 0  ;;  %v5579_v60 = vor.u32 %v8707_v46, %v8694_v31  ;;  %v9497_v61 = vshrl.u32 %v8688_v11, 16  ;;  %v2183_v22 = vld [vmem:[#allocation2 + $0x80] sm:$0x1f] }
 0x1eb   : > { %5040 = vst.msk [vmem:[#allocation3 + $0x10] sm:$0xff] %vm9491_vm3, %v4994_v40  ;;  %3322 = vrot.lane.b32.xlu1 %v8649_v10, %s6778_s15  ;;  %v3872_v40 = vsel %vm9493_vm15, %v8336_v17, 0  ;;  %v1781_v10 = vor.u32 %v1780_v43, %v1777_v32  ;;  %v1719_v6 = vsel %vm1639_vm5, %v1709_v58, %v1718_v7  ;;  %v1728_v19 = vsel %vm1639_vm5, %v1718_v7, %v1727_v51  ;;  %vm9496_vm15 = vmmov %vm9492_vm4 }
 0x1ec   : > { %5620 = vrot.lane.b32.xlu0 %v8656_v0, %s6782_s21  ;;  %v2129_v44 = vpop.permute.xlu1 %2128  ;;  %v3285_v0 = vshll.u32 %v8719_v28, 16  ;;  %v1790_v63 = vor.u32 %v1789_v14, %v1786_v26  ;;  %vm9495_vm3 = vcmask 294144   ;;  %1815 = vst.msk [vmem:[#allocation3 + $0x38] sm:$0xff] %vm9492_vm4, %v1719_v6  ;;  %v5584_v27 = vrot.slane %v9497_v61, 4  ;;  %v9502_v14 = vld [vmem:[#allocation7_spill] sm:$0xff] }
 0x1ed   : > { %v5613_v18 = vpop.permute.xlu0 %5612  ;;  %2164 = vst.msk [vmem:[#allocation3 + $0x68] sm:$0xff] %vm9494_vm14, %v2129_v44  ;;  %v1782_v28 = vsel %vm1639_vm5, %v8572_v15, %v1781_v10  ;;  %v9498_v37 = vshll.u32 %v8688_v11, 16  ;;  %v2567_v31 = vsel %vm2550_vm6, %v8336_v17, 0  ;;  %vm9499_vm14 = vmmov %vm9492_vm4  ;;  %v4001_v46 = vshrl.u32 %v3872_v40, 16 }
 0x1ee   : > { %5659 = vst.msk [vmem:[#allocation3 + $0x10] sm:$0xff] %vm9495_vm3, %v5613_v18  ;;  %v1791_v15 = vsel %vm1639_vm5, %v1781_v10, %v1790_v63  ;;  %v4004_v51 = vshll.u32 %v3872_v40, 16  ;;  %vm9500_vm3 = vmmov %vm9492_vm4  ;;  %v4618_v1 = vsel %vm1639_vm5, %v8206_v4, %v8753_v5  ;;  %v3284_v11 = vrot.slane %v3282_v3, 3 }
 0x1ef   : > { %1816 = vst.msk [vmem:[#allocation3 + $0x40] sm:$0xff] %vm9496_vm15, %v1728_v19  ;;  %4041 = vrot.lane.b32.xlu1 %v8666_v35, %s6779_s16  ;;  %v5587_v55 = vrot.slane %v9498_v37, 5  ;;  %v3287_v12 = vrot.slane %v3285_v0, 4  ;;  %v4491_v17 = vsel %vm1619_vm8, %v8343_v13, 0  ;;  %v4645_v58 = vsel %vm1639_vm5, %v8766_v29, %v4644_v48  ;;  %v2802_v0 = vld [vmem:[#allocation2 + $0x88] sm:$0xf] }
 0x1f0   : > { %2737 = vrot.lane.b32.xlu0 %v8681_v25, %s6777_s14  ;;  %1822 = vst.msk [vmem:[#allocation3 + $0x70] sm:$0xff] %vm9499_vm14, %v1782_v28  ;;  %v3315_v35 = vpop.permute.xlu1 %3314  ;;  %v2704_v36 = vshrl.u32 %v2567_v31, 16  ;;  %v2707_v30 = vshll.u32 %v2567_v31, 16  ;;  %vm2551_vm4 = vcmp.ne.s16.totalorder %v8711_v8, 0  ;;  %v9501_v4 = vrot.slane %v8517_v23, 4 }
 0x1f1   : > { %1823 = vst.msk [vmem:[#allocation3 + $0x78] sm:$0xff] %vm9500_vm3, %v1791_v15  ;;  %v5615_v25 = vpop.permute.xlu0 %5614  ;;  %v5580_v49 = vsel %vm1461_vm2, %v8208_v45, %v5579_v60  ;;  %v8810_v2 = vor.u32 %v5587_v55, %v5584_v27  ;;  %v3154_v52 = vsel %vm1620_vm10, %v8343_v13, 0  ;;  %v4003_v39 = vrot.slane %v4001_v46, 4  ;;  %v3521_v27 = vld [vmem:[#allocation2 + $0x88] sm:$0x1f] }
 0x1f2   : > { %3360 = vst.msk [vmem:[#allocation3 + $0x18] sm:$0xff] %vm3356_vm7, %v3315_v35  ;;  %v4988_v41 = vsel %vm622_vm13, %v8619_v9, %v9501_v4  ;;  %v4620_v33 = vshrl.u32 %v4491_v17, 16  ;;  %v4623_v32 = vshll.u32 %v4491_v17, 16  ;;  %v8815_v23 = vor.u32 %v3287_v12, %v3284_v11 }
 0x1f3   : > { %3492 = vst.msk [vmem:[#allocation3 + $0x18] sm:$0xff] %vm3488_vm1, %v8583_v47  ;;  %4676 = vrot.lane.b32.xlu1 %v4645_v58, %s6781_s18  ;;  %v4006_v47 = vrot.slane %v4004_v51, 5  ;;  %v2568_v9 = vsel %vm2551_vm4, %v2183_v22, 0  ;;  %v3873_v45 = vsel %vm2550_vm6, %v8343_v13, 0  ;;  %v5421_v21 = vsel %vm1639_vm5, %v9487_v50, %v9502_v14  ;;  %v5070_v51 = vld [vmem:[#allocation2 + $0x90] sm:$0x1f] }
 0x1f4   : > { %4670 = vrot.lane.b32.xlu0 %v4618_v1, %s6781_s18  ;;  %v4034_v43 = vpop.permute.xlu1 %4033  ;;  %v2706_v3 = vrot.slane %v2704_v36, 4  ;;  %v2709_v40 = vrot.slane %v2707_v30, 5  ;;  %v3291_v10 = vshrl.u32 %v3154_v52, 16  ;;  %v3294_v44 = vshll.u32 %v3154_v52, 16 }
 0x1f5   : > { %v2730_v7 = vpop.permute.xlu0 %2729  ;;  %v5675_v26 = vld [vmem:[#allocation3 + $0x10] sm:$0xff]  ;;  %4079 = vst.msk [vmem:[#allocation3 + $0x18] sm:$0xff] %vm4075_vm0, %v4034_v43  ;;  %v5589_v13 = vsel %vm1461_vm2, %v5579_v60, %v8810_v2  ;;  %v8832_v59 = vor.u32 %v4006_v47, %v4003_v39  ;;  %v4622_v50 = vrot.slane %v4620_v33, 3  ;;  %v4625_v18 = vrot.slane %v4623_v32, 4 }
 0x1f6   : > { %2774 = vst.msk [vmem:[#allocation3 + $0x20] sm:$0xff] %vm2769_vm11, %v2730_v7  ;;  %6675 = vmatprep.mubr.msk.bf16.mxu1 %vm5716_vm12, %v5675_v26  ;;  %vm5437_vm13 = vcmp.ne.s16.totalorder %v5421_v21, 0  ;;  %v2713_v63 = vshrl.u32 %v2568_v9, 16  ;;  %v2716_v48 = vshll.u32 %v2568_v9, 16  ;;  %v4010_v28 = vshrl.u32 %v3873_v45, 16 }
 0x1f7   : > { %5019 = vrot.lane.b32.xlu1 %v4988_v41, %s6780_s17  ;;  %v4013_v61 = vshll.u32 %v3873_v45, 16  ;;  %vm9503_vm8 = vcmask 228544   ;;  %v3289_v60 = vsel %vm1639_vm5, %v8262_v56, %v8815_v23  ;;  %v2710_v37 = vor.u32 %v2709_v40, %v2706_v3 }
 0x1f8   : > { %5632 = vrot.lane.b32.xlu0 %v5580_v49, %s6782_s21  ;;  %v4653_v6 = vpop.permute.xlu1 %4652  ;;  %v3293_v55 = vrot.slane %v3291_v10, 3  ;;  %v3296_v31 = vrot.slane %v3294_v44, 4  ;;  %vm9504_vm10 = vcmask 261344   ;;  %v3155_v15 = vsel %vm1621_vm9, %v2802_v0, 0  ;;  %vm9507_vm15 = vmmov %vm9503_vm8 }
 0x1f9   : > { %v3317_v19 = vpop.permute.xlu0 %3316  ;;  %4698 = vst.msk [vmem:[#allocation3 + $0x18] sm:$0xff] %vm9503_vm8, %v4653_v6  ;;  %vm9505_vm6 = vcmask 294144   ;;  %v4008_v56 = vsel %vm1461_vm2, %v8278_v38, %v8832_v59  ;;  %v4626_v46 = vor.u32 %v4625_v18, %v4622_v50  ;;  %v2715_v11 = vrot.slane %v2713_v63, 4  ;;  %vm9508_vm14 = vmmov %vm9504_vm10 }
 0x1fa   : > { %3361 = vst.msk [vmem:[#allocation3 + $0x20] sm:$0xff] %vm3356_vm7, %v3317_v19  ;;  %v2718_v12 = vrot.slane %v2716_v48, 5  ;;  %v4012_v24 = vrot.slane %v4010_v28, 4  ;;  %v4015_v17 = vrot.slane %v4013_v61, 5  ;;  %v2711_v38 = vsel %vm1461_vm2, %v8242_v57, %v2710_v37  ;;  %vm9509_vm3 = vmmov %vm9505_vm6 }
 0x1fb   : > { %5041 = vst.msk [vmem:[#allocation3 + $0x18] sm:$0xff] %vm9504_vm10, %v8634_v34  ;;  %3334 = vrot.lane.b32.xlu1 %v3289_v60, %s6778_s15  ;;  %v3874_v34 = vsel %vm2551_vm4, %v3521_v27, 0  ;;  %v3300_v8 = vshrl.u32 %v3155_v15, 16  ;;  %v3303_v58 = vshll.u32 %v3155_v15, 16  ;;  %vm9506_vm9 = vcmp.ne.s16.totalorder %v9502_v14, 0  ;;  %vm9510_vm4 = vmmov %vm9503_vm8 }
 0x1fc   : > { %3493 = vst.msk [vmem:[#allocation3 + $0x20] sm:$0xff] %vm3488_vm1, %v8636_v42  ;;  %5634 = vrot.lane.b32.xlu0 %v5589_v13, %s6782_s21  ;;  %v5454_v42 = vsel %vm5437_vm13, %v8577_v62, 0  ;;  %v2732_v35 = vpop.permute.xlu1 %2731  ;;  %v5455_v62 = vsel %vm9506_vm9, %v5070_v51, 0  ;;  %v4627_v41 = vsel %vm1639_vm5, %v8753_v5, %v4626_v46  ;;  %v2719_v49 = vor.u32 %v2718_v12, %v2715_v11  ;;  %vm9511_vm13 = vmmov %vm9504_vm10  ;;  %v5978_v15 = vld [vmem:[%s9228_s5] sm:$0x3] }
 0x1fd   : > { %5660 = vst.msk [vmem:[#allocation3 + $0x18] sm:$0xff] %vm9505_vm6, %v5615_v25  ;;  %v4036_v1 = vpop.permute.xlu0 %4035  ;;  %v3297_v25 = vor.u32 %v3296_v31, %v3293_v55  ;;  %v5591_v36 = vshrl.u32 %v5454_v42, 16  ;;  %v5594_v30 = vshll.u32 %v5454_v42, 16  ;;  %v4019_v52 = vshrl.u32 %v3874_v34, 16  ;;  %vm9512_vm8 = vmmov %vm9509_vm3 }
 0x1fe   : > { %2775 = vst.msk [vmem:[#allocation3 + $0x28] sm:$0xff] %vm2769_vm11, %v2732_v35  ;;  %v4022_v57 = vshll.u32 %v3874_v34, 16  ;;  %v4016_v47 = vor.u32 %v4015_v17, %v4012_v24  ;;  %v3302_v33 = vrot.slane %v3300_v8, 3  ;;  %v3305_v32 = vrot.slane %v3303_v58, 4 }
 0x1ff   : > { %4080 = vst.msk [vmem:[#allocation3 + $0x20] sm:$0xff] %vm4075_vm0, %v4036_v1  ;;  %4053 = vrot.lane.b32.xlu1 %v4008_v56, %s6779_s16  ;;  %v3298_v39 = vsel %vm1639_vm5, %v8815_v23, %v3297_v25  ;;  %v5600_v43 = vshrl.u32 %v5455_v62, 16  ;;  %v4021_v23 = vrot.slane %v4019_v52, 4  ;;  %v5593_v9 = vrot.slane %v5591_v36, 4 }
 0x200   : > { %2749 = vrot.lane.b32.xlu0 %v2711_v38, %s6777_s14  ;;  %v5596_v45 = vrot.slane %v5594_v30, 5  ;;  %v5603_v14 = vshll.u32 %v5455_v62, 16  ;;  %v3306_v21 = vor.u32 %v3305_v32, %v3302_v33  ;;  %v4024_v3 = vrot.slane %v4022_v57, 5  ;;  %v9523_v57 = vld [vmem:[#allocation20_spill] sm:$0xff] }
 0x201   : > { %v3331_v22 = vpop.permute.xlu1 %3330  ;;  %v4636_v44 = vsel %vm1639_vm5, %v4626_v46, %v8766_v29  ;;  %v5602_v13 = vrot.slane %v5600_v43, 4  ;;  %v9528_v43 = vld [vmem:[#allocation22_spill] sm:$0xff] }
 0x202   : > { %v4667_v4 = vpop.permute.xlu0 %4666  ;;  %3368 = vst.msk [vmem:[#allocation3 + $0x58] sm:$0xff] %vm3356_vm7, %v3331_v22  ;;  %v3307_v50 = vsel %vm1639_vm5, %v3297_v25, %v3306_v21  ;;  %v4025_v18 = vor.u32 %v4024_v3, %v4021_v23  ;;  %v5597_v0 = vor.u32 %v5596_v45, %v5593_v9  ;;  %v5605_v6 = vrot.slane %v5603_v14, 5 }
 0x203   : > { %4705 = vst.msk [vmem:[#allocation3 + $0x50] sm:$0xff] %vm9507_vm15, %v4667_v4  ;;  %4672 = vrot.lane.b32.xlu1 %v4627_v41, %s6781_s18  ;;  %vm9513_vm5 = vcmask 64544  }
 0x204   : > { %3500 = vst.msk [vmem:[#allocation3 + $0x58] sm:$0xff] %vm3488_vm1, %v8610_v53  ;;  %3336 = vrot.lane.b32.xlu0 %v3298_v39, %s6778_s15  ;;  %v5676_v5 = vld [vmem:[#allocation3 + $0x18] sm:$0xff]  ;;  %v2720_v53 = vsel %vm1461_vm2, %v2710_v37, %v2719_v49  ;;  %v4026_v29 = vsel %vm1461_vm2, %v4016_v47, %v4025_v18  ;;  %v5598_v63 = vsel %vm1461_vm2, %v8810_v2, %v5597_v0  ;;  %vm9516_vm6 = vmmov %vm9513_vm5  ;;  %v9524_v39 = vld [vmem:[#allocation21_spill] sm:$0xff] }
 0x205   : > { %5048 = vst.msk [vmem:[#allocation3 + $0x50] sm:$0xff] %vm9508_vm14, %v8725_v54  ;;  %6676 = vmatmul.mubr.msk.bf16.gmra.mrb[20].mxu1 %vm5716_vm12, %v5676_v5  ;;  %v4050_v7 = vpop.permute.xlu1 %4049  ;;  %v4017_v54 = vsel %vm1461_vm2, %v8832_v59, %v4016_v47  ;;  %v5606_v48 = vor.u32 %v5605_v6, %v5602_v13  ;;  %vm9517_vm9 = vmmov %vm9513_vm5  ;;  %v9525_v47 = vld [vmem:[#allocation13_spill] sm:$0xff]  ;;  %v9541_v18 = vld [vmem:[#allocation15_spill] sm:$0xff] }
 0x206   : > { %v5629_v26 = vpop.permute.xlu0 %5628  ;;  %4087 = vst.msk [vmem:[#allocation3 + $0x58] sm:$0xff] %vm4075_vm0, %v4050_v7  ;;  %vm9518_vm15 = vmmov %vm9513_vm5  ;;  %v9526_v5 = vld [vmem:[#allocation25_spill] sm:$0xff]  ;;  %v9530_v7 = vld [vmem:[#allocation11_spill] sm:$0xff] }
 0x207   : > { %5667 = vst.msk [vmem:[#allocation3 + $0x50] sm:$0xff] %vm9509_vm3, %v5629_v26  ;;  %2751 = vrot.lane.b32.xlu1 %v2720_v53, %s6777_s14  ;;  %v5607_v61 = vsel %vm1461_vm2, %v5597_v0, %v5606_v48  ;;  %vm9514_vm2 = vcmask 1041408   ;;  %vm9519_vm14 = vmmov %vm9513_vm5  ;;  %v9544_v0 = vld [vmem:[#allocation24_spill] sm:$0xff] }
 0x208   : > { %4055 = vrot.lane.b32.xlu0 %v4017_v54, %s6779_s16  ;;  %6740 = vmatprep.subr.msk.bf16.mxu0 %vm9514_vm2, %v5978_v15  ;;  %vm9515_vm10 = vmmov %vm9514_vm2  ;;  %v9547_v6 = vld [vmem:[#allocation12_spill] sm:$0xff] }
 0x209   : > { %v4669_v40 = vpop.permute.xlu1 %4668  ;;  %vm9520_vm3 = vmmov %vm9510_vm4 }
 0x20a   : > { %v5631_v10 = vpop.permute.xlu0 %5630  ;;  %4706 = vst.msk [vmem:[#allocation3 + $0x58] sm:$0xff] %vm9510_vm4, %v4669_v40  ;;  %vm9521_vm4 = vmmov %vm9511_vm13 }
 0x20b   : > { %5049 = vst.msk [vmem:[#allocation3 + $0x58] sm:$0xff] %vm9511_vm13, %v8723_v16  ;;  %3338 = vrot.lane.b32.xlu1 %v3307_v50, %s6778_s15  ;;  %vm9522_vm13 = vmmov %vm9513_vm5  ;;  %s9095_s15 = scalar_lea.vmem %s9230_s7, %s6388_s29 }
 0x20c   : > { %4674 = vrot.lane.b32.xlu0 %v4636_v44, %s6781_s18  ;;  %5668 = vst.msk [vmem:[#allocation3 + $0x58] sm:$0xff] %vm9512_vm8, %v5631_v10  ;;  %vm9529_vm2 = vmmov %vm9521_vm4 }
 0x20d   : > { %v2748_v59 = vpop.permute.xlu1 %2747 }
 0x20e   : > { %v2746_v19 = vpop.permute.xlu0 %2745  ;;  %2783 = vst.msk [vmem:[#allocation3 + $0x68] sm:$0xff] %vm2769_vm11, %v2748_v59 }
 0x20f   : > { %2782 = vst.msk [vmem:[#allocation3 + $0x60] sm:$0xff] %vm2769_vm11, %v2746_v19  ;;  %4057 = vrot.lane.b32.xlu1 %v4026_v29, %s6779_s16 }
 0x210   : > { %5636 = vrot.lane.b32.xlu0 %v5598_v63, %s6782_s21 }
 0x211   : > { %v3451_v16 = vpop.permute.xlu1 %3450 }
 0x212   : > { %v3333_v28 = vpop.permute.xlu0 %3332 }
 0x213   : > { %3369 = vst.msk [vmem:[#allocation3 + $0x60] sm:$0xff] %vm3356_vm7, %v3333_v28  ;;  %5638 = vrot.lane.b32.xlu1 %v5607_v61, %s6782_s21 }
 0x214   : > { %3501 = vst.msk [vmem:[#allocation3 + $0x60] sm:$0xff] %vm3488_vm1, %v8658_v20  ;;  %v6035_v20 = vsel %vm9515_vm10, %v5978_v15, 0  ;;  %vm9531_vm10 = vmmov %vm9512_vm8  ;;  %v5684_v15 = vld [vmem:[#allocation3 + $0x58] sm:$0xff] }
 0x215   : > { %v8904_v27 = vpop.permute.xlu1 %3454  ;;  %6704 = vmatpush3.bf16.msra.mxu0 %v6035_v20 }
 0x216   : > { %v4052_v60 = vpop.permute.xlu0 %4051 }
 0x217   : > { %4088 = vst.msk [vmem:[#allocation3 + $0x60] sm:$0xff] %vm4075_vm0, %v4052_v60 }
 0x219   : > { %v8907_v2 = vpop.permute.xlu1 %5003 }
 0x21a   : > { %v8909_v37 = vpop.permute.xlu0 %3456 }
 0x21d   : > { %v2121_v55 = vpop.permute.xlu1 %2120 }
 0x21e   : > { %v3453_v31 = vpop.permute.xlu0 %3452  ;;  %2160 = vst.msk [vmem:[#allocation3 + $0x48] sm:$0xff] %vm9513_vm5, %v2121_v55  ;;  %vm9527_vm5 = vmmov %vm9520_vm3 }
 0x221   : > { %v8917_v56 = vpop.permute.xlu1 %3466 }
 0x222   : > { %v8919_v46 = vpop.permute.xlu0 %3468 }
 0x225   : > { %v8921_v34 = vpop.permute.xlu1 %3470 }
 0x226   : > { %v4998_v42 = vpop.permute.xlu0 %4997 }
 0x229   : > { %v5000_v51 = vpop.permute.xlu1 %4999 }
 0x22a   : > { %v5002_v35 = vpop.permute.xlu0 %5001 }
 0x22d   : > { %v2115_v1 = vpop.permute.xlu1 %2114 }
 0x22e   : > { %v8923_v11 = vpop.permute.xlu0 %5013  ;;  %2157 = vst.msk [vmem:[#allocation3 + $0x30] sm:$0xff] %vm9516_vm6, %v2115_v1  ;;  %vm9532_vm6 = vmmov %vm9520_vm3 }
 0x231   : > { %v2117_v12 = vpop.permute.xlu1 %2116 }
 0x232   : > { %v8926_v24 = vpop.permute.xlu0 %5622  ;;  %2158 = vst.msk [vmem:[#allocation3 + $0x38] sm:$0xff] %vm9517_vm9, %v2117_v12  ;;  %vm9533_vm9 = vmmov %vm9529_vm2  ;;  %v9030_v12 = vld [vmem:[%s9227_s4] ss:$0 sm:$0xff] }
 0x235   : > { %v2119_v17 = vpop.permute.xlu1 %2118 }
 0x236   : > { %v3325_v38 = vpop.permute.xlu0 %3324  ;;  %2159 = vst.msk [vmem:[#allocation3 + $0x40] sm:$0xff] %vm9518_vm15, %v2119_v17  ;;  %vm9534_vm15 = vmmov %vm9512_vm8 }
 0x239   : > { %v8930_v25 = vpop.permute.xlu1 %5015 }
 0x23a   : > { %v4044_v8 = vpop.permute.xlu0 %4043 }
 0x23d   : > { %v2131_v58 = vpop.permute.xlu1 %2130 }
 0x23e   : > { %v4655_v62 = vpop.permute.xlu0 %4654  ;;  %2165 = vst.msk [vmem:[#allocation3 + $0x70] sm:$0xff] %vm9519_vm14, %v2131_v58  ;;  %vm9535_vm14 = vmmov %vm9520_vm3 }
 0x23f   : > { %4699 = vst.msk [vmem:[#allocation3 + $0x20] sm:$0xff] %vm9520_vm3, %v4655_v62  ;;  %vm9536_vm3 = vmmov %vm9529_vm2 }
 0x240   : > { %5042 = vst.msk [vmem:[#allocation3 + $0x20] sm:$0xff] %vm9521_vm4, %v4998_v42  ;;  %vm9537_vm4 = vmmov %vm9512_vm8 }
 0x241   : > { %v2133_v36 = vpop.permute.xlu1 %2132 }
 0x242   : > { %v5617_v30 = vpop.permute.xlu0 %5616  ;;  %2166 = vst.msk [vmem:[#allocation3 + $0x78] sm:$0xff] %vm9522_vm13, %v2133_v36  ;;  %vm9538_vm13 = vmmov %vm9527_vm5 }
 0x243   : > { %5661 = vst.msk [vmem:[#allocation3 + $0x20] sm:$0xff] %vm9512_vm8, %v5617_v30  ;;  %vm9539_vm8 = vmmov %vm9529_vm2 }
 0x245   : > { %v4661_v22 = vpop.permute.xlu1 %4660 }
 0x246   : > { %v5619_v4 = vpop.permute.xlu0 %5618 }
 0x249   : > { %v2740_v41 = vpop.permute.xlu1 %2739 }
 0x24a   : > { %v2734_v49 = vpop.permute.xlu0 %2733  ;;  %v5677_v52 = vld [vmem:[#allocation3 + $0x20] sm:$0xff]  ;;  %2779 = vst.msk [vmem:[#allocation3 + $0x48] sm:$0xff] %vm2769_vm11, %v2740_v41 }
 0x24b   : > { %2776 = vst.msk [vmem:[#allocation3 + $0x30] sm:$0xff] %vm2769_vm11, %v2734_v49  ;;  %6679 = vmatprep.mubr.msk.bf16.mxu1 %vm5716_vm12, %v5677_v52 }
 0x24c   : > { %3366 = vst.msk [vmem:[#allocation3 + $0x48] sm:$0xff] %vm3356_vm7, %v9523_v57 }
 0x24d   : > { %3498 = vst.msk [vmem:[#allocation3 + $0x48] sm:$0xff] %vm3488_vm1, %v9524_v39  ;;  %v3319_v33 = vpop.permute.xlu1 %3318 }
 0x24e   : > { %4085 = vst.msk [vmem:[#allocation3 + $0x48] sm:$0xff] %vm4075_vm0, %v9525_v47  ;;  %v3321_v32 = vpop.permute.xlu0 %3320 }
 0x24f   : > { %4704 = vst.msk [vmem:[#allocation3 + $0x48] sm:$0xff] %vm9527_vm5, %v9526_v5  ;;  %vm9540_vm5 = vmmov %vm9537_vm4 }
 0x250   : > { %3362 = vst.msk [vmem:[#allocation3 + $0x28] sm:$0xff] %vm3356_vm7, %v3319_v33  ;;  %3363 = vst.msk [vmem:[#allocation3 + $0x30] sm:$0xff] %vm3356_vm7, %v3321_v32 }
 0x251   : > { %5047 = vst.msk [vmem:[#allocation3 + $0x48] sm:$0xff] %vm9529_vm2, %v9528_v43  ;;  %v4038_v26 = vpop.permute.xlu1 %4037  ;;  %vm9542_vm2 = vmmov %vm9532_vm6 }
 0x252   : > { %3494 = vst.msk [vmem:[#allocation3 + $0x28] sm:$0xff] %vm3488_vm1, %v3451_v16  ;;  %3495 = vst.msk [vmem:[#allocation3 + $0x30] sm:$0xff] %vm3488_vm1, %v3453_v31  ;;  %v4040_v23 = vpop.permute.xlu0 %4039 }
 0x253   : > { %5666 = vst.msk [vmem:[#allocation3 + $0x48] sm:$0xff] %vm9531_vm10, %v9530_v7  ;;  %vm9543_vm10 = vmmov %vm9542_vm2 }
 0x254   : > { %4081 = vst.msk [vmem:[#allocation3 + $0x28] sm:$0xff] %vm4075_vm0, %v4038_v26  ;;  %4082 = vst.msk [vmem:[#allocation3 + $0x30] sm:$0xff] %vm4075_vm0, %v4040_v23 }
 0x255   : > { %v4657_v9 = vpop.permute.xlu1 %4656 }
 0x256   : > { %v8958_v45 = vpop.permute.xlu0 %5017  ;;  %4700 = vst.msk [vmem:[#allocation3 + $0x28] sm:$0xff] %vm9532_vm6, %v4657_v9  ;;  %vm9545_vm6 = vmmov %vm9536_vm3 }
 0x257   : > { %5043 = vst.msk [vmem:[#allocation3 + $0x28] sm:$0xff] %vm9533_vm9, %v5000_v51  ;;  %vm9546_vm9 = vmmov %vm9536_vm3 }
 0x258   : > { %5662 = vst.msk [vmem:[#allocation3 + $0x28] sm:$0xff] %vm9534_vm15, %v5619_v4  ;;  %vm9548_vm15 = vmmov %vm9537_vm4 }
 0x259   : > { %v2736_v14 = vpop.permute.xlu1 %2735 }
 0x25a   : > { %v4659_v53 = vpop.permute.xlu0 %4658  ;;  %2777 = vst.msk [vmem:[#allocation3 + $0x38] sm:$0xff] %vm2769_vm11, %v2736_v14 }
 0x25b   : > { %4701 = vst.msk [vmem:[#allocation3 + $0x30] sm:$0xff] %vm9535_vm14, %v4659_v53  ;;  %vm9549_vm14 = vmmov %vm9537_vm4 }
 0x25c   : > { %5044 = vst.msk [vmem:[#allocation3 + $0x30] sm:$0xff] %vm9536_vm3, %v5002_v35  ;;  %vm9550_vm3 = vmmov %vm9542_vm2 }
 0x25d   : > { %v3323_v54 = vpop.permute.xlu1 %3322 }
 0x25e   : > { %v5621_v21 = vpop.permute.xlu0 %5620  ;;  %3364 = vst.msk [vmem:[#allocation3 + $0x38] sm:$0xff] %vm3356_vm7, %v3323_v54 }
 0x25f   : > { %5663 = vst.msk [vmem:[#allocation3 + $0x30] sm:$0xff] %vm9537_vm4, %v5621_v21  ;;  %v5678_v3 = vld [vmem:[#allocation3 + $0x28] sm:$0xff]  ;;  %vm9551_vm4 = vmmov %vm9545_vm6 }
 0x260   : > { %3496 = vst.msk [vmem:[#allocation3 + $0x38] sm:$0xff] %vm3488_vm1, %v8904_v27  ;;  %6680 = vmatmul.mubr.msk.bf16.gmra.mrb[24].mxu1 %vm5716_vm12, %v5678_v3  ;;  %v5682_v27 = vld [vmem:[#allocation3 + $0x48] sm:$0xff] }
 0x261   : > { %v4042_v40 = vpop.permute.xlu1 %4041 }
 0x262   : > { %v2738_v10 = vpop.permute.xlu0 %2737  ;;  %4083 = vst.msk [vmem:[#allocation3 + $0x38] sm:$0xff] %vm4075_vm0, %v4042_v40 }
 0x263   : > { %2778 = vst.msk [vmem:[#allocation3 + $0x40] sm:$0xff] %vm2769_vm11, %v2738_v10 }
 0x264   : > { %4702 = vst.msk [vmem:[#allocation3 + $0x38] sm:$0xff] %vm9538_vm13, %v4661_v22  ;;  %vm9552_vm13 = vmmov %vm9540_vm5 }
 0x265   : > { %3365 = vst.msk [vmem:[#allocation3 + $0x40] sm:$0xff] %vm3356_vm7, %v3325_v38  ;;  %v4677_v44 = vpop.permute.xlu1 %4676 }
 0x266   : > { %5045 = vst.msk [vmem:[#allocation3 + $0x38] sm:$0xff] %vm9539_vm8, %v8907_v2  ;;  %v4671_v13 = vpop.permute.xlu0 %4670  ;;  %v5679_v50 = vld [vmem:[#allocation3 + $0x30] sm:$0xff]  ;;  %vm9553_vm8 = vmmov %vm9542_vm2 }
 0x267   : > { %3497 = vst.msk [vmem:[#allocation3 + $0x40] sm:$0xff] %vm3488_vm1, %v8909_v37  ;;  %6683 = vmatprep.mubr.msk.bf16.mxu1 %vm5716_vm12, %v5679_v50  ;;  %v5683_v37 = vld [vmem:[#allocation3 + $0x50] sm:$0xff] }
 0x268   : > { %5664 = vst.msk [vmem:[#allocation3 + $0x38] sm:$0xff] %vm9540_vm5, %v8926_v24  ;;  %vm9554_vm5 = vmmov %vm9551_vm4 }
 0x269   : > { %4084 = vst.msk [vmem:[#allocation3 + $0x40] sm:$0xff] %vm4075_vm0, %v4044_v8  ;;  %v5020_v59 = vpop.permute.xlu1 %5019 }
 0x26a   : > { %4703 = vst.msk [vmem:[#allocation3 + $0x40] sm:$0xff] %vm9542_vm2, %v9541_v18  ;;  %v5633_v19 = vpop.permute.xlu0 %5632 }
 0x26b   : > { %4707 = vst.msk [vmem:[#allocation3 + $0x60] sm:$0xff] %vm9543_vm10, %v4671_v13  ;;  %vm9556_vm10 = vmmov %vm9551_vm4 }
 0x26c   : > { %5046 = vst.msk [vmem:[#allocation3 + $0x40] sm:$0xff] %vm9545_vm6, %v9544_v0 }
 0x26d   : > { %5050 = vst.msk [vmem:[#allocation3 + $0x60] sm:$0xff] %vm9546_vm9, %v8923_v11  ;;  %v3335_v63 = vpop.permute.xlu1 %3334 }
 0x26e   : > { %5665 = vst.msk [vmem:[#allocation3 + $0x40] sm:$0xff] %vm9548_vm15, %v9547_v6  ;;  %v5635_v48 = vpop.permute.xlu0 %5634 }
 0x26f   : > { %5669 = vst.msk [vmem:[#allocation3 + $0x60] sm:$0xff] %vm9549_vm14, %v5633_v19  ;;  %v5680_v29 = vld [vmem:[#allocation3 + $0x38] sm:$0xff] }
 0x270   : > { %6684 = vmatmul.mubr.msk.bf16.gmra.mrb[28].mxu1 %vm5716_vm12, %v5680_v29  ;;  %3370 = vst.msk [vmem:[#allocation3 + $0x68] sm:$0xff] %vm3356_vm7, %v3335_v63 }
 0x271   : > { %3502 = vst.msk [vmem:[#allocation3 + $0x68] sm:$0xff] %vm3488_vm1, %v8917_v56  ;;  %v4054_v28 = vpop.permute.xlu1 %4053 }
 0x272   : > { %v2750_v61 = vpop.permute.xlu0 %2749  ;;  %4089 = vst.msk [vmem:[#allocation3 + $0x68] sm:$0xff] %vm4075_vm0, %v4054_v28 }
 0x273   : > { %2784 = vst.msk [vmem:[#allocation3 + $0x70] sm:$0xff] %vm2769_vm11, %v2750_v61 }
 0x275   : > { %v5681_v16 = vld [vmem:[#allocation3 + $0x40] sm:$0xff]  ;;  %v4673_v60 = vpop.permute.xlu1 %4672 }
 0x276   : > { %6687 = vmatprep.mubr.msk.bf16.mxu1 %vm5716_vm12, %v5681_v16  ;;  %v3337_v2 = vpop.permute.xlu0 %3336  ;;  %4708 = vst.msk [vmem:[#allocation3 + $0x68] sm:$0xff] %vm9550_vm3, %v4673_v60  ;;  %v5685_v42 = vld [vmem:[#allocation3 + $0x60] sm:$0xff] }
 0x277   : > { %3371 = vst.msk [vmem:[#allocation3 + $0x70] sm:$0xff] %vm3356_vm7, %v3337_v2 }
 0x278   : > { %6688 = vmatmul.mubr.msk.bf16.gmra.mrb[32].mxu1 %vm5716_vm12, %v5682_v27  ;;  %5051 = vst.msk [vmem:[#allocation3 + $0x68] sm:$0xff] %vm9551_vm4, %v8930_v25 }
 0x279   : > { %6691 = vmatprep.mubr.msk.bf16.mxu1 %vm5716_vm12, %v5683_v37  ;;  %3503 = vst.msk [vmem:[#allocation3 + $0x70] sm:$0xff] %vm3488_vm1, %v8919_v46  ;;  %v2752_v55 = vpop.permute.xlu1 %2751 }
 0x27a   : > { %5670 = vst.msk [vmem:[#allocation3 + $0x68] sm:$0xff] %vm9552_vm13, %v5635_v48  ;;  %v4056_v31 = vpop.permute.xlu0 %4055 }
 0x27b   : > { %2785 = vst.msk [vmem:[#allocation3 + $0x78] sm:$0xff] %vm2769_vm11, %v2752_v55  ;;  %vm9555_vm11 = vmmov %vm9552_vm13 }
 0x27c   : > { %4090 = vst.msk [vmem:[#allocation3 + $0x70] sm:$0xff] %vm4075_vm0, %v4056_v31 }
 0x27d   : > { %v3339_v20 = vpop.permute.xlu1 %3338 }
 0x27e   : > { %v4675_v56 = vpop.permute.xlu0 %4674  ;;  %3372 = vst.msk [vmem:[#allocation3 + $0x78] sm:$0xff] %vm3356_vm7, %v3339_v20  ;;  %vm9557_vm7 = vmmov %vm9555_vm11 }
 0x27f   : > { %4709 = vst.msk [vmem:[#allocation3 + $0x70] sm:$0xff] %vm9553_vm8, %v4675_v56 }
 0x280   : > { %6692 = vmatmul.mubr.msk.bf16.gmra.mrb[36].mxu1 %vm5716_vm12, %v5684_v15  ;;  %3504 = vst.msk [vmem:[#allocation3 + $0x78] sm:$0xff] %vm3488_vm1, %v8921_v34 }
 0x281   : > { %6695 = vmatprep.mubr.msk.bf16.mxu1 %vm5716_vm12, %v5685_v42  ;;  %5052 = vst.msk [vmem:[#allocation3 + $0x70] sm:$0xff] %vm9554_vm5, %v8958_v45  ;;  %v4058_v46 = vpop.permute.xlu1 %4057  ;;  %v5686_v35 = vld [vmem:[#allocation3 + $0x68] sm:$0xff] }
 0x282   : > { %v5637_v51 = vpop.permute.xlu0 %5636  ;;  %4091 = vst.msk [vmem:[#allocation3 + $0x78] sm:$0xff] %vm4075_vm0, %v4058_v46 }
 0x283   : > { %5671 = vst.msk [vmem:[#allocation3 + $0x70] sm:$0xff] %vm9555_vm11, %v5637_v51 }
 0x284   : > { %4710 = vst.msk [vmem:[#allocation3 + $0x78] sm:$0xff] %vm9542_vm2, %v4677_v44 }
 0x285   : > { %5053 = vst.msk [vmem:[#allocation3 + $0x78] sm:$0xff] %vm9556_vm10, %v5020_v59  ;;  %v5639_v1 = vpop.permute.xlu1 %5638 }
 0x286   : > { %5672 = vst.msk [vmem:[#allocation3 + $0x78] sm:$0xff] %vm9557_vm7, %v5639_v1 }
 0x288   : > { %6696 = vmatmul.mubr.msk.bf16.gmra.mrb[40].mxu1 %vm5716_vm12, %v5686_v35 }
 0x28a   : > { %v5687_v34 = vld [vmem:[#allocation3 + $0x70] sm:$0xff] }
 0x28b   : > { %6699 = vmatprep.mubr.msk.bf16.mxu1 %vm5716_vm12, %v5687_v34 }
 0x28d   : > { %v5688_v11 = vld [vmem:[#allocation3 + $0x78] sm:$0xff] }
 0x290   : > { %6700 = vmatmul.mubr.msk.bf16.gmra.mrb[44].mxu1 %vm5716_vm12, %v5688_v11  ;;  %vm9558_vm12 = vcmask 31744  }
 0x291   : > { %vm9559_vm1 = vmmov %vm9558_vm12 }
 0x292   : > { %vm9560_vm0 = vmmov %vm9559_vm1 }
 0x293   : > { %vm9561_vm6 = vmmov %vm9560_vm0 }
 0x294   : > { %vm9562_vm9 = vmmov %vm9560_vm0 }
 0x295   : > { %vm9563_vm15 = vmmov %vm9560_vm0 }
 0x296   : > { %v6673_v24 = vpop.f32.mrb[16].mxu1  ;;  %vm9564_vm14 = vmmov %vm9560_vm0 }
 0x297   : > { %v5812_v17 = vadd.f32 %v6673_v24, %v9030_v12  ;;  %v5803_v38 = vpop.f32.mrb[17].mxu1  ;;  %vm9565_vm3 = vmmov %vm9560_vm0 }
 0x298   : > { %v5804_v25 = vadd.f32 %v9030_v12, %v5803_v38  ;;  %v6674_v8 = vpop.f32.mrb[18].mxu1  ;;  %vm9566_vm4 = vmmov %vm9560_vm0 }
 0x299   : > { %v5815_v58 = vadd.f32 %v6674_v8, %v9030_v12  ;;  %v5806_v62 = vpop.f32.mrb[19].mxu1  ;;  %v5932_v30 = vmax.f32 %v5812_v17, 0.0  ;;  %vm9567_vm13 = vmmov %vm9560_vm0 }
 0x29a   : > { %v5807_v36 = vadd.f32 %v9030_v12, %v5806_v62  ;;  %v5930_v4 = vmax.f32 %v5804_v25, 0.0  ;;  %vm9568_vm8 = vmmov %vm9560_vm0 }
 0x29b   : > { %v5933_v22 = vmax.f32 %v5815_v58, 0.0  ;;  %vm9569_vm5 = vmmov %vm9560_vm0 }
 0x29c   : > { %v5931_v41 = vmax.f32 %v5807_v36, 0.0  ;;  %vm9570_vm11 = vmmov %vm9560_vm0 }
 0x29d   : > { %v5963_v49 = vpack.c.bf16 %v5933_v22, %v5932_v30  ;;  %vm9571_vm2 = vmmov %vm9560_vm0 }
 0x29e   : > { %v5962_v52 = vpack.c.bf16 %v5931_v41, %v5930_v4  ;;  %vm9572_vm10 = vmmov %vm9560_vm0 }
 0x29f   : > { %vm9573_vm7 = vmmov %vm9560_vm0 }
 0x2a0   : > { %6705 = vmatprep.mubr.msk.bf16.mxu0 %vm9558_vm12, %v5962_v52  ;;  %vm9574_vm12 = vcmask 130048  }
 0x2a1   : > { %6706 = vmatmul.mubr.msk.bf16.vlgmr.msra.gmra.mrb[16].mxu0 %vm9559_vm1, %v5963_v49  ;;  %vm9575_vm1 = vmmov %vm9574_vm12 }
 0x2d8   : > { %v6677_v57 = vpop.f32.mrb[20].mxu1 }
 0x2d9   : > { %v5828_v39 = vadd.f32 %v6677_v57, %v9030_v12  ;;  %v5819_v47 = vpop.f32.mrb[21].mxu1 }
 0x2da   : > { %v5820_v33 = vadd.f32 %v9030_v12, %v5819_v47  ;;  %v6678_v32 = vpop.f32.mrb[22].mxu1 }
 0x2db   : > { %v5831_v5 = vadd.f32 %v6678_v32, %v9030_v12  ;;  %v5822_v43 = vpop.f32.mrb[23].mxu1  ;;  %v5936_v26 = vmax.f32 %v5828_v39, 0.0 }
 0x2dc   : > { %v5823_v7 = vadd.f32 %v9030_v12, %v5822_v43  ;;  %v5934_v9 = vmax.f32 %v5820_v33, 0.0 }
 0x2dd   : > { %v5937_v23 = vmax.f32 %v5831_v5, 0.0 }
 0x2de   : > { %v5935_v45 = vmax.f32 %v5823_v7, 0.0 }
 0x2df   : > { %v5965_v14 = vpack.c.bf16 %v5937_v23, %v5936_v26 }
 0x2e0   : > { %v5964_v53 = vpack.c.bf16 %v5935_v45, %v5934_v9 }
 0x2e2   : > { %6709 = vmatprep.mubr.msk.bf16.mxu0 %vm9560_vm0, %v5964_v53  ;;  %vm9576_vm0 = vmmov %vm9575_vm1 }
 0x2e3   : > { %6710 = vmatmul.mubr.msk.bf16.gmra.mrb[20].mxu0 %vm9561_vm6, %v5965_v14  ;;  %vm9577_vm6 = vmmov %vm9576_vm0 }
 0x333   : > { %v6681_v54 = vpop.f32.mrb[24].mxu1 }
 0x334   : > { %v5844_v21 = vadd.f32 %v6681_v54, %v9030_v12  ;;  %v5835_v3 = vpop.f32.mrb[25].mxu1 }
 0x335   : > { %v5836_v40 = vadd.f32 %v9030_v12, %v5835_v3  ;;  %v6682_v10 = vpop.f32.mrb[26].mxu1 }
 0x336   : > { %v5847_v44 = vadd.f32 %v6682_v10, %v9030_v12  ;;  %v5838_v13 = vpop.f32.mrb[27].mxu1  ;;  %v5940_v18 = vmax.f32 %v5844_v21, 0.0 }
 0x337   : > { %v5839_v50 = vadd.f32 %v9030_v12, %v5838_v13  ;;  %v5938_v6 = vmax.f32 %v5836_v40, 0.0 }
 0x338   : > { %v5941_v0 = vmax.f32 %v5847_v44, 0.0 }
 0x339   : > { %v5939_v59 = vmax.f32 %v5839_v50, 0.0 }
 0x33a   : > { %v5967_v19 = vpack.c.bf16 %v5941_v0, %v5940_v18 }
 0x33b   : > { %v5966_v29 = vpack.c.bf16 %v5939_v59, %v5938_v6 }
 0x33d   : > { %6713 = vmatprep.mubr.msk.bf16.mxu0 %vm9562_vm9, %v5966_v29  ;;  %vm9578_vm9 = vmmov %vm9576_vm0 }
 0x33e   : > { %6714 = vmatmul.mubr.msk.bf16.gmra.mrb[24].mxu0 %vm9563_vm15, %v5967_v19  ;;  %vm9579_vm15 = vmmov %vm9576_vm0 }
 0x343   : > { %v6685_v63 = vpop.f32.mrb[28].mxu1 }
 0x344   : > { %v5860_v48 = vadd.f32 %v6685_v63, %v9030_v12  ;;  %v5851_v16 = vpop.f32.mrb[29].mxu1 }
 0x345   : > { %v5852_v28 = vadd.f32 %v9030_v12, %v5851_v16  ;;  %v6686_v61 = vpop.f32.mrb[30].mxu1 }
 0x346   : > { %v5863_v27 = vadd.f32 %v6686_v61, %v9030_v12  ;;  %v5854_v60 = vpop.f32.mrb[31].mxu1  ;;  %v5944_v37 = vmax.f32 %v5860_v48, 0.0 }
 0x347   : > { %v5855_v2 = vadd.f32 %v9030_v12, %v5854_v60  ;;  %v5942_v31 = vmax.f32 %v5852_v28, 0.0 }
 0x348   : > { %v5945_v55 = vmax.f32 %v5863_v27, 0.0 }
 0x349   : > { %v5943_v15 = vmax.f32 %v5855_v2, 0.0  ;;  %v9083_v2 = vld [vmem:[%s9229_s6] ss:$0 sm:$0xff] }
 0x34a   : > { %v5969_v20 = vpack.c.bf16 %v5945_v55, %v5944_v37 }
 0x34b   : > { %v5968_v56 = vpack.c.bf16 %v5943_v15, %v5942_v31  ;;  %v6689_v42 = vpop.f32.mrb[32].mxu1  ;;  %v6232_v31 = vld [vmem:[%s6842_s9 + $0x10] sm:$0xff] }
 0x34c   : > { %v5876_v46 = vadd.f32 %v6689_v42, %v9030_v12  ;;  %v5867_v51 = vpop.f32.mrb[33].mxu1  ;;  %v6230_v42 = vld [vmem:[%s6842_s9] sm:$0xff] }
 0x34d   : > { %v5868_v35 = vadd.f32 %v9030_v12, %v5867_v51  ;;  %v6690_v1 = vpop.f32.mrb[34].mxu1  ;;  %6717 = vmatprep.mubr.msk.bf16.mxu0 %vm9564_vm14, %v5968_v56  ;;  %vm9580_vm14 = vmmov %vm9576_vm0 }
 0x34e   : > { %v5879_v34 = vadd.f32 %v6690_v1, %v9030_v12  ;;  %v5870_v11 = vpop.f32.mrb[35].mxu1  ;;  %6718 = vmatmul.mubr.msk.bf16.gmra.mrb[28].mxu0 %vm9565_vm3, %v5969_v20  ;;  %v5948_v17 = vmax.f32 %v5876_v46, 0.0  ;;  %v6233_v1 = vld [vmem:[%s6842_s9 + $0x18] sm:$0xff]  ;;  %vm9581_vm3 = vmmov %vm9576_vm0 }
 0x34f   : > { %v5871_v24 = vadd.f32 %v9030_v12, %v5870_v11  ;;  %v5946_v25 = vmax.f32 %v5868_v35, 0.0 }
 0x350   : > { %v5949_v38 = vmax.f32 %v5879_v34, 0.0 }
 0x351   : > { %v5947_v8 = vmax.f32 %v5871_v24, 0.0 }
 0x352   : > { %v5971_v58 = vpack.c.bf16 %v5949_v38, %v5948_v17  ;;  %v6231_v17 = vld [vmem:[%s6842_s9 + $0x8] sm:$0xff] }
 0x353   : > { %v5970_v62 = vpack.c.bf16 %v5947_v8, %v5946_v25  ;;  %v6693_v36 = vpop.f32.mrb[36].mxu1 }
 0x354   : > { %v5892_v30 = vadd.f32 %v6693_v36, %v9030_v12  ;;  %v5883_v22 = vpop.f32.mrb[37].mxu1 }
 0x355   : > { %v5884_v4 = vadd.f32 %v9030_v12, %v5883_v22  ;;  %v6694_v41 = vpop.f32.mrb[38].mxu1  ;;  %6721 = vmatprep.mubr.msk.bf16.mxu0 %vm9566_vm4, %v5970_v62  ;;  %v6236_v22 = vld [vmem:[%s6842_s9 + $0x30] sm:$0xff]  ;;  %vm9582_vm4 = vmmov %vm9576_vm0 }
 0x356   : > { %v5895_v49 = vadd.f32 %v6694_v41, %v9030_v12  ;;  %v5886_v52 = vpop.f32.mrb[39].mxu1  ;;  %6722 = vmatmul.mubr.msk.bf16.gmra.mrb[32].mxu0 %vm9567_vm13, %v5971_v58  ;;  %v5952_v39 = vmax.f32 %v5892_v30, 0.0  ;;  %vm9583_vm13 = vmmov %vm9576_vm0 }
 0x357   : > { %v5887_v57 = vadd.f32 %v9030_v12, %v5886_v52  ;;  %v5950_v33 = vmax.f32 %v5884_v4, 0.0  ;;  %v6234_v52 = vld [vmem:[%s6842_s9 + $0x20] sm:$0xff] }
 0x358   : > { %v5953_v47 = vmax.f32 %v5895_v49, 0.0 }
 0x359   : > { %v5951_v32 = vmax.f32 %v5887_v57, 0.0 }
 0x35a   : > { %v5973_v5 = vpack.c.bf16 %v5953_v47, %v5952_v39 }
 0x35b   : > { %v5972_v43 = vpack.c.bf16 %v5951_v32, %v5950_v33  ;;  %v6697_v7 = vpop.f32.mrb[40].mxu1  ;;  %v6237_v33 = vld [vmem:[%s6842_s9 + $0x38] sm:$0xff] }
 0x35c   : > { %v5908_v26 = vadd.f32 %v6697_v7, %v9030_v12  ;;  %v5899_v23 = vpop.f32.mrb[41].mxu1  ;;  %v6235_v7 = vld [vmem:[%s6842_s9 + $0x28] sm:$0xff] }
 0x35d   : > { %v5900_v9 = vadd.f32 %v9030_v12, %v5899_v23  ;;  %v6698_v45 = vpop.f32.mrb[42].mxu1  ;;  %6725 = vmatprep.mubr.msk.bf16.mxu0 %vm9568_vm8, %v5972_v43  ;;  %vm9584_vm8 = vmmov %vm9576_vm0 }
 0x35e   : > { %v5911_v14 = vadd.f32 %v6698_v45, %v9030_v12  ;;  %v5902_v53 = vpop.f32.mrb[43].mxu1  ;;  %6726 = vmatmul.mubr.msk.bf16.gmra.mrb[36].mxu0 %vm9569_vm5, %v5973_v5  ;;  %v5956_v21 = vmax.f32 %v5908_v26, 0.0  ;;  %vm9585_vm5 = vmmov %vm9576_vm0 }
 0x35f   : > { %v5903_v54 = vadd.f32 %v9030_v12, %v5902_v53  ;;  %v5954_v40 = vmax.f32 %v5900_v9, 0.0 }
 0x360   : > { %v5957_v3 = vmax.f32 %v5911_v14, 0.0 }
 0x361   : > { %v5955_v10 = vmax.f32 %v5903_v54, 0.0 }
 0x362   : > { %v5975_v44 = vpack.c.bf16 %v5957_v3, %v5956_v21  ;;  %v6240_v21 = vld [vmem:[%s6842_s9 + $0x50] sm:$0xff] }
 0x363   : > { %v5974_v13 = vpack.c.bf16 %v5955_v10, %v5954_v40  ;;  %v6701_v50 = vpop.f32.mrb[44].mxu1 }
 0x364   : > { %v5924_v18 = vadd.f32 %v6701_v50, %v9030_v12  ;;  %v5915_v0 = vpop.f32.mrb[45].mxu1 }
 0x365   : > { %6729 = vmatprep.mubr.msk.bf16.mxu0 %vm9570_vm11, %v5974_v13  ;;  %v5916_v6 = vadd.f32 %v9030_v12, %v5915_v0  ;;  %v6702_v59 = vpop.f32.mrb[46].mxu1  ;;  %v6241_v0 = vld [vmem:[%s6842_s9 + $0x58] sm:$0xff]  ;;  %vm9586_vm11 = vmmov %vm9576_vm0 }
 0x366   : > { %6730 = vmatmul.mubr.msk.bf16.gmra.mrb[40].mxu0 %vm9571_vm2, %v5975_v44  ;;  %v5927_v19 = vadd.f32 %v6702_v59, %v9030_v12  ;;  %v5918_v29 = vpop.f32.mrb[47].mxu1  ;;  %v5960_v48 = vmax.f32 %v5924_v18, 0.0  ;;  %v6238_v44 = vld [vmem:[%s6842_s9 + $0x40] sm:$0xff]  ;;  %vm9587_vm2 = vmmov %vm9576_vm0 }
 0x367   : > { %v5919_v63 = vadd.f32 %v9030_v12, %v5918_v29  ;;  %v5958_v28 = vmax.f32 %v5916_v6, 0.0  ;;  %v6239_v29 = vld [vmem:[%s6842_s9 + $0x48] sm:$0xff] }
 0x368   : > { %v5961_v16 = vmax.f32 %v5927_v19, 0.0 }
 0x369   : > { %v5959_v61 = vmax.f32 %v5919_v63, 0.0 }
 0x36a   : > { %v5977_v27 = vpack.c.bf16 %v5961_v16, %v5960_v48 }
 0x36b   : > { %v5976_v60 = vpack.c.bf16 %v5959_v61, %v5958_v28 }
 0x36d   : > { %6733 = vmatprep.mubr.msk.bf16.mxu0 %vm9572_vm10, %v5976_v60  ;;  %vm9588_vm10 = vmmov %vm9576_vm0 }
 0x36e   : > { %6734 = vmatmul.mubr.msk.bf16.gmra.mrb[44].mxu0 %vm9573_vm7, %v5977_v27  ;;  %vm9589_vm7 = vmmov %vm9576_vm0 }
 0x374   : > { %v6707_v37 = vpop.f32.mrb[16].mxu0 }
 0x375   : > { %v6080_v12 = vadd.f32 %v6707_v37, %v9083_v2  ;;  %v6071_v55 = vpop.f32.mrb[17].mxu0  ;;  %v6244_v37 = vld [vmem:[%s6842_s9 + $0x70] sm:$0xff] }
 0x376   : > { %v6072_v15 = vadd.f32 %v9083_v2, %v6071_v55  ;;  %v6708_v20 = vpop.f32.mrb[18].mxu0 }
 0x377   : > { %v6200_v56 = vmax.f32 %v6080_v12, 0.0  ;;  %v6083_v46 = vadd.f32 %v6708_v20, %v9083_v2  ;;  %v6074_v51 = vpop.f32.mrb[19].mxu0 }
 0x378   : > { %v6198_v35 = vmax.f32 %v6072_v15, 0.0  ;;  %v6075_v34 = vadd.f32 %v9083_v2, %v6074_v51  ;;  %v6242_v15 = vld [vmem:[%s6842_s9 + $0x60] sm:$0xff] }
 0x379   : > { %v6264_v11 = vadd.f32 %v6232_v31, %v6200_v56  ;;  %v6201_v24 = vmax.f32 %v6083_v46, 0.0  ;;  %v6245_v46 = vld [vmem:[%s6842_s9 + $0x78] sm:$0xff] }
 0x37a   : > { %v6262_v38 = vadd.f32 %v6230_v42, %v6198_v35  ;;  %v6199_v25 = vmax.f32 %v6075_v34, 0.0  ;;  %v6243_v34 = vld [vmem:[%s6842_s9 + $0x68] sm:$0xff] }
 0x37b   : > { %6296 = vst.msk [vmem:[%s9095_s15 + $0x10] sm:$0xff] %vm9574_vm12, %v6264_v11  ;;  %v6265_v8 = vadd.f32 %v6233_v1, %v6201_v24  ;;  %vm9590_vm12 = vmmov %vm9576_vm0 }
 0x37c   : > { %6294 = vst.msk [vmem:[%s9095_s15] sm:$0xff] %vm9575_vm1, %v6262_v38  ;;  %v6263_v58 = vadd.f32 %v6231_v17, %v6199_v25  ;;  %vm9591_vm1 = vmmov %vm9576_vm0 }
 0x37d   : > { %6297 = vst.msk [vmem:[%s9095_s15 + $0x18] sm:$0xff] %vm9576_vm0, %v6265_v8 }
 0x37e   : > { %6295 = vst.msk [vmem:[%s9095_s15 + $0x8] sm:$0xff] %vm9577_vm6, %v6263_v58  ;;  %vm9592_vm6 = vmmov %vm9576_vm0 }
 0x3b6   : > { %v6711_v62 = vpop.f32.mrb[20].mxu0 }
 0x3b7   : > { %v6096_v36 = vadd.f32 %v6711_v62, %v9083_v2  ;;  %v6087_v30 = vpop.f32.mrb[21].mxu0  ;;  %v6248_v62 = vld [vmem:[%s6842_s9 + $0x90] sm:$0xff] }
 0x3b8   : > { %v6088_v4 = vadd.f32 %v9083_v2, %v6087_v30  ;;  %v6712_v41 = vpop.f32.mrb[22].mxu0 }
 0x3b9   : > { %v6204_v49 = vmax.f32 %v6096_v36, 0.0  ;;  %v6099_v57 = vadd.f32 %v6712_v41, %v9083_v2  ;;  %v6090_v39 = vpop.f32.mrb[23].mxu0 }
 0x3ba   : > { %v6202_v47 = vmax.f32 %v6088_v4, 0.0  ;;  %v6091_v32 = vadd.f32 %v9083_v2, %v6090_v39  ;;  %v6246_v4 = vld [vmem:[%s6842_s9 + $0x80] sm:$0xff] }
 0x3bb   : > { %v6268_v5 = vadd.f32 %v6236_v22, %v6204_v49  ;;  %v6205_v43 = vmax.f32 %v6099_v57, 0.0  ;;  %v6249_v57 = vld [vmem:[%s6842_s9 + $0x98] sm:$0xff] }
 0x3bc   : > { %v6266_v26 = vadd.f32 %v6234_v52, %v6202_v47  ;;  %v6203_v23 = vmax.f32 %v6091_v32, 0.0  ;;  %v6247_v32 = vld [vmem:[%s6842_s9 + $0x88] sm:$0xff] }
 0x3bd   : > { %6300 = vst.msk [vmem:[%s9095_s15 + $0x30] sm:$0xff] %vm9578_vm9, %v6268_v5  ;;  %v6269_v9 = vadd.f32 %v6237_v33, %v6205_v43  ;;  %vm9593_vm9 = vmmov %vm9576_vm0 }
 0x3be   : > { %6298 = vst.msk [vmem:[%s9095_s15 + $0x20] sm:$0xff] %vm9579_vm15, %v6266_v26  ;;  %v6267_v45 = vadd.f32 %v6235_v7, %v6203_v23  ;;  %vm9594_vm15 = vmmov %vm9576_vm0 }
 0x3bf   : > { %6301 = vst.msk [vmem:[%s9095_s15 + $0x38] sm:$0xff] %vm9580_vm14, %v6269_v9  ;;  %vm9595_vm14 = vmmov %vm9576_vm0 }
 0x3c0   : > { %6299 = vst.msk [vmem:[%s9095_s15 + $0x28] sm:$0xff] %vm9581_vm3, %v6267_v45  ;;  %vm9596_vm3 = vmmov %vm9576_vm0 }
 0x411   : > { %v6715_v14 = vpop.f32.mrb[24].mxu0 }
 0x412   : > { %v6112_v53 = vadd.f32 %v6715_v14, %v9083_v2  ;;  %v6103_v54 = vpop.f32.mrb[25].mxu0  ;;  %v6252_v14 = vld [vmem:[%s6842_s9 + $0xb0] sm:$0xff] }
 0x413   : > { %v6104_v3 = vadd.f32 %v9083_v2, %v6103_v54  ;;  %v6716_v40 = vpop.f32.mrb[26].mxu0 }
 0x414   : > { %v6208_v10 = vmax.f32 %v6112_v53, 0.0  ;;  %v6115_v13 = vadd.f32 %v6716_v40, %v9083_v2  ;;  %v6106_v50 = vpop.f32.mrb[27].mxu0 }
 0x415   : > { %v6206_v18 = vmax.f32 %v6104_v3, 0.0  ;;  %v6107_v6 = vadd.f32 %v9083_v2, %v6106_v50  ;;  %v6250_v3 = vld [vmem:[%s6842_s9 + $0xa0] sm:$0xff] }
 0x416   : > { %v6272_v59 = vadd.f32 %v6240_v21, %v6208_v10  ;;  %v6209_v19 = vmax.f32 %v6115_v13, 0.0  ;;  %v6253_v13 = vld [vmem:[%s6842_s9 + $0xb8] sm:$0xff] }
 0x417   : > { %v6270_v63 = vadd.f32 %v6238_v44, %v6206_v18  ;;  %v6207_v48 = vmax.f32 %v6107_v6, 0.0  ;;  %v6251_v6 = vld [vmem:[%s6842_s9 + $0xa8] sm:$0xff] }
 0x418   : > { %6304 = vst.msk [vmem:[%s9095_s15 + $0x50] sm:$0xff] %vm9582_vm4, %v6272_v59  ;;  %v6273_v16 = vadd.f32 %v6241_v0, %v6209_v19  ;;  %vm9597_vm4 = vmmov %vm9576_vm0 }
 0x419   : > { %6302 = vst.msk [vmem:[%s9095_s15 + $0x40] sm:$0xff] %vm9583_vm13, %v6270_v63  ;;  %v6271_v28 = vadd.f32 %v6239_v29, %v6207_v48  ;;  %vm9598_vm13 = vmmov %vm9576_vm0 }
 0x41a   : > { %6305 = vst.msk [vmem:[%s9095_s15 + $0x58] sm:$0xff] %vm9584_vm8, %v6273_v16  ;;  %vm9599_vm8 = vmmov %vm9576_vm0 }
 0x41b   : > { %6303 = vst.msk [vmem:[%s9095_s15 + $0x48] sm:$0xff] %vm9585_vm5, %v6271_v28  ;;  %vm9600_vm5 = vmmov %vm9576_vm0 }
 0x421   : > { %v6719_v61 = vpop.f32.mrb[28].mxu0 }
 0x422   : > { %v6128_v27 = vadd.f32 %v6719_v61, %v9083_v2  ;;  %v6119_v60 = vpop.f32.mrb[29].mxu0  ;;  %v6256_v61 = vld [vmem:[%s6842_s9 + $0xd0] sm:$0xff] }
 0x423   : > { %v6120_v12 = vadd.f32 %v9083_v2, %v6119_v60  ;;  %v6720_v55 = vpop.f32.mrb[30].mxu0 }
 0x424   : > { %v6212_v31 = vmax.f32 %v6128_v27, 0.0  ;;  %v6131_v20 = vadd.f32 %v6720_v55, %v9083_v2  ;;  %v6122_v56 = vpop.f32.mrb[31].mxu0 }
 0x425   : > { %v6210_v42 = vmax.f32 %v6120_v12, 0.0  ;;  %v6123_v51 = vadd.f32 %v9083_v2, %v6122_v56  ;;  %v6254_v12 = vld [vmem:[%s6842_s9 + $0xc0] sm:$0xff] }
 0x426   : > { %v6276_v35 = vadd.f32 %v6244_v37, %v6212_v31  ;;  %v6213_v1 = vmax.f32 %v6131_v20, 0.0  ;;  %v6257_v20 = vld [vmem:[%s6842_s9 + $0xd8] sm:$0xff] }
 0x427   : > { %v6274_v11 = vadd.f32 %v6242_v15, %v6210_v42  ;;  %v6211_v24 = vmax.f32 %v6123_v51, 0.0  ;;  %v6255_v51 = vld [vmem:[%s6842_s9 + $0xc8] sm:$0xff] }
 0x428   : > { %6308 = vst.msk [vmem:[%s9095_s15 + $0x70] sm:$0xff] %vm9586_vm11, %v6276_v35  ;;  %v6277_v17 = vadd.f32 %v6245_v46, %v6213_v1  ;;  %vm9601_vm11 = vmmov %vm9576_vm0 }
 0x429   : > { %6306 = vst.msk [vmem:[%s9095_s15 + $0x60] sm:$0xff] %vm9587_vm2, %v6274_v11  ;;  %v6275_v38 = vadd.f32 %v6243_v34, %v6211_v24  ;;  %v6723_v25 = vpop.f32.mrb[32].mxu0  ;;  %vm9602_vm2 = vmmov %vm9576_vm0 }
 0x42a   : > { %6309 = vst.msk [vmem:[%s9095_s15 + $0x78] sm:$0xff] %vm9588_vm10, %v6277_v17  ;;  %v6144_v8 = vadd.f32 %v6723_v25, %v9083_v2  ;;  %v6135_v58 = vpop.f32.mrb[33].mxu0  ;;  %v6260_v25 = vld [vmem:[%s6842_s9 + $0xf0] sm:$0xff]  ;;  %vm9603_vm10 = vmmov %vm9576_vm0 }
 0x42b   : > { %6307 = vst.msk [vmem:[%s9095_s15 + $0x68] sm:$0xff] %vm9589_vm7, %v6275_v38  ;;  %v6136_v36 = vadd.f32 %v9083_v2, %v6135_v58  ;;  %v6724_v30 = vpop.f32.mrb[34].mxu0  ;;  %vm9604_vm7 = vmmov %vm9576_vm0 }
 0x42c   : > { %v6216_v22 = vmax.f32 %v6144_v8, 0.0  ;;  %v6147_v41 = vadd.f32 %v6724_v30, %v9083_v2  ;;  %v6138_v49 = vpop.f32.mrb[35].mxu0 }
 0x42d   : > { %v6214_v52 = vmax.f32 %v6136_v36, 0.0  ;;  %v6139_v39 = vadd.f32 %v9083_v2, %v6138_v49  ;;  %v6258_v36 = vld [vmem:[%s6842_s9 + $0xe0] sm:$0xff] }
 0x42e   : > { %v6280_v47 = vadd.f32 %v6248_v62, %v6216_v22  ;;  %v6217_v33 = vmax.f32 %v6147_v41, 0.0  ;;  %v6261_v41 = vld [vmem:[%s6842_s9 + $0xf8] sm:$0xff] }
 0x42f   : > { %v6278_v5 = vadd.f32 %v6246_v4, %v6214_v52  ;;  %v6215_v43 = vmax.f32 %v6139_v39, 0.0  ;;  %v6259_v39 = vld [vmem:[%s6842_s9 + $0xe8] sm:$0xff] }
 0x430   : > { %6312 = vst.msk [vmem:[%s9095_s15 + $0x90] sm:$0xff] %vm9590_vm12, %v6280_v47  ;;  %v6281_v7 = vadd.f32 %v6249_v57, %v6217_v33 }
 0x431   : > { %6310 = vst.msk [vmem:[%s9095_s15 + $0x80] sm:$0xff] %vm9591_vm1, %v6278_v5  ;;  %v6279_v26 = vadd.f32 %v6247_v32, %v6215_v43  ;;  %v6727_v23 = vpop.f32.mrb[36].mxu0 }
 0x432   : > { %6313 = vst.msk [vmem:[%s9095_s15 + $0x98] sm:$0xff] %vm9576_vm0, %v6281_v7  ;;  %v6160_v9 = vadd.f32 %v6727_v23, %v9083_v2  ;;  %v6151_v45 = vpop.f32.mrb[37].mxu0 }
 0x433   : > { %6311 = vst.msk [vmem:[%s9095_s15 + $0x88] sm:$0xff] %vm9592_vm6, %v6279_v26  ;;  %v6152_v53 = vadd.f32 %v9083_v2, %v6151_v45  ;;  %v6728_v54 = vpop.f32.mrb[38].mxu0 }
 0x434   : > { %v6220_v21 = vmax.f32 %v6160_v9, 0.0  ;;  %v6163_v40 = vadd.f32 %v6728_v54, %v9083_v2  ;;  %v6154_v10 = vpop.f32.mrb[39].mxu0 }
 0x435   : > { %v6218_v44 = vmax.f32 %v6152_v53, 0.0  ;;  %v6155_v50 = vadd.f32 %v9083_v2, %v6154_v10 }
 0x436   : > { %v6284_v18 = vadd.f32 %v6252_v14, %v6220_v21  ;;  %v6221_v0 = vmax.f32 %v6163_v40, 0.0 }
 0x437   : > { %v6282_v59 = vadd.f32 %v6250_v3, %v6218_v44  ;;  %v6219_v19 = vmax.f32 %v6155_v50, 0.0 }
 0x438   : > { %6316 = vst.msk [vmem:[%s9095_s15 + $0xb0] sm:$0xff] %vm9593_vm9, %v6284_v18  ;;  %v6285_v29 = vadd.f32 %v6253_v13, %v6221_v0 }
 0x439   : > { %6314 = vst.msk [vmem:[%s9095_s15 + $0xa0] sm:$0xff] %vm9594_vm15, %v6282_v59  ;;  %v6283_v63 = vadd.f32 %v6251_v6, %v6219_v19  ;;  %v6731_v48 = vpop.f32.mrb[40].mxu0 }
 0x43a   : > { %6317 = vst.msk [vmem:[%s9095_s15 + $0xb8] sm:$0xff] %vm9595_vm14, %v6285_v29  ;;  %v6176_v16 = vadd.f32 %v6731_v48, %v9083_v2  ;;  %v6167_v28 = vpop.f32.mrb[41].mxu0 }
 0x43b   : > { %6315 = vst.msk [vmem:[%s9095_s15 + $0xa8] sm:$0xff] %vm9596_vm3, %v6283_v63  ;;  %v6168_v27 = vadd.f32 %v9083_v2, %v6167_v28  ;;  %v6732_v60 = vpop.f32.mrb[42].mxu0 }
 0x43c   : > { %v6224_v37 = vmax.f32 %v6176_v16, 0.0  ;;  %v6179_v55 = vadd.f32 %v6732_v60, %v9083_v2  ;;  %v6170_v31 = vpop.f32.mrb[43].mxu0 }
 0x43d   : > { %v6222_v15 = vmax.f32 %v6168_v27, 0.0  ;;  %v6171_v56 = vadd.f32 %v9083_v2, %v6170_v31 }
 0x43e   : > { %v6288_v42 = vadd.f32 %v6256_v61, %v6224_v37  ;;  %v6225_v46 = vmax.f32 %v6179_v55, 0.0 }
 0x43f   : > { %v6286_v35 = vadd.f32 %v6254_v12, %v6222_v15  ;;  %v6223_v1 = vmax.f32 %v6171_v56, 0.0 }
 0x440   : > { %6320 = vst.msk [vmem:[%s9095_s15 + $0xd0] sm:$0xff] %vm9597_vm4, %v6288_v42  ;;  %v6289_v34 = vadd.f32 %v6257_v20, %v6225_v46 }
 0x441   : > { %6318 = vst.msk [vmem:[%s9095_s15 + $0xc0] sm:$0xff] %vm9598_vm13, %v6286_v35  ;;  %v6287_v11 = vadd.f32 %v6255_v51, %v6223_v1  ;;  %v6735_v24 = vpop.f32.mrb[44].mxu0 }
 0x442   : > { %6321 = vst.msk [vmem:[%s9095_s15 + $0xd8] sm:$0xff] %vm9599_vm8, %v6289_v34  ;;  %v6192_v17 = vadd.f32 %v6735_v24, %v9083_v2  ;;  %v6183_v38 = vpop.f32.mrb[45].mxu0 }
 0x443   : > { %6319 = vst.msk [vmem:[%s9095_s15 + $0xc8] sm:$0xff] %vm9600_vm5, %v6287_v11  ;;  %v6184_v8 = vadd.f32 %v9083_v2, %v6183_v38  ;;  %v6736_v58 = vpop.f32.mrb[46].mxu0 }
 0x444   : > { %v6228_v62 = vmax.f32 %v6192_v17, 0.0  ;;  %v6195_v30 = vadd.f32 %v6736_v58, %v9083_v2  ;;  %v6186_v22 = vpop.f32.mrb[47].mxu0 }
 0x445   : > { %v6226_v4 = vmax.f32 %v6184_v8, 0.0  ;;  %v6187_v49 = vadd.f32 %v9083_v2, %v6186_v22 }
 0x446   : > { %v6292_v52 = vadd.f32 %v6260_v25, %v6228_v62  ;;  %v6229_v57 = vmax.f32 %v6195_v30, 0.0 }
 0x447   : > { %v6290_v47 = vadd.f32 %v6258_v36, %v6226_v4  ;;  %v6227_v33 = vmax.f32 %v6187_v49, 0.0 }
 0x448   : > { %6324 = vst.msk [vmem:[%s9095_s15 + $0xf0] sm:$0xff] %vm9601_vm11, %v6292_v52  ;;  %v6293_v32 = vadd.f32 %v6261_v41, %v6229_v57 }
 0x449   : > { %6322 = vst.msk [vmem:[%s9095_s15 + $0xe0] sm:$0xff] %vm9602_vm2, %v6290_v47  ;;  %v6291_v5 = vadd.f32 %v6259_v39, %v6227_v33 }
 0x44a   : > { %6325 = vst.msk [vmem:[%s9095_s15 + $0xf8] sm:$0xff] %vm9603_vm10, %v6293_v32 }
 0x44b   : > { %6323 = vst.msk [vmem:[%s9095_s15 + $0xe8] sm:$0xff] %vm9604_vm7, %v6291_v5 }
 0x44c PF: > { %s17_s24 = sadd.s32 1, %s6770_s24  }
 0x44d   : > { %p14_p4 = scmp.ge.s32.totalorder %s17_s24, 4  }
 0x44f   :  { %16 = sbr.rel (!%p14_p4) target bundleno = 1 (0x1), region = 78 }

</bundles_post_ra>
